<compile_context>
chip_gen: v6e
topology: v6e:2x2x1
jax: 0.10.0
libtpu: 0.0.40
codegen_flags: <defaults>
</compile_context>

<pallas_src>
import jax
import jax.numpy as jnp
from jax import lax
from jax.experimental import pallas as pl
from jax.experimental.pallas import tpu as pltpu

# ----------------------------- configuration ------------------------------
T, B = 6, 4      # decode steps (inputs.size(0)), batch
V = 20           # dicts.size()
E = 32           # opt.word_vec_size
H = 32           # opt.rnn_size
S = 8            # source length (attention context)
L = 2            # opt.layers (kernel hard-codes 2 layers)
PAD = 0          # lib.Constants.PAD


# ------------------------------ Pallas kernel ------------------------------
def decoder_kernel(eg_ref, ctx_ref, st_ref, wl_ref, wa_ref, b1_ref, out_seq_ref):
    # eg_ref  : (T, B, 4H) f32   precomputed emb @ W0_emb + b0, gate order [i,f,o,g]
    # ctx_ref : (B, S, H)  f32   attention memory bank
    # st_ref  : (5, B, H)  f32   [h0_l0, c0_l0, h0_l1, c0_l1, out0]
    # wl_ref  : (4, H, 4H) bf16  [W0_feed, W0_h, W1_x, W1_h]  (gate-reordered)
    # wa_ref  : (3, H, H)  bf16  [lin_in.T, w_out[:, :H].T, w_out[:, H:].T]
    # b1_ref  : (1, 4H)    f32   fused layer-1 bias (gate-reordered)
    n_steps = eg_ref.shape[0]

    def gates_to_state(gates, c_prev):
        # Gate columns pre-ordered [i, f, o, g]: activate the whole (B, 4H)
        # vreg on the EUP, then slice the results (no pre-activation slicing).
        sig = jax.nn.sigmoid(gates)
        tg = jnp.tanh(gates)
        i = sig[:, 0 * H:1 * H]
        f = sig[:, 1 * H:2 * H]
        o = sig[:, 2 * H:3 * H]
        g = tg[:, 3 * H:4 * H]
        c_new = f * c_prev + i * g
        h_new = o * jnp.tanh(c_new)
        return h_new, c_new

    def step(t, carry):
        h1, c1, h2, c2, feed = carry

        eg = eg_ref[pl.ds(t, 1)][0]                    # (B, 4H), includes b0

        # ---- StackedLSTM layer 0: emb part hoisted; feed/h parts on MXU ----
        g0 = (eg
              + jnp.dot(feed.astype(jnp.bfloat16), wl_ref[0],
                        preferred_element_type=jnp.float32)
              + jnp.dot(h1.astype(jnp.bfloat16), wl_ref[1],
                        preferred_element_type=jnp.float32))
        h1n, c1n = gates_to_state(g0, c1)

        # ---- StackedLSTM layer 1 (dropout identity between layers) ----
        g1 = (b1_ref[...]
              + jnp.dot(h1n.astype(jnp.bfloat16), wl_ref[2],
                        preferred_element_type=jnp.float32)
              + jnp.dot(h2.astype(jnp.bfloat16), wl_ref[3],
                        preferred_element_type=jnp.float32))
        h2n, c2n = gates_to_state(g1, c2)

        # ---- GlobalAttention ----
        ctx = ctx_ref[...]                                              # (B, S, H)
        h2nb = h2n.astype(jnp.bfloat16)
        target = jnp.dot(h2nb, wa_ref[0],
                         preferred_element_type=jnp.float32)            # (B, H)
        scores = jnp.sum(ctx * target[:, None, :], axis=-1)             # (B, S)
        scores = scores - jnp.max(scores, axis=-1, keepdims=True)
        e = jnp.exp(scores)
        inv = pl.reciprocal(jnp.sum(e, axis=-1, keepdims=True), approx=True)
        attn = e * inv                                                   # softmax
        wctx = jnp.sum(ctx * attn[:, :, None], axis=1)                   # (B, H)
        out = jnp.tanh(
            jnp.dot(wctx.astype(jnp.bfloat16), wa_ref[1],
                    preferred_element_type=jnp.float32)
            + jnp.dot(h2nb, wa_ref[2], preferred_element_type=jnp.float32))

        out_seq_ref[pl.ds(t, 1)] = out[None]           # per-step output
        return (h1n, c1n, h2n, c2n, out)               # out feeds next step

    init = (st_ref[0], st_ref[1], st_ref[2], st_ref[3], st_ref[4])
    lax.fori_loop(0, n_steps, step, init, unroll=True)


# ------------------------------- wrapper -----------------------------------
def tree_decoder_forward(inputs, init_states, params):
    """inputs: (T, B) int32 token ids.  init_states = (emb0, out0, (h0, c0), context)."""
    emb0, out0, (h0, c0), context = init_states

    embs = jnp.take(params["emb"], inputs, axis=0)                 # (T, B, E)
    # emb fed at step t: emb0 at t=0, embs[t-1] afterwards (embs[T-1] unused).
    emb_seq = jnp.concatenate([emb0[None], embs[:-1]], axis=0)     # (T, B, E)

    def reorder(w):
        # PyTorch gate order along 4H is [i, f, g, o]; reorder to [i, f, o, g]
        # so sigmoid covers the first 3H lanes and tanh the last H lanes.
        i, f, g, o = jnp.split(w, 4, axis=-1)
        return jnp.concatenate([i, f, o, g], axis=-1)

    # Layer 0 input is cat([emb, feed], 1); split the weight into blocks.
    W0_emb = reorder(params["w_ih0"][:, :E].T)                     # (E, 4H)
    W0_feed = reorder(params["w_ih0"][:, E:].T)                    # (H, 4H)
    W0_h = reorder(params["w_hh0"].T)                              # (H, 4H)
    b0 = reorder((params["b_ih0"] + params["b_hh0"])[None, :])     # (1, 4H)
    W1_x = reorder(params["w_ih1"].T)                              # (H, 4H)
    W1_h = reorder(params["w_hh1"].T)                              # (H, 4H)
    b1 = reorder((params["b_ih1"] + params["b_hh1"])[None, :])     # (1, 4H)

    # Hoist the embedding matmul out of the recurrence (one big matmul).
    emb_gates = (emb_seq.reshape(T * B, E) @ W0_emb + b0).reshape(T, B, 4 * H)

    # Packed operands (cut the DMA prologue); MXU weights in bf16.
    w_lstm = jnp.stack([W0_feed, W0_h, W1_x, W1_h]).astype(jnp.bfloat16)  # (4, H, 4H)
    w_attn = jnp.stack([params["lin_in"].T,
                        params["w_out"][:, :H].T,
                        params["w_out"][:, H:].T]).astype(jnp.bfloat16)   # (3, H, H)
    state0 = jnp.stack([h0[0], c0[0], h0[1], c0[1], out0])                # (5, B, H)

    # Advisory cost hint so XLA can schedule around the custom call.
    flops = T * (2 * B * (4 * H * 4 * H + 3 * H * H) + 4 * B * S * H)
    transcendentals = T * (4 * B * 4 * H + 2 * B * H + B * S + B)
    bytes_accessed = (emb_gates.size * 4 + context.size * 4 + state0.size * 4
                      + w_lstm.size * 2 + w_attn.size * 2 + b1.size * 4
                      + T * B * H * 4)

    vmem_spec = pl.BlockSpec(memory_space=pltpu.MemorySpace.VMEM)

    # Single grid-less invocation: everything VMEM-resident (<100 KB).
    return pl.pallas_call(
        decoder_kernel,
        out_shape=jax.ShapeDtypeStruct((T, B, H), jnp.float32),
        in_specs=[vmem_spec] * 6,
        out_specs=vmem_spec,
        cost_estimate=pl.CostEstimate(flops=flops,
                                      transcendentals=transcendentals,
                                      bytes_accessed=bytes_accessed),
    )(emb_gates, context, state0, w_lstm, w_attn, b1)


# -------------------------- pure-JAX reference ------------------------------
def reference_forward(inputs, init_states, params):
    emb0, out0, (h0, c0), context = init_states
    embs = jnp.take(params["emb"], inputs, axis=0)

    def lstm_cell(x, h, c, w_ih, w_hh, b_ih, b_hh):
        gates = x @ w_ih.T + b_ih + h @ w_hh.T + b_hh
        i, f, g, o = jnp.split(gates, 4, axis=1)
        c_new = jax.nn.sigmoid(f) * c + jax.nn.sigmoid(i) * jnp.tanh(g)
        h_new = jax.nn.sigmoid(o) * jnp.tanh(c_new)
        return h_new, c_new

    def global_attn(inp, ctx):
        target = inp @ params["lin_in"].T
        a = jax.nn.softmax(jnp.einsum("bsh,bh->bs", ctx, target), axis=-1)
        wc = jnp.einsum("bs,bsh->bh", a, ctx)
        return jnp.tanh(jnp.concatenate([wc, inp], axis=1) @ params["w_out"].T)

    emb, output, h, c = emb0, out0, h0, c0
    outs = []
    for t in range(inputs.shape[0]):
        x = jnp.concatenate([emb, output], axis=1)
        h0n, c0n = lstm_cell(x, h[0], c[0], params["w_ih0"], params["w_hh0"],
                             params["b_ih0"], params["b_hh0"])
        h1n, c1n = lstm_cell(h0n, h[1], c[1], params["w_ih1"], params["w_hh1"],
                             params["b_ih1"], params["b_hh1"])
        h, c = jnp.stack([h0n, h1n]), jnp.stack([c0n, c1n])
        output = global_attn(h1n, context)
        outs.append(output)
        emb = embs[t]
    return jnp.stack(outs)


# ------------------------------ param init ----------------------------------
def init_params(key):
    ks = jax.random.split(key, 11)
    bound = 1.0 / jnp.sqrt(jnp.float32(H))
    u = lambda k, shape: jax.random.uniform(k, shape, jnp.float32, -bound, bound)
    emb = jax.random.normal(ks[0], (V, E), jnp.float32)
    emb = emb.at[PAD].set(0.0)  # nn.Embedding padding_idx
    return dict(
        emb=emb,
        w_ih0=u(ks[1], (4 * H, E + H)), w_hh0=u(ks[2], (4 * H, H)),
        b_ih0=u(ks[3], (4 * H,)), b_hh0=u(ks[4], (4 * H,)),
        w_ih1=u(ks[5], (4 * H, H)), w_hh1=u(ks[6], (4 * H, H)),
        b_ih1=u(ks[7], (4 * H,)), b_hh1=u(ks[8], (4 * H,)),
        lin_in=u(ks[9], (H, H)),
        w_out=u(ks[10], (H, 2 * H)),
    )


if __name__ == "__main__":
    key = jax.random.PRNGKey(0)
    k_params, k_in, k_e, k_o, k_h, k_c, k_ctx = jax.random.split(key, 7)

    params = init_params(k_params)

    inputs = jax.random.randint(k_in, (T, B), 1, V, dtype=jnp.int32)   # (T, B) token ids
    emb0 = jax.random.normal(k_e, (B, E), jnp.float32) * 0.1
    out0 = jax.random.normal(k_o, (B, H), jnp.float32) * 0.1
    h0 = jax.random.normal(k_h, (L, B, H), jnp.float32) * 0.1
    c0 = jax.random.normal(k_c, (L, B, H), jnp.float32) * 0.1
    context = jax.random.normal(k_ctx, (B, S, H), jnp.float32)

    init_states = (emb0, out0, (h0, c0), context)

    out = tree_decoder_forward(inputs, init_states, params)
    out = jax.block_until_ready(out)

    ref = jax.block_until_ready(reference_forward(inputs, init_states, params))

    assert out.shape == (T, B, H), out.shape
    assert bool(jnp.all(jnp.isfinite(out)))
    # Tolerance widened slightly vs. f32 reference: MXU operands are bf16.
    assert bool(jnp.allclose(out, ref, atol=2e-2, rtol=2e-2)), (
        float(jnp.max(jnp.abs(out - ref))))

    print("KERNEL_OK")
</pallas_src>

<mosaic_0001>
module attributes {stable_mosaic.version = 11 : i64} {
  func.func @decoder_kernel(%arg0: memref<6x4x128xf32, #tpu.memory_space<vmem>>, %arg1: memref<4x8x32xf32, #tpu.memory_space<vmem>>, %arg2: memref<5x4x32xf32, #tpu.memory_space<vmem>>, %arg3: memref<4x32x128xbf16, #tpu.memory_space<vmem>>, %arg4: memref<3x32x32xbf16, #tpu.memory_space<vmem>>, %arg5: memref<1x128xf32, #tpu.memory_space<vmem>>, %arg6: memref<6x4x32xf32, #tpu.memory_space<vmem>>) attributes {dimension_semantics = [], scalar_prefetch = 0 : i64, scratch_operands = 0 : i64, tpu.core_type = #tpu.core_type<tc>} {
    %c0 = arith.constant 0 : index
    %c0_0 = arith.constant 0 : index
    %c0_1 = arith.constant 0 : index
    %0 = vector.load %arg2[%c0, %c0_0, %c0_1] : memref<5x4x32xf32, #tpu.memory_space<vmem>>, vector<1x4x32xf32>
    %1 = vector.shape_cast %0 : vector<1x4x32xf32> to vector<4x32xf32>
    %c1 = arith.constant 1 : index
    %c0_2 = arith.constant 0 : index
    %c0_3 = arith.constant 0 : index
    %2 = vector.load %arg2[%c1, %c0_2, %c0_3] : memref<5x4x32xf32, #tpu.memory_space<vmem>>, vector<1x4x32xf32>
    %3 = vector.shape_cast %2 : vector<1x4x32xf32> to vector<4x32xf32>
    %c2 = arith.constant 2 : index
    %c0_4 = arith.constant 0 : index
    %c0_5 = arith.constant 0 : index
    %4 = vector.load %arg2[%c2, %c0_4, %c0_5] : memref<5x4x32xf32, #tpu.memory_space<vmem>>, vector<1x4x32xf32>
    %5 = vector.shape_cast %4 : vector<1x4x32xf32> to vector<4x32xf32>
    %c3 = arith.constant 3 : index
    %c0_6 = arith.constant 0 : index
    %c0_7 = arith.constant 0 : index
    %6 = vector.load %arg2[%c3, %c0_6, %c0_7] : memref<5x4x32xf32, #tpu.memory_space<vmem>>, vector<1x4x32xf32>
    %7 = vector.shape_cast %6 : vector<1x4x32xf32> to vector<4x32xf32>
    %c4 = arith.constant 4 : index
    %c0_8 = arith.constant 0 : index
    %c0_9 = arith.constant 0 : index
    %8 = vector.load %arg2[%c4, %c0_8, %c0_9] : memref<5x4x32xf32, #tpu.memory_space<vmem>>, vector<1x4x32xf32>
    %9 = vector.shape_cast %8 : vector<1x4x32xf32> to vector<4x32xf32>
    %c0_i32 = arith.constant 0 : i32
    %10 = arith.index_cast %c0_i32 : i32 to index
    %c0_10 = arith.constant 0 : index
    %c0_11 = arith.constant 0 : index
    %11 = vector.load %arg0[%10, %c0_10, %c0_11] : memref<6x4x128xf32, #tpu.memory_space<vmem>>, vector<1x4x128xf32>
    %12 = vector.shape_cast %11 : vector<1x4x128xf32> to vector<4x128xf32>
    %13 = arith.truncf %9 : vector<4x32xf32> to vector<4x32xbf16>
    %c0_12 = arith.constant 0 : index
    %c0_13 = arith.constant 0 : index
    %c0_14 = arith.constant 0 : index
    %14 = vector.load %arg3[%c0_12, %c0_13, %c0_14] : memref<4x32x128xbf16, #tpu.memory_space<vmem>>, vector<1x32x128xbf16>
    %15 = vector.shape_cast %14 : vector<1x32x128xbf16> to vector<32x128xbf16>
    %cst = arith.constant dense<0.000000e+00> : vector<4x128xf32>
    %16 = tpu.matmul %13, %15, %cst {dimension_numbers = #tpu.dot_dimension_numbers<[1], [0], [0], [1], [0, 0, 1, 1], [], []>} : vector<4x32xbf16>, vector<32x128xbf16>, vector<4x128xf32> -> vector<4x128xf32>
    %17 = arith.addf %12, %16 : vector<4x128xf32>
    %18 = arith.truncf %1 : vector<4x32xf32> to vector<4x32xbf16>
    %c1_15 = arith.constant 1 : index
    %c0_16 = arith.constant 0 : index
    %c0_17 = arith.constant 0 : index
    %19 = vector.load %arg3[%c1_15, %c0_16, %c0_17] : memref<4x32x128xbf16, #tpu.memory_space<vmem>>, vector<1x32x128xbf16>
    %20 = vector.shape_cast %19 : vector<1x32x128xbf16> to vector<32x128xbf16>
    %cst_18 = arith.constant dense<0.000000e+00> : vector<4x128xf32>
    %21 = tpu.matmul %18, %20, %cst_18 {dimension_numbers = #tpu.dot_dimension_numbers<[1], [0], [0], [1], [0, 0, 1, 1], [], []>} : vector<4x32xbf16>, vector<32x128xbf16>, vector<4x128xf32> -> vector<4x128xf32>
    %22 = arith.addf %17, %21 : vector<4x128xf32>
    %23 = arith.negf %22 : vector<4x128xf32>
    %24 = math.exp %23 : vector<4x128xf32>
    %cst_19 = arith.constant 1.000000e+00 : f32
    %25 = vector.broadcast %cst_19 : f32 to vector<4x128xf32>
    %26 = arith.addf %25, %24 : vector<4x128xf32>
    %27 = arith.divf %25, %26 : vector<4x128xf32>
    %28 = math.tanh %22 : vector<4x128xf32>
    %29 = vector.extract_strided_slice %27 {offsets = [0, 0], sizes = [4, 32], strides = [1, 1]} : vector<4x128xf32> to vector<4x32xf32>
    %30 = vector.extract_strided_slice %27 {offsets = [0, 32], sizes = [4, 32], strides = [1, 1]} : vector<4x128xf32> to vector<4x32xf32>
    %31 = vector.extract_strided_slice %27 {offsets = [0, 64], sizes = [4, 32], strides = [1, 1]} : vector<4x128xf32> to vector<4x32xf32>
    %32 = vector.extract_strided_slice %28 {offsets = [0, 96], sizes = [4, 32], strides = [1, 1]} : vector<4x128xf32> to vector<4x32xf32>
    %33 = arith.mulf %30, %3 : vector<4x32xf32>
    %34 = arith.mulf %29, %32 : vector<4x32xf32>
    %35 = arith.addf %33, %34 : vector<4x32xf32>
    %36 = math.tanh %35 : vector<4x32xf32>
    %37 = arith.mulf %31, %36 : vector<4x32xf32>
    %c0_20 = arith.constant 0 : index
    %c0_21 = arith.constant 0 : index
    %38 = vector.load %arg5[%c0_20, %c0_21] : memref<1x128xf32, #tpu.memory_space<vmem>>, vector<1x128xf32>
    %39 = arith.truncf %37 : vector<4x32xf32> to vector<4x32xbf16>
    %c2_22 = arith.constant 2 : index
    %c0_23 = arith.constant 0 : index
    %c0_24 = arith.constant 0 : index
    %40 = vector.load %arg3[%c2_22, %c0_23, %c0_24] : memref<4x32x128xbf16, #tpu.memory_space<vmem>>, vector<1x32x128xbf16>
    %41 = vector.shape_cast %40 : vector<1x32x128xbf16> to vector<32x128xbf16>
    %cst_25 = arith.constant dense<0.000000e+00> : vector<4x128xf32>
    %42 = tpu.matmul %39, %41, %cst_25 {dimension_numbers = #tpu.dot_dimension_numbers<[1], [0], [0], [1], [0, 0, 1, 1], [], []>} : vector<4x32xbf16>, vector<32x128xbf16>, vector<4x128xf32> -> vector<4x128xf32>
    %43 = vector.broadcast %38 : vector<1x128xf32> to vector<4x128xf32>
    %44 = arith.addf %43, %42 : vector<4x128xf32>
    %45 = arith.truncf %5 : vector<4x32xf32> to vector<4x32xbf16>
    %c3_26 = arith.constant 3 : index
    %c0_27 = arith.constant 0 : index
    %c0_28 = arith.constant 0 : index
    %46 = vector.load %arg3[%c3_26, %c0_27, %c0_28] : memref<4x32x128xbf16, #tpu.memory_space<vmem>>, vector<1x32x128xbf16>
    %47 = vector.shape_cast %46 : vector<1x32x128xbf16> to vector<32x128xbf16>
    %cst_29 = arith.constant dense<0.000000e+00> : vector<4x128xf32>
    %48 = tpu.matmul %45, %47, %cst_29 {dimension_numbers = #tpu.dot_dimension_numbers<[1], [0], [0], [1], [0, 0, 1, 1], [], []>} : vector<4x32xbf16>, vector<32x128xbf16>, vector<4x128xf32> -> vector<4x128xf32>
    %49 = arith.addf %44, %48 : vector<4x128xf32>
    %50 = arith.negf %49 : vector<4x128xf32>
    %51 = math.exp %50 : vector<4x128xf32>
    %cst_30 = arith.constant 1.000000e+00 : f32
    %52 = vector.broadcast %cst_30 : f32 to vector<4x128xf32>
    %53 = arith.addf %52, %51 : vector<4x128xf32>
    %54 = arith.divf %52, %53 : vector<4x128xf32>
    %55 = math.tanh %49 : vector<4x128xf32>
    %56 = vector.extract_strided_slice %54 {offsets = [0, 0], sizes = [4, 32], strides = [1, 1]} : vector<4x128xf32> to vector<4x32xf32>
    %57 = vector.extract_strided_slice %54 {offsets = [0, 32], sizes = [4, 32], strides = [1, 1]} : vector<4x128xf32> to vector<4x32xf32>
    %58 = vector.extract_strided_slice %54 {offsets = [0, 64], sizes = [4, 32], strides = [1, 1]} : vector<4x128xf32> to vector<4x32xf32>
    %59 = vector.extract_strided_slice %55 {offsets = [0, 96], sizes = [4, 32], strides = [1, 1]} : vector<4x128xf32> to vector<4x32xf32>
    %60 = arith.mulf %57, %7 : vector<4x32xf32>
    %61 = arith.mulf %56, %59 : vector<4x32xf32>
    %62 = arith.addf %60, %61 : vector<4x32xf32>
    %63 = math.tanh %62 : vector<4x32xf32>
    %64 = arith.mulf %58, %63 : vector<4x32xf32>
    %c0_31 = arith.constant 0 : index
    %c0_32 = arith.constant 0 : index
    %c0_33 = arith.constant 0 : index
    %65 = vector.load %arg1[%c0_31, %c0_32, %c0_33] : memref<4x8x32xf32, #tpu.memory_space<vmem>>, vector<4x8x32xf32>
    %66 = arith.truncf %64 : vector<4x32xf32> to vector<4x32xbf16>
    %c0_34 = arith.constant 0 : index
    %c0_35 = arith.constant 0 : index
    %c0_36 = arith.constant 0 : index
    %67 = vector.load %arg4[%c0_34, %c0_35, %c0_36] : memref<3x32x32xbf16, #tpu.memory_space<vmem>>, vector<1x32x32xbf16>
    %68 = vector.shape_cast %67 : vector<1x32x32xbf16> to vector<32x32xbf16>
    %cst_37 = arith.constant dense<0.000000e+00> : vector<4x32xf32>
    %69 = tpu.matmul %66, %68, %cst_37 {dimension_numbers = #tpu.dot_dimension_numbers<[1], [0], [0], [1], [0, 0, 1, 1], [], []>} : vector<4x32xbf16>, vector<32x32xbf16>, vector<4x32xf32> -> vector<4x32xf32>
    %70 = vector.shape_cast %69 : vector<4x32xf32> to vector<4x1x32xf32>
    %71 = vector.broadcast %70 : vector<4x1x32xf32> to vector<4x8x32xf32>
    %72 = arith.mulf %65, %71 : vector<4x8x32xf32>
    %cst_38 = arith.constant dense<0.000000e+00> : vector<4x8xf32>
    %73 = vector.multi_reduction <add>, %72, %cst_38 [2] : vector<4x8x32xf32> to vector<4x8xf32>
    %cst_39 = arith.constant dense<0xFF800000> : vector<4xf32>
    %74 = vector.multi_reduction <maximumf>, %73, %cst_39 [1] : vector<4x8xf32> to vector<4xf32>
    %75 = vector.shape_cast %74 : vector<4xf32> to vector<4x1xf32>
    %76 = vector.broadcast %75 : vector<4x1xf32> to vector<4x8xf32>
    %77 = arith.subf %73, %76 : vector<4x8xf32>
    %78 = math.exp %77 : vector<4x8xf32>
    %cst_40 = arith.constant dense<0.000000e+00> : vector<4xf32>
    %79 = vector.multi_reduction <add>, %78, %cst_40 [1] : vector<4x8xf32> to vector<4xf32>
    %80 = vector.shape_cast %79 : vector<4xf32> to vector<4x1xf32>
    %81 = tpu.reciprocal %80 {approx = true} : vector<4x1xf32> -> vector<4x1xf32>
    %82 = vector.broadcast %81 : vector<4x1xf32> to vector<4x8xf32>
    %83 = arith.mulf %78, %82 : vector<4x8xf32>
    %84 = vector.shape_cast %83 : vector<4x8xf32> to vector<4x8x1xf32>
    %85 = vector.broadcast %84 : vector<4x8x1xf32> to vector<4x8x32xf32>
    %86 = arith.mulf %65, %85 : vector<4x8x32xf32>
    %cst_41 = arith.constant dense<0.000000e+00> : vector<4x32xf32>
    %87 = vector.multi_reduction <add>, %86, %cst_41 [1] : vector<4x8x32xf32> to vector<4x32xf32>
    %88 = arith.truncf %87 : vector<4x32xf32> to vector<4x32xbf16>
    %c1_42 = arith.constant 1 : index
    %c0_43 = arith.constant 0 : index
    %c0_44 = arith.constant 0 : index
    %89 = vector.load %arg4[%c1_42, %c0_43, %c0_44] : memref<3x32x32xbf16, #tpu.memory_space<vmem>>, vector<1x32x32xbf16>
    %90 = vector.shape_cast %89 : vector<1x32x32xbf16> to vector<32x32xbf16>
    %cst_45 = arith.constant dense<0.000000e+00> : vector<4x32xf32>
    %91 = tpu.matmul %88, %90, %cst_45 {dimension_numbers = #tpu.dot_dimension_numbers<[1], [0], [0], [1], [0, 0, 1, 1], [], []>} : vector<4x32xbf16>, vector<32x32xbf16>, vector<4x32xf32> -> vector<4x32xf32>
    %c2_46 = arith.constant 2 : index
    %c0_47 = arith.constant 0 : index
    %c0_48 = arith.constant 0 : index
    %92 = vector.load %arg4[%c2_46, %c0_47, %c0_48] : memref<3x32x32xbf16, #tpu.memory_space<vmem>>, vector<1x32x32xbf16>
    %93 = vector.shape_cast %92 : vector<1x32x32xbf16> to vector<32x32xbf16>
    %cst_49 = arith.constant dense<0.000000e+00> : vector<4x32xf32>
    %94 = tpu.matmul %66, %93, %cst_49 {dimension_numbers = #tpu.dot_dimension_numbers<[1], [0], [0], [1], [0, 0, 1, 1], [], []>} : vector<4x32xbf16>, vector<32x32xbf16>, vector<4x32xf32> -> vector<4x32xf32>
    %95 = arith.addf %91, %94 : vector<4x32xf32>
    %96 = math.tanh %95 : vector<4x32xf32>
    %97 = vector.shape_cast %96 : vector<4x32xf32> to vector<1x4x32xf32>
    %98 = arith.index_cast %c0_i32 : i32 to index
    %c0_50 = arith.constant 0 : index
    %c0_51 = arith.constant 0 : index
    %99 = vector.load %arg6[%98, %c0_50, %c0_51] : memref<6x4x32xf32, #tpu.memory_space<vmem>>, vector<1x4x32xf32>
    tpu.vector_store %arg6[%98, %c0_50, %c0_51], %97 {strides = array<i32>} : memref<6x4x32xf32, #tpu.memory_space<vmem>>, vector<1x4x32xf32>,
    %c1_i32 = arith.constant 1 : i32
    %100 = arith.index_cast %c1_i32 : i32 to index
    %c0_52 = arith.constant 0 : index
    %c0_53 = arith.constant 0 : index
    %101 = vector.load %arg0[%100, %c0_52, %c0_53] : memref<6x4x128xf32, #tpu.memory_space<vmem>>, vector<1x4x128xf32>
    %102 = vector.shape_cast %101 : vector<1x4x128xf32> to vector<4x128xf32>
    %103 = arith.truncf %96 : vector<4x32xf32> to vector<4x32xbf16>
    %c0_54 = arith.constant 0 : index
    %c0_55 = arith.constant 0 : index
    %c0_56 = arith.constant 0 : index
    %104 = vector.load %arg3[%c0_54, %c0_55, %c0_56] : memref<4x32x128xbf16, #tpu.memory_space<vmem>>, vector<1x32x128xbf16>
    %105 = vector.shape_cast %104 : vector<1x32x128xbf16> to vector<32x128xbf16>
    %cst_57 = arith.constant dense<0.000000e+00> : vector<4x128xf32>
    %106 = tpu.matmul %103, %105, %cst_57 {dimension_numbers = #tpu.dot_dimension_numbers<[1], [0], [0], [1], [0, 0, 1, 1], [], []>} : vector<4x32xbf16>, vector<32x128xbf16>, vector<4x128xf32> -> vector<4x128xf32>
    %107 = arith.addf %102, %106 : vector<4x128xf32>
    %108 = arith.truncf %37 : vector<4x32xf32> to vector<4x32xbf16>
    %c1_58 = arith.constant 1 : index
    %c0_59 = arith.constant 0 : index
    %c0_60 = arith.constant 0 : index
    %109 = vector.load %arg3[%c1_58, %c0_59, %c0_60] : memref<4x32x128xbf16, #tpu.memory_space<vmem>>, vector<1x32x128xbf16>
    %110 = vector.shape_cast %109 : vector<1x32x128xbf16> to vector<32x128xbf16>
    %cst_61 = arith.constant dense<0.000000e+00> : vector<4x128xf32>
    %111 = tpu.matmul %108, %110, %cst_61 {dimension_numbers = #tpu.dot_dimension_numbers<[1], [0], [0], [1], [0, 0, 1, 1], [], []>} : vector<4x32xbf16>, vector<32x128xbf16>, vector<4x128xf32> -> vector<4x128xf32>
    %112 = arith.addf %107, %111 : vector<4x128xf32>
    %113 = arith.negf %112 : vector<4x128xf32>
    %114 = math.exp %113 : vector<4x128xf32>
    %cst_62 = arith.constant 1.000000e+00 : f32
    %115 = vector.broadcast %cst_62 : f32 to vector<4x128xf32>
    %116 = arith.addf %115, %114 : vector<4x128xf32>
    %117 = arith.divf %115, %116 : vector<4x128xf32>
    %118 = math.tanh %112 : vector<4x128xf32>
    %119 = vector.extract_strided_slice %117 {offsets = [0, 0], sizes = [4, 32], strides = [1, 1]} : vector<4x128xf32> to vector<4x32xf32>
    %120 = vector.extract_strided_slice %117 {offsets = [0, 32], sizes = [4, 32], strides = [1, 1]} : vector<4x128xf32> to vector<4x32xf32>
    %121 = vector.extract_strided_slice %117 {offsets = [0, 64], sizes = [4, 32], strides = [1, 1]} : vector<4x128xf32> to vector<4x32xf32>
    %122 = vector.extract_strided_slice %118 {offsets = [0, 96], sizes = [4, 32], strides = [1, 1]} : vector<4x128xf32> to vector<4x32xf32>
    %123 = arith.mulf %120, %35 : vector<4x32xf32>
    %124 = arith.mulf %119, %122 : vector<4x32xf32>
    %125 = arith.addf %123, %124 : vector<4x32xf32>
    %126 = math.tanh %125 : vector<4x32xf32>
    %127 = arith.mulf %121, %126 : vector<4x32xf32>
    %c0_63 = arith.constant 0 : index
    %c0_64 = arith.constant 0 : index
    %128 = vector.load %arg5[%c0_63, %c0_64] : memref<1x128xf32, #tpu.memory_space<vmem>>, vector<1x128xf32>
    %129 = arith.truncf %127 : vector<4x32xf32> to vector<4x32xbf16>
    %c2_65 = arith.constant 2 : index
    %c0_66 = arith.constant 0 : index
    %c0_67 = arith.constant 0 : index
    %130 = vector.load %arg3[%c2_65, %c0_66, %c0_67] : memref<4x32x128xbf16, #tpu.memory_space<vmem>>, vector<1x32x128xbf16>
    %131 = vector.shape_cast %130 : vector<1x32x128xbf16> to vector<32x128xbf16>
    %cst_68 = arith.constant dense<0.000000e+00> : vector<4x128xf32>
    %132 = tpu.matmul %129, %131, %cst_68 {dimension_numbers = #tpu.dot_dimension_numbers<[1], [0], [0], [1], [0, 0, 1, 1], [], []>} : vector<4x32xbf16>, vector<32x128xbf16>, vector<4x128xf32> -> vector<4x128xf32>
    %133 = vector.broadcast %128 : vector<1x128xf32> to vector<4x128xf32>
    %134 = arith.addf %133, %132 : vector<4x128xf32>
    %135 = arith.truncf %64 : vector<4x32xf32> to vector<4x32xbf16>
    %c3_69 = arith.constant 3 : index
    %c0_70 = arith.constant 0 : index
    %c0_71 = arith.constant 0 : index
    %136 = vector.load %arg3[%c3_69, %c0_70, %c0_71] : memref<4x32x128xbf16, #tpu.memory_space<vmem>>, vector<1x32x128xbf16>
    %137 = vector.shape_cast %136 : vector<1x32x128xbf16> to vector<32x128xbf16>
    %cst_72 = arith.constant dense<0.000000e+00> : vector<4x128xf32>
    %138 = tpu.matmul %135, %137, %cst_72 {dimension_numbers = #tpu.dot_dimension_numbers<[1], [0], [0], [1], [0, 0, 1, 1], [], []>} : vector<4x32xbf16>, vector<32x128xbf16>, vector<4x128xf32> -> vector<4x128xf32>
    %139 = arith.addf %134, %138 : vector<4x128xf32>
    %140 = arith.negf %139 : vector<4x128xf32>
    %141 = math.exp %140 : vector<4x128xf32>
    %cst_73 = arith.constant 1.000000e+00 : f32
    %142 = vector.broadcast %cst_73 : f32 to vector<4x128xf32>
    %143 = arith.addf %142, %141 : vector<4x128xf32>
    %144 = arith.divf %142, %143 : vector<4x128xf32>
    %145 = math.tanh %139 : vector<4x128xf32>
    %146 = vector.extract_strided_slice %144 {offsets = [0, 0], sizes = [4, 32], strides = [1, 1]} : vector<4x128xf32> to vector<4x32xf32>
    %147 = vector.extract_strided_slice %144 {offsets = [0, 32], sizes = [4, 32], strides = [1, 1]} : vector<4x128xf32> to vector<4x32xf32>
    %148 = vector.extract_strided_slice %144 {offsets = [0, 64], sizes = [4, 32], strides = [1, 1]} : vector<4x128xf32> to vector<4x32xf32>
    %149 = vector.extract_strided_slice %145 {offsets = [0, 96], sizes = [4, 32], strides = [1, 1]} : vector<4x128xf32> to vector<4x32xf32>
    %150 = arith.mulf %147, %62 : vector<4x32xf32>
    %151 = arith.mulf %146, %149 : vector<4x32xf32>
    %152 = arith.addf %150, %151 : vector<4x32xf32>
    %153 = math.tanh %152 : vector<4x32xf32>
    %154 = arith.mulf %148, %153 : vector<4x32xf32>
    %c0_74 = arith.constant 0 : index
    %c0_75 = arith.constant 0 : index
    %c0_76 = arith.constant 0 : index
    %155 = vector.load %arg1[%c0_74, %c0_75, %c0_76] : memref<4x8x32xf32, #tpu.memory_space<vmem>>, vector<4x8x32xf32>
    %156 = arith.truncf %154 : vector<4x32xf32> to vector<4x32xbf16>
    %c0_77 = arith.constant 0 : index
    %c0_78 = arith.constant 0 : index
    %c0_79 = arith.constant 0 : index
    %157 = vector.load %arg4[%c0_77, %c0_78, %c0_79] : memref<3x32x32xbf16, #tpu.memory_space<vmem>>, vector<1x32x32xbf16>
    %158 = vector.shape_cast %157 : vector<1x32x32xbf16> to vector<32x32xbf16>
    %cst_80 = arith.constant dense<0.000000e+00> : vector<4x32xf32>
    %159 = tpu.matmul %156, %158, %cst_80 {dimension_numbers = #tpu.dot_dimension_numbers<[1], [0], [0], [1], [0, 0, 1, 1], [], []>} : vector<4x32xbf16>, vector<32x32xbf16>, vector<4x32xf32> -> vector<4x32xf32>
    %160 = vector.shape_cast %159 : vector<4x32xf32> to vector<4x1x32xf32>
    %161 = vector.broadcast %160 : vector<4x1x32xf32> to vector<4x8x32xf32>
    %162 = arith.mulf %155, %161 : vector<4x8x32xf32>
    %cst_81 = arith.constant dense<0.000000e+00> : vector<4x8xf32>
    %163 = vector.multi_reduction <add>, %162, %cst_81 [2] : vector<4x8x32xf32> to vector<4x8xf32>
    %cst_82 = arith.constant dense<0xFF800000> : vector<4xf32>
    %164 = vector.multi_reduction <maximumf>, %163, %cst_82 [1] : vector<4x8xf32> to vector<4xf32>
    %165 = vector.shape_cast %164 : vector<4xf32> to vector<4x1xf32>
    %166 = vector.broadcast %165 : vector<4x1xf32> to vector<4x8xf32>
    %167 = arith.subf %163, %166 : vector<4x8xf32>
    %168 = math.exp %167 : vector<4x8xf32>
    %cst_83 = arith.constant dense<0.000000e+00> : vector<4xf32>
    %169 = vector.multi_reduction <add>, %168, %cst_83 [1] : vector<4x8xf32> to vector<4xf32>
    %170 = vector.shape_cast %169 : vector<4xf32> to vector<4x1xf32>
    %171 = tpu.reciprocal %170 {approx = true} : vector<4x1xf32> -> vector<4x1xf32>
    %172 = vector.broadcast %171 : vector<4x1xf32> to vector<4x8xf32>
    %173 = arith.mulf %168, %172 : vector<4x8xf32>
    %174 = vector.shape_cast %173 : vector<4x8xf32> to vector<4x8x1xf32>
    %175 = vector.broadcast %174 : vector<4x8x1xf32> to vector<4x8x32xf32>
    %176 = arith.mulf %155, %175 : vector<4x8x32xf32>
    %cst_84 = arith.constant dense<0.000000e+00> : vector<4x32xf32>
    %177 = vector.multi_reduction <add>, %176, %cst_84 [1] : vector<4x8x32xf32> to vector<4x32xf32>
    %178 = arith.truncf %177 : vector<4x32xf32> to vector<4x32xbf16>
    %c1_85 = arith.constant 1 : index
    %c0_86 = arith.constant 0 : index
    %c0_87 = arith.constant 0 : index
    %179 = vector.load %arg4[%c1_85, %c0_86, %c0_87] : memref<3x32x32xbf16, #tpu.memory_space<vmem>>, vector<1x32x32xbf16>
    %180 = vector.shape_cast %179 : vector<1x32x32xbf16> to vector<32x32xbf16>
    %cst_88 = arith.constant dense<0.000000e+00> : vector<4x32xf32>
    %181 = tpu.matmul %178, %180, %cst_88 {dimension_numbers = #tpu.dot_dimension_numbers<[1], [0], [0], [1], [0, 0, 1, 1], [], []>} : vector<4x32xbf16>, vector<32x32xbf16>, vector<4x32xf32> -> vector<4x32xf32>
    %c2_89 = arith.constant 2 : index
    %c0_90 = arith.constant 0 : index
    %c0_91 = arith.constant 0 : index
    %182 = vector.load %arg4[%c2_89, %c0_90, %c0_91] : memref<3x32x32xbf16, #tpu.memory_space<vmem>>, vector<1x32x32xbf16>
    %183 = vector.shape_cast %182 : vector<1x32x32xbf16> to vector<32x32xbf16>
    %cst_92 = arith.constant dense<0.000000e+00> : vector<4x32xf32>
    %184 = tpu.matmul %156, %183, %cst_92 {dimension_numbers = #tpu.dot_dimension_numbers<[1], [0], [0], [1], [0, 0, 1, 1], [], []>} : vector<4x32xbf16>, vector<32x32xbf16>, vector<4x32xf32> -> vector<4x32xf32>
    %185 = arith.addf %181, %184 : vector<4x32xf32>
    %186 = math.tanh %185 : vector<4x32xf32>
    %187 = vector.shape_cast %186 : vector<4x32xf32> to vector<1x4x32xf32>
    %188 = arith.index_cast %c1_i32 : i32 to index
    %c0_93 = arith.constant 0 : index
    %c0_94 = arith.constant 0 : index
    %189 = vector.load %arg6[%188, %c0_93, %c0_94] : memref<6x4x32xf32, #tpu.memory_space<vmem>>, vector<1x4x32xf32>
    tpu.vector_store %arg6[%188, %c0_93, %c0_94], %187 {strides = array<i32>} : memref<6x4x32xf32, #tpu.memory_space<vmem>>, vector<1x4x32xf32>,
    %c2_i32 = arith.constant 2 : i32
    %190 = arith.index_cast %c2_i32 : i32 to index
    %c0_95 = arith.constant 0 : index
    %c0_96 = arith.constant 0 : index
    %191 = vector.load %arg0[%190, %c0_95, %c0_96] : memref<6x4x128xf32, #tpu.memory_space<vmem>>, vector<1x4x128xf32>
    %192 = vector.shape_cast %191 : vector<1x4x128xf32> to vector<4x128xf32>
    %193 = arith.truncf %186 : vector<4x32xf32> to vector<4x32xbf16>
    %c0_97 = arith.constant 0 : index
    %c0_98 = arith.constant 0 : index
    %c0_99 = arith.constant 0 : index
    %194 = vector.load %arg3[%c0_97, %c0_98, %c0_99] : memref<4x32x128xbf16, #tpu.memory_space<vmem>>, vector<1x32x128xbf16>
    %195 = vector.shape_cast %194 : vector<1x32x128xbf16> to vector<32x128xbf16>
    %cst_100 = arith.constant dense<0.000000e+00> : vector<4x128xf32>
    %196 = tpu.matmul %193, %195, %cst_100 {dimension_numbers = #tpu.dot_dimension_numbers<[1], [0], [0], [1], [0, 0, 1, 1], [], []>} : vector<4x32xbf16>, vector<32x128xbf16>, vector<4x128xf32> -> vector<4x128xf32>
    %197 = arith.addf %192, %196 : vector<4x128xf32>
    %198 = arith.truncf %127 : vector<4x32xf32> to vector<4x32xbf16>
    %c1_101 = arith.constant 1 : index
    %c0_102 = arith.constant 0 : index
    %c0_103 = arith.constant 0 : index
    %199 = vector.load %arg3[%c1_101, %c0_102, %c0_103] : memref<4x32x128xbf16, #tpu.memory_space<vmem>>, vector<1x32x128xbf16>
    %200 = vector.shape_cast %199 : vector<1x32x128xbf16> to vector<32x128xbf16>
    %cst_104 = arith.constant dense<0.000000e+00> : vector<4x128xf32>
    %201 = tpu.matmul %198, %200, %cst_104 {dimension_numbers = #tpu.dot_dimension_numbers<[1], [0], [0], [1], [0, 0, 1, 1], [], []>} : vector<4x32xbf16>, vector<32x128xbf16>, vector<4x128xf32> -> vector<4x128xf32>
    %202 = arith.addf %197, %201 : vector<4x128xf32>
    %203 = arith.negf %202 : vector<4x128xf32>
    %204 = math.exp %203 : vector<4x128xf32>
    %cst_105 = arith.constant 1.000000e+00 : f32
    %205 = vector.broadcast %cst_105 : f32 to vector<4x128xf32>
    %206 = arith.addf %205, %204 : vector<4x128xf32>
    %207 = arith.divf %205, %206 : vector<4x128xf32>
    %208 = math.tanh %202 : vector<4x128xf32>
    %209 = vector.extract_strided_slice %207 {offsets = [0, 0], sizes = [4, 32], strides = [1, 1]} : vector<4x128xf32> to vector<4x32xf32>
    %210 = vector.extract_strided_slice %207 {offsets = [0, 32], sizes = [4, 32], strides = [1, 1]} : vector<4x128xf32> to vector<4x32xf32>
    %211 = vector.extract_strided_slice %207 {offsets = [0, 64], sizes = [4, 32], strides = [1, 1]} : vector<4x128xf32> to vector<4x32xf32>
    %212 = vector.extract_strided_slice %208 {offsets = [0, 96], sizes = [4, 32], strides = [1, 1]} : vector<4x128xf32> to vector<4x32xf32>
    %213 = arith.mulf %210, %125 : vector<4x32xf32>
    %214 = arith.mulf %209, %212 : vector<4x32xf32>
    %215 = arith.addf %213, %214 : vector<4x32xf32>
    %216 = math.tanh %215 : vector<4x32xf32>
    %217 = arith.mulf %211, %216 : vector<4x32xf32>
    %c0_106 = arith.constant 0 : index
    %c0_107 = arith.constant 0 : index
    %218 = vector.load %arg5[%c0_106, %c0_107] : memref<1x128xf32, #tpu.memory_space<vmem>>, vector<1x128xf32>
    %219 = arith.truncf %217 : vector<4x32xf32> to vector<4x32xbf16>
    %c2_108 = arith.constant 2 : index
    %c0_109 = arith.constant 0 : index
    %c0_110 = arith.constant 0 : index
    %220 = vector.load %arg3[%c2_108, %c0_109, %c0_110] : memref<4x32x128xbf16, #tpu.memory_space<vmem>>, vector<1x32x128xbf16>
    %221 = vector.shape_cast %220 : vector<1x32x128xbf16> to vector<32x128xbf16>
    %cst_111 = arith.constant dense<0.000000e+00> : vector<4x128xf32>
    %222 = tpu.matmul %219, %221, %cst_111 {dimension_numbers = #tpu.dot_dimension_numbers<[1], [0], [0], [1], [0, 0, 1, 1], [], []>} : vector<4x32xbf16>, vector<32x128xbf16>, vector<4x128xf32> -> vector<4x128xf32>
    %223 = vector.broadcast %218 : vector<1x128xf32> to vector<4x128xf32>
    %224 = arith.addf %223, %222 : vector<4x128xf32>
    %225 = arith.truncf %154 : vector<4x32xf32> to vector<4x32xbf16>
    %c3_112 = arith.constant 3 : index
    %c0_113 = arith.constant 0 : index
    %c0_114 = arith.constant 0 : index
    %226 = vector.load %arg3[%c3_112, %c0_113, %c0_114] : memref<4x32x128xbf16, #tpu.memory_space<vmem>>, vector<1x32x128xbf16>
    %227 = vector.shape_cast %226 : vector<1x32x128xbf16> to vector<32x128xbf16>
    %cst_115 = arith.constant dense<0.000000e+00> : vector<4x128xf32>
    %228 = tpu.matmul %225, %227, %cst_115 {dimension_numbers = #tpu.dot_dimension_numbers<[1], [0], [0], [1], [0, 0, 1, 1], [], []>} : vector<4x32xbf16>, vector<32x128xbf16>, vector<4x128xf32> -> vector<4x128xf32>
    %229 = arith.addf %224, %228 : vector<4x128xf32>
    %230 = arith.negf %229 : vector<4x128xf32>
    %231 = math.exp %230 : vector<4x128xf32>
    %cst_116 = arith.constant 1.000000e+00 : f32
    %232 = vector.broadcast %cst_116 : f32 to vector<4x128xf32>
    %233 = arith.addf %232, %231 : vector<4x128xf32>
    %234 = arith.divf %232, %233 : vector<4x128xf32>
    %235 = math.tanh %229 : vector<4x128xf32>
    %236 = vector.extract_strided_slice %234 {offsets = [0, 0], sizes = [4, 32], strides = [1, 1]} : vector<4x128xf32> to vector<4x32xf32>
    %237 = vector.extract_strided_slice %234 {offsets = [0, 32], sizes = [4, 32], strides = [1, 1]} : vector<4x128xf32> to vector<4x32xf32>
    %238 = vector.extract_strided_slice %234 {offsets = [0, 64], sizes = [4, 32], strides = [1, 1]} : vector<4x128xf32> to vector<4x32xf32>
    %239 = vector.extract_strided_slice %235 {offsets = [0, 96], sizes = [4, 32], strides = [1, 1]} : vector<4x128xf32> to vector<4x32xf32>
    %240 = arith.mulf %237, %152 : vector<4x32xf32>
    %241 = arith.mulf %236, %239 : vector<4x32xf32>
    %242 = arith.addf %240, %241 : vector<4x32xf32>
    %243 = math.tanh %242 : vector<4x32xf32>
    %244 = arith.mulf %238, %243 : vector<4x32xf32>
    %c0_117 = arith.constant 0 : index
    %c0_118 = arith.constant 0 : index
    %c0_119 = arith.constant 0 : index
    %245 = vector.load %arg1[%c0_117, %c0_118, %c0_119] : memref<4x8x32xf32, #tpu.memory_space<vmem>>, vector<4x8x32xf32>
    %246 = arith.truncf %244 : vector<4x32xf32> to vector<4x32xbf16>
    %c0_120 = arith.constant 0 : index
    %c0_121 = arith.constant 0 : index
    %c0_122 = arith.constant 0 : index
    %247 = vector.load %arg4[%c0_120, %c0_121, %c0_122] : memref<3x32x32xbf16, #tpu.memory_space<vmem>>, vector<1x32x32xbf16>
    %248 = vector.shape_cast %247 : vector<1x32x32xbf16> to vector<32x32xbf16>
    %cst_123 = arith.constant dense<0.000000e+00> : vector<4x32xf32>
    %249 = tpu.matmul %246, %248, %cst_123 {dimension_numbers = #tpu.dot_dimension_numbers<[1], [0], [0], [1], [0, 0, 1, 1], [], []>} : vector<4x32xbf16>, vector<32x32xbf16>, vector<4x32xf32> -> vector<4x32xf32>
    %250 = vector.shape_cast %249 : vector<4x32xf32> to vector<4x1x32xf32>
    %251 = vector.broadcast %250 : vector<4x1x32xf32> to vector<4x8x32xf32>
    %252 = arith.mulf %245, %251 : vector<4x8x32xf32>
    %cst_124 = arith.constant dense<0.000000e+00> : vector<4x8xf32>
    %253 = vector.multi_reduction <add>, %252, %cst_124 [2] : vector<4x8x32xf32> to vector<4x8xf32>
    %cst_125 = arith.constant dense<0xFF800000> : vector<4xf32>
    %254 = vector.multi_reduction <maximumf>, %253, %cst_125 [1] : vector<4x8xf32> to vector<4xf32>
    %255 = vector.shape_cast %254 : vector<4xf32> to vector<4x1xf32>
    %256 = vector.broadcast %255 : vector<4x1xf32> to vector<4x8xf32>
    %257 = arith.subf %253, %256 : vector<4x8xf32>
    %258 = math.exp %257 : vector<4x8xf32>
    %cst_126 = arith.constant dense<0.000000e+00> : vector<4xf32>
    %259 = vector.multi_reduction <add>, %258, %cst_126 [1] : vector<4x8xf32> to vector<4xf32>
    %260 = vector.shape_cast %259 : vector<4xf32> to vector<4x1xf32>
    %261 = tpu.reciprocal %260 {approx = true} : vector<4x1xf32> -> vector<4x1xf32>
    %262 = vector.broadcast %261 : vector<4x1xf32> to vector<4x8xf32>
    %263 = arith.mulf %258, %262 : vector<4x8xf32>
    %264 = vector.shape_cast %263 : vector<4x8xf32> to vector<4x8x1xf32>
    %265 = vector.broadcast %264 : vector<4x8x1xf32> to vector<4x8x32xf32>
    %266 = arith.mulf %245, %265 : vector<4x8x32xf32>
    %cst_127 = arith.constant dense<0.000000e+00> : vector<4x32xf32>
    %267 = vector.multi_reduction <add>, %266, %cst_127 [1] : vector<4x8x32xf32> to vector<4x32xf32>
    %268 = arith.truncf %267 : vector<4x32xf32> to vector<4x32xbf16>
    %c1_128 = arith.constant 1 : index
    %c0_129 = arith.constant 0 : index
    %c0_130 = arith.constant 0 : index
    %269 = vector.load %arg4[%c1_128, %c0_129, %c0_130] : memref<3x32x32xbf16, #tpu.memory_space<vmem>>, vector<1x32x32xbf16>
    %270 = vector.shape_cast %269 : vector<1x32x32xbf16> to vector<32x32xbf16>
    %cst_131 = arith.constant dense<0.000000e+00> : vector<4x32xf32>
    %271 = tpu.matmul %268, %270, %cst_131 {dimension_numbers = #tpu.dot_dimension_numbers<[1], [0], [0], [1], [0, 0, 1, 1], [], []>} : vector<4x32xbf16>, vector<32x32xbf16>, vector<4x32xf32> -> vector<4x32xf32>
    %c2_132 = arith.constant 2 : index
    %c0_133 = arith.constant 0 : index
    %c0_134 = arith.constant 0 : index
    %272 = vector.load %arg4[%c2_132, %c0_133, %c0_134] : memref<3x32x32xbf16, #tpu.memory_space<vmem>>, vector<1x32x32xbf16>
    %273 = vector.shape_cast %272 : vector<1x32x32xbf16> to vector<32x32xbf16>
    %cst_135 = arith.constant dense<0.000000e+00> : vector<4x32xf32>
    %274 = tpu.matmul %246, %273, %cst_135 {dimension_numbers = #tpu.dot_dimension_numbers<[1], [0], [0], [1], [0, 0, 1, 1], [], []>} : vector<4x32xbf16>, vector<32x32xbf16>, vector<4x32xf32> -> vector<4x32xf32>
    %275 = arith.addf %271, %274 : vector<4x32xf32>
    %276 = math.tanh %275 : vector<4x32xf32>
    %277 = vector.shape_cast %276 : vector<4x32xf32> to vector<1x4x32xf32>
    %278 = arith.index_cast %c2_i32 : i32 to index
    %c0_136 = arith.constant 0 : index
    %c0_137 = arith.constant 0 : index
    %279 = vector.load %arg6[%278, %c0_136, %c0_137] : memref<6x4x32xf32, #tpu.memory_space<vmem>>, vector<1x4x32xf32>
    tpu.vector_store %arg6[%278, %c0_136, %c0_137], %277 {strides = array<i32>} : memref<6x4x32xf32, #tpu.memory_space<vmem>>, vector<1x4x32xf32>,
    %c3_i32 = arith.constant 3 : i32
    %280 = arith.index_cast %c3_i32 : i32 to index
    %c0_138 = arith.constant 0 : index
    %c0_139 = arith.constant 0 : index
    %281 = vector.load %arg0[%280, %c0_138, %c0_139] : memref<6x4x128xf32, #tpu.memory_space<vmem>>, vector<1x4x128xf32>
    %282 = vector.shape_cast %281 : vector<1x4x128xf32> to vector<4x128xf32>
    %283 = arith.truncf %276 : vector<4x32xf32> to vector<4x32xbf16>
    %c0_140 = arith.constant 0 : index
    %c0_141 = arith.constant 0 : index
    %c0_142 = arith.constant 0 : index
    %284 = vector.load %arg3[%c0_140, %c0_141, %c0_142] : memref<4x32x128xbf16, #tpu.memory_space<vmem>>, vector<1x32x128xbf16>
    %285 = vector.shape_cast %284 : vector<1x32x128xbf16> to vector<32x128xbf16>
    %cst_143 = arith.constant dense<0.000000e+00> : vector<4x128xf32>
    %286 = tpu.matmul %283, %285, %cst_143 {dimension_numbers = #tpu.dot_dimension_numbers<[1], [0], [0], [1], [0, 0, 1, 1], [], []>} : vector<4x32xbf16>, vector<32x128xbf16>, vector<4x128xf32> -> vector<4x128xf32>
    %287 = arith.addf %282, %286 : vector<4x128xf32>
    %288 = arith.truncf %217 : vector<4x32xf32> to vector<4x32xbf16>
    %c1_144 = arith.constant 1 : index
    %c0_145 = arith.constant 0 : index
    %c0_146 = arith.constant 0 : index
    %289 = vector.load %arg3[%c1_144, %c0_145, %c0_146] : memref<4x32x128xbf16, #tpu.memory_space<vmem>>, vector<1x32x128xbf16>
    %290 = vector.shape_cast %289 : vector<1x32x128xbf16> to vector<32x128xbf16>
    %cst_147 = arith.constant dense<0.000000e+00> : vector<4x128xf32>
    %291 = tpu.matmul %288, %290, %cst_147 {dimension_numbers = #tpu.dot_dimension_numbers<[1], [0], [0], [1], [0, 0, 1, 1], [], []>} : vector<4x32xbf16>, vector<32x128xbf16>, vector<4x128xf32> -> vector<4x128xf32>
    %292 = arith.addf %287, %291 : vector<4x128xf32>
    %293 = arith.negf %292 : vector<4x128xf32>
    %294 = math.exp %293 : vector<4x128xf32>
    %cst_148 = arith.constant 1.000000e+00 : f32
    %295 = vector.broadcast %cst_148 : f32 to vector<4x128xf32>
    %296 = arith.addf %295, %294 : vector<4x128xf32>
    %297 = arith.divf %295, %296 : vector<4x128xf32>
    %298 = math.tanh %292 : vector<4x128xf32>
    %299 = vector.extract_strided_slice %297 {offsets = [0, 0], sizes = [4, 32], strides = [1, 1]} : vector<4x128xf32> to vector<4x32xf32>
    %300 = vector.extract_strided_slice %297 {offsets = [0, 32], sizes = [4, 32], strides = [1, 1]} : vector<4x128xf32> to vector<4x32xf32>
    %301 = vector.extract_strided_slice %297 {offsets = [0, 64], sizes = [4, 32], strides = [1, 1]} : vector<4x128xf32> to vector<4x32xf32>
    %302 = vector.extract_strided_slice %298 {offsets = [0, 96], sizes = [4, 32], strides = [1, 1]} : vector<4x128xf32> to vector<4x32xf32>
    %303 = arith.mulf %300, %215 : vector<4x32xf32>
    %304 = arith.mulf %299, %302 : vector<4x32xf32>
    %305 = arith.addf %303, %304 : vector<4x32xf32>
    %306 = math.tanh %305 : vector<4x32xf32>
    %307 = arith.mulf %301, %306 : vector<4x32xf32>
    %c0_149 = arith.constant 0 : index
    %c0_150 = arith.constant 0 : index
    %308 = vector.load %arg5[%c0_149, %c0_150] : memref<1x128xf32, #tpu.memory_space<vmem>>, vector<1x128xf32>
    %309 = arith.truncf %307 : vector<4x32xf32> to vector<4x32xbf16>
    %c2_151 = arith.constant 2 : index
    %c0_152 = arith.constant 0 : index
    %c0_153 = arith.constant 0 : index
    %310 = vector.load %arg3[%c2_151, %c0_152, %c0_153] : memref<4x32x128xbf16, #tpu.memory_space<vmem>>, vector<1x32x128xbf16>
    %311 = vector.shape_cast %310 : vector<1x32x128xbf16> to vector<32x128xbf16>
    %cst_154 = arith.constant dense<0.000000e+00> : vector<4x128xf32>
    %312 = tpu.matmul %309, %311, %cst_154 {dimension_numbers = #tpu.dot_dimension_numbers<[1], [0], [0], [1], [0, 0, 1, 1], [], []>} : vector<4x32xbf16>, vector<32x128xbf16>, vector<4x128xf32> -> vector<4x128xf32>
    %313 = vector.broadcast %308 : vector<1x128xf32> to vector<4x128xf32>
    %314 = arith.addf %313, %312 : vector<4x128xf32>
    %315 = arith.truncf %244 : vector<4x32xf32> to vector<4x32xbf16>
    %c3_155 = arith.constant 3 : index
    %c0_156 = arith.constant 0 : index
    %c0_157 = arith.constant 0 : index
    %316 = vector.load %arg3[%c3_155, %c0_156, %c0_157] : memref<4x32x128xbf16, #tpu.memory_space<vmem>>, vector<1x32x128xbf16>
    %317 = vector.shape_cast %316 : vector<1x32x128xbf16> to vector<32x128xbf16>
    %cst_158 = arith.constant dense<0.000000e+00> : vector<4x128xf32>
    %318 = tpu.matmul %315, %317, %cst_158 {dimension_numbers = #tpu.dot_dimension_numbers<[1], [0], [0], [1], [0, 0, 1, 1], [], []>} : vector<4x32xbf16>, vector<32x128xbf16>, vector<4x128xf32> -> vector<4x128xf32>
    %319 = arith.addf %314, %318 : vector<4x128xf32>
    %320 = arith.negf %319 : vector<4x128xf32>
    %321 = math.exp %320 : vector<4x128xf32>
    %cst_159 = arith.constant 1.000000e+00 : f32
    %322 = vector.broadcast %cst_159 : f32 to vector<4x128xf32>
    %323 = arith.addf %322, %321 : vector<4x128xf32>
    %324 = arith.divf %322, %323 : vector<4x128xf32>
    %325 = math.tanh %319 : vector<4x128xf32>
    %326 = vector.extract_strided_slice %324 {offsets = [0, 0], sizes = [4, 32], strides = [1, 1]} : vector<4x128xf32> to vector<4x32xf32>
    %327 = vector.extract_strided_slice %324 {offsets = [0, 32], sizes = [4, 32], strides = [1, 1]} : vector<4x128xf32> to vector<4x32xf32>
    %328 = vector.extract_strided_slice %324 {offsets = [0, 64], sizes = [4, 32], strides = [1, 1]} : vector<4x128xf32> to vector<4x32xf32>
    %329 = vector.extract_strided_slice %325 {offsets = [0, 96], sizes = [4, 32], strides = [1, 1]} : vector<4x128xf32> to vector<4x32xf32>
    %330 = arith.mulf %327, %242 : vector<4x32xf32>
    %331 = arith.mulf %326, %329 : vector<4x32xf32>
    %332 = arith.addf %330, %331 : vector<4x32xf32>
    %333 = math.tanh %332 : vector<4x32xf32>
    %334 = arith.mulf %328, %333 : vector<4x32xf32>
    %c0_160 = arith.constant 0 : index
    %c0_161 = arith.constant 0 : index
    %c0_162 = arith.constant 0 : index
    %335 = vector.load %arg1[%c0_160, %c0_161, %c0_162] : memref<4x8x32xf32, #tpu.memory_space<vmem>>, vector<4x8x32xf32>
    %336 = arith.truncf %334 : vector<4x32xf32> to vector<4x32xbf16>
    %c0_163 = arith.constant 0 : index
    %c0_164 = arith.constant 0 : index
    %c0_165 = arith.constant 0 : index
    %337 = vector.load %arg4[%c0_163, %c0_164, %c0_165] : memref<3x32x32xbf16, #tpu.memory_space<vmem>>, vector<1x32x32xbf16>
    %338 = vector.shape_cast %337 : vector<1x32x32xbf16> to vector<32x32xbf16>
    %cst_166 = arith.constant dense<0.000000e+00> : vector<4x32xf32>
    %339 = tpu.matmul %336, %338, %cst_166 {dimension_numbers = #tpu.dot_dimension_numbers<[1], [0], [0], [1], [0, 0, 1, 1], [], []>} : vector<4x32xbf16>, vector<32x32xbf16>, vector<4x32xf32> -> vector<4x32xf32>
    %340 = vector.shape_cast %339 : vector<4x32xf32> to vector<4x1x32xf32>
    %341 = vector.broadcast %340 : vector<4x1x32xf32> to vector<4x8x32xf32>
    %342 = arith.mulf %335, %341 : vector<4x8x32xf32>
    %cst_167 = arith.constant dense<0.000000e+00> : vector<4x8xf32>
    %343 = vector.multi_reduction <add>, %342, %cst_167 [2] : vector<4x8x32xf32> to vector<4x8xf32>
    %cst_168 = arith.constant dense<0xFF800000> : vector<4xf32>
    %344 = vector.multi_reduction <maximumf>, %343, %cst_168 [1] : vector<4x8xf32> to vector<4xf32>
    %345 = vector.shape_cast %344 : vector<4xf32> to vector<4x1xf32>
    %346 = vector.broadcast %345 : vector<4x1xf32> to vector<4x8xf32>
    %347 = arith.subf %343, %346 : vector<4x8xf32>
    %348 = math.exp %347 : vector<4x8xf32>
    %cst_169 = arith.constant dense<0.000000e+00> : vector<4xf32>
    %349 = vector.multi_reduction <add>, %348, %cst_169 [1] : vector<4x8xf32> to vector<4xf32>
    %350 = vector.shape_cast %349 : vector<4xf32> to vector<4x1xf32>
    %351 = tpu.reciprocal %350 {approx = true} : vector<4x1xf32> -> vector<4x1xf32>
    %352 = vector.broadcast %351 : vector<4x1xf32> to vector<4x8xf32>
    %353 = arith.mulf %348, %352 : vector<4x8xf32>
    %354 = vector.shape_cast %353 : vector<4x8xf32> to vector<4x8x1xf32>
    %355 = vector.broadcast %354 : vector<4x8x1xf32> to vector<4x8x32xf32>
    %356 = arith.mulf %335, %355 : vector<4x8x32xf32>
    %cst_170 = arith.constant dense<0.000000e+00> : vector<4x32xf32>
    %357 = vector.multi_reduction <add>, %356, %cst_170 [1] : vector<4x8x32xf32> to vector<4x32xf32>
    %358 = arith.truncf %357 : vector<4x32xf32> to vector<4x32xbf16>
    %c1_171 = arith.constant 1 : index
    %c0_172 = arith.constant 0 : index
    %c0_173 = arith.constant 0 : index
    %359 = vector.load %arg4[%c1_171, %c0_172, %c0_173] : memref<3x32x32xbf16, #tpu.memory_space<vmem>>, vector<1x32x32xbf16>
    %360 = vector.shape_cast %359 : vector<1x32x32xbf16> to vector<32x32xbf16>
    %cst_174 = arith.constant dense<0.000000e+00> : vector<4x32xf32>
    %361 = tpu.matmul %358, %360, %cst_174 {dimension_numbers = #tpu.dot_dimension_numbers<[1], [0], [0], [1], [0, 0, 1, 1], [], []>} : vector<4x32xbf16>, vector<32x32xbf16>, vector<4x32xf32> -> vector<4x32xf32>
    %c2_175 = arith.constant 2 : index
    %c0_176 = arith.constant 0 : index
    %c0_177 = arith.constant 0 : index
    %362 = vector.load %arg4[%c2_175, %c0_176, %c0_177] : memref<3x32x32xbf16, #tpu.memory_space<vmem>>, vector<1x32x32xbf16>
    %363 = vector.shape_cast %362 : vector<1x32x32xbf16> to vector<32x32xbf16>
    %cst_178 = arith.constant dense<0.000000e+00> : vector<4x32xf32>
    %364 = tpu.matmul %336, %363, %cst_178 {dimension_numbers = #tpu.dot_dimension_numbers<[1], [0], [0], [1], [0, 0, 1, 1], [], []>} : vector<4x32xbf16>, vector<32x32xbf16>, vector<4x32xf32> -> vector<4x32xf32>
    %365 = arith.addf %361, %364 : vector<4x32xf32>
    %366 = math.tanh %365 : vector<4x32xf32>
    %367 = vector.shape_cast %366 : vector<4x32xf32> to vector<1x4x32xf32>
    %368 = arith.index_cast %c3_i32 : i32 to index
    %c0_179 = arith.constant 0 : index
    %c0_180 = arith.constant 0 : index
    %369 = vector.load %arg6[%368, %c0_179, %c0_180] : memref<6x4x32xf32, #tpu.memory_space<vmem>>, vector<1x4x32xf32>
    tpu.vector_store %arg6[%368, %c0_179, %c0_180], %367 {strides = array<i32>} : memref<6x4x32xf32, #tpu.memory_space<vmem>>, vector<1x4x32xf32>,
    %c4_i32 = arith.constant 4 : i32
    %370 = arith.index_cast %c4_i32 : i32 to index
    %c0_181 = arith.constant 0 : index
    %c0_182 = arith.constant 0 : index
    %371 = vector.load %arg0[%370, %c0_181, %c0_182] : memref<6x4x128xf32, #tpu.memory_space<vmem>>, vector<1x4x128xf32>
    %372 = vector.shape_cast %371 : vector<1x4x128xf32> to vector<4x128xf32>
    %373 = arith.truncf %366 : vector<4x32xf32> to vector<4x32xbf16>
    %c0_183 = arith.constant 0 : index
    %c0_184 = arith.constant 0 : index
    %c0_185 = arith.constant 0 : index
    %374 = vector.load %arg3[%c0_183, %c0_184, %c0_185] : memref<4x32x128xbf16, #tpu.memory_space<vmem>>, vector<1x32x128xbf16>
    %375 = vector.shape_cast %374 : vector<1x32x128xbf16> to vector<32x128xbf16>
    %cst_186 = arith.constant dense<0.000000e+00> : vector<4x128xf32>
    %376 = tpu.matmul %373, %375, %cst_186 {dimension_numbers = #tpu.dot_dimension_numbers<[1], [0], [0], [1], [0, 0, 1, 1], [], []>} : vector<4x32xbf16>, vector<32x128xbf16>, vector<4x128xf32> -> vector<4x128xf32>
    %377 = arith.addf %372, %376 : vector<4x128xf32>
    %378 = arith.truncf %307 : vector<4x32xf32> to vector<4x32xbf16>
    %c1_187 = arith.constant 1 : index
    %c0_188 = arith.constant 0 : index
    %c0_189 = arith.constant 0 : index
    %379 = vector.load %arg3[%c1_187, %c0_188, %c0_189] : memref<4x32x128xbf16, #tpu.memory_space<vmem>>, vector<1x32x128xbf16>
    %380 = vector.shape_cast %379 : vector<1x32x128xbf16> to vector<32x128xbf16>
    %cst_190 = arith.constant dense<0.000000e+00> : vector<4x128xf32>
    %381 = tpu.matmul %378, %380, %cst_190 {dimension_numbers = #tpu.dot_dimension_numbers<[1], [0], [0], [1], [0, 0, 1, 1], [], []>} : vector<4x32xbf16>, vector<32x128xbf16>, vector<4x128xf32> -> vector<4x128xf32>
    %382 = arith.addf %377, %381 : vector<4x128xf32>
    %383 = arith.negf %382 : vector<4x128xf32>
    %384 = math.exp %383 : vector<4x128xf32>
    %cst_191 = arith.constant 1.000000e+00 : f32
    %385 = vector.broadcast %cst_191 : f32 to vector<4x128xf32>
    %386 = arith.addf %385, %384 : vector<4x128xf32>
    %387 = arith.divf %385, %386 : vector<4x128xf32>
    %388 = math.tanh %382 : vector<4x128xf32>
    %389 = vector.extract_strided_slice %387 {offsets = [0, 0], sizes = [4, 32], strides = [1, 1]} : vector<4x128xf32> to vector<4x32xf32>
    %390 = vector.extract_strided_slice %387 {offsets = [0, 32], sizes = [4, 32], strides = [1, 1]} : vector<4x128xf32> to vector<4x32xf32>
    %391 = vector.extract_strided_slice %387 {offsets = [0, 64], sizes = [4, 32], strides = [1, 1]} : vector<4x128xf32> to vector<4x32xf32>
    %392 = vector.extract_strided_slice %388 {offsets = [0, 96], sizes = [4, 32], strides = [1, 1]} : vector<4x128xf32> to vector<4x32xf32>
    %393 = arith.mulf %390, %305 : vector<4x32xf32>
    %394 = arith.mulf %389, %392 : vector<4x32xf32>
    %395 = arith.addf %393, %394 : vector<4x32xf32>
    %396 = math.tanh %395 : vector<4x32xf32>
    %397 = arith.mulf %391, %396 : vector<4x32xf32>
    %c0_192 = arith.constant 0 : index
    %c0_193 = arith.constant 0 : index
    %398 = vector.load %arg5[%c0_192, %c0_193] : memref<1x128xf32, #tpu.memory_space<vmem>>, vector<1x128xf32>
    %399 = arith.truncf %397 : vector<4x32xf32> to vector<4x32xbf16>
    %c2_194 = arith.constant 2 : index
    %c0_195 = arith.constant 0 : index
    %c0_196 = arith.constant 0 : index
    %400 = vector.load %arg3[%c2_194, %c0_195, %c0_196] : memref<4x32x128xbf16, #tpu.memory_space<vmem>>, vector<1x32x128xbf16>
    %401 = vector.shape_cast %400 : vector<1x32x128xbf16> to vector<32x128xbf16>
    %cst_197 = arith.constant dense<0.000000e+00> : vector<4x128xf32>
    %402 = tpu.matmul %399, %401, %cst_197 {dimension_numbers = #tpu.dot_dimension_numbers<[1], [0], [0], [1], [0, 0, 1, 1], [], []>} : vector<4x32xbf16>, vector<32x128xbf16>, vector<4x128xf32> -> vector<4x128xf32>
    %403 = vector.broadcast %398 : vector<1x128xf32> to vector<4x128xf32>
    %404 = arith.addf %403, %402 : vector<4x128xf32>
    %405 = arith.truncf %334 : vector<4x32xf32> to vector<4x32xbf16>
    %c3_198 = arith.constant 3 : index
    %c0_199 = arith.constant 0 : index
    %c0_200 = arith.constant 0 : index
    %406 = vector.load %arg3[%c3_198, %c0_199, %c0_200] : memref<4x32x128xbf16, #tpu.memory_space<vmem>>, vector<1x32x128xbf16>
    %407 = vector.shape_cast %406 : vector<1x32x128xbf16> to vector<32x128xbf16>
    %cst_201 = arith.constant dense<0.000000e+00> : vector<4x128xf32>
    %408 = tpu.matmul %405, %407, %cst_201 {dimension_numbers = #tpu.dot_dimension_numbers<[1], [0], [0], [1], [0, 0, 1, 1], [], []>} : vector<4x32xbf16>, vector<32x128xbf16>, vector<4x128xf32> -> vector<4x128xf32>
    %409 = arith.addf %404, %408 : vector<4x128xf32>
    %410 = arith.negf %409 : vector<4x128xf32>
    %411 = math.exp %410 : vector<4x128xf32>
    %cst_202 = arith.constant 1.000000e+00 : f32
    %412 = vector.broadcast %cst_202 : f32 to vector<4x128xf32>
    %413 = arith.addf %412, %411 : vector<4x128xf32>
    %414 = arith.divf %412, %413 : vector<4x128xf32>
    %415 = math.tanh %409 : vector<4x128xf32>
    %416 = vector.extract_strided_slice %414 {offsets = [0, 0], sizes = [4, 32], strides = [1, 1]} : vector<4x128xf32> to vector<4x32xf32>
    %417 = vector.extract_strided_slice %414 {offsets = [0, 32], sizes = [4, 32], strides = [1, 1]} : vector<4x128xf32> to vector<4x32xf32>
    %418 = vector.extract_strided_slice %414 {offsets = [0, 64], sizes = [4, 32], strides = [1, 1]} : vector<4x128xf32> to vector<4x32xf32>
    %419 = vector.extract_strided_slice %415 {offsets = [0, 96], sizes = [4, 32], strides = [1, 1]} : vector<4x128xf32> to vector<4x32xf32>
    %420 = arith.mulf %417, %332 : vector<4x32xf32>
    %421 = arith.mulf %416, %419 : vector<4x32xf32>
    %422 = arith.addf %420, %421 : vector<4x32xf32>
    %423 = math.tanh %422 : vector<4x32xf32>
    %424 = arith.mulf %418, %423 : vector<4x32xf32>
    %c0_203 = arith.constant 0 : index
    %c0_204 = arith.constant 0 : index
    %c0_205 = arith.constant 0 : index
    %425 = vector.load %arg1[%c0_203, %c0_204, %c0_205] : memref<4x8x32xf32, #tpu.memory_space<vmem>>, vector<4x8x32xf32>
    %426 = arith.truncf %424 : vector<4x32xf32> to vector<4x32xbf16>
    %c0_206 = arith.constant 0 : index
    %c0_207 = arith.constant 0 : index
    %c0_208 = arith.constant 0 : index
    %427 = vector.load %arg4[%c0_206, %c0_207, %c0_208] : memref<3x32x32xbf16, #tpu.memory_space<vmem>>, vector<1x32x32xbf16>
    %428 = vector.shape_cast %427 : vector<1x32x32xbf16> to vector<32x32xbf16>
    %cst_209 = arith.constant dense<0.000000e+00> : vector<4x32xf32>
    %429 = tpu.matmul %426, %428, %cst_209 {dimension_numbers = #tpu.dot_dimension_numbers<[1], [0], [0], [1], [0, 0, 1, 1], [], []>} : vector<4x32xbf16>, vector<32x32xbf16>, vector<4x32xf32> -> vector<4x32xf32>
    %430 = vector.shape_cast %429 : vector<4x32xf32> to vector<4x1x32xf32>
    %431 = vector.broadcast %430 : vector<4x1x32xf32> to vector<4x8x32xf32>
    %432 = arith.mulf %425, %431 : vector<4x8x32xf32>
    %cst_210 = arith.constant dense<0.000000e+00> : vector<4x8xf32>
    %433 = vector.multi_reduction <add>, %432, %cst_210 [2] : vector<4x8x32xf32> to vector<4x8xf32>
    %cst_211 = arith.constant dense<0xFF800000> : vector<4xf32>
    %434 = vector.multi_reduction <maximumf>, %433, %cst_211 [1] : vector<4x8xf32> to vector<4xf32>
    %435 = vector.shape_cast %434 : vector<4xf32> to vector<4x1xf32>
    %436 = vector.broadcast %435 : vector<4x1xf32> to vector<4x8xf32>
    %437 = arith.subf %433, %436 : vector<4x8xf32>
    %438 = math.exp %437 : vector<4x8xf32>
    %cst_212 = arith.constant dense<0.000000e+00> : vector<4xf32>
    %439 = vector.multi_reduction <add>, %438, %cst_212 [1] : vector<4x8xf32> to vector<4xf32>
    %440 = vector.shape_cast %439 : vector<4xf32> to vector<4x1xf32>
    %441 = tpu.reciprocal %440 {approx = true} : vector<4x1xf32> -> vector<4x1xf32>
    %442 = vector.broadcast %441 : vector<4x1xf32> to vector<4x8xf32>
    %443 = arith.mulf %438, %442 : vector<4x8xf32>
    %444 = vector.shape_cast %443 : vector<4x8xf32> to vector<4x8x1xf32>
    %445 = vector.broadcast %444 : vector<4x8x1xf32> to vector<4x8x32xf32>
    %446 = arith.mulf %425, %445 : vector<4x8x32xf32>
    %cst_213 = arith.constant dense<0.000000e+00> : vector<4x32xf32>
    %447 = vector.multi_reduction <add>, %446, %cst_213 [1] : vector<4x8x32xf32> to vector<4x32xf32>
    %448 = arith.truncf %447 : vector<4x32xf32> to vector<4x32xbf16>
    %c1_214 = arith.constant 1 : index
    %c0_215 = arith.constant 0 : index
    %c0_216 = arith.constant 0 : index
    %449 = vector.load %arg4[%c1_214, %c0_215, %c0_216] : memref<3x32x32xbf16, #tpu.memory_space<vmem>>, vector<1x32x32xbf16>
    %450 = vector.shape_cast %449 : vector<1x32x32xbf16> to vector<32x32xbf16>
    %cst_217 = arith.constant dense<0.000000e+00> : vector<4x32xf32>
    %451 = tpu.matmul %448, %450, %cst_217 {dimension_numbers = #tpu.dot_dimension_numbers<[1], [0], [0], [1], [0, 0, 1, 1], [], []>} : vector<4x32xbf16>, vector<32x32xbf16>, vector<4x32xf32> -> vector<4x32xf32>
    %c2_218 = arith.constant 2 : index
    %c0_219 = arith.constant 0 : index
    %c0_220 = arith.constant 0 : index
    %452 = vector.load %arg4[%c2_218, %c0_219, %c0_220] : memref<3x32x32xbf16, #tpu.memory_space<vmem>>, vector<1x32x32xbf16>
    %453 = vector.shape_cast %452 : vector<1x32x32xbf16> to vector<32x32xbf16>
    %cst_221 = arith.constant dense<0.000000e+00> : vector<4x32xf32>
    %454 = tpu.matmul %426, %453, %cst_221 {dimension_numbers = #tpu.dot_dimension_numbers<[1], [0], [0], [1], [0, 0, 1, 1], [], []>} : vector<4x32xbf16>, vector<32x32xbf16>, vector<4x32xf32> -> vector<4x32xf32>
    %455 = arith.addf %451, %454 : vector<4x32xf32>
    %456 = math.tanh %455 : vector<4x32xf32>
    %457 = vector.shape_cast %456 : vector<4x32xf32> to vector<1x4x32xf32>
    %458 = arith.index_cast %c4_i32 : i32 to index
    %c0_222 = arith.constant 0 : index
    %c0_223 = arith.constant 0 : index
    %459 = vector.load %arg6[%458, %c0_222, %c0_223] : memref<6x4x32xf32, #tpu.memory_space<vmem>>, vector<1x4x32xf32>
    tpu.vector_store %arg6[%458, %c0_222, %c0_223], %457 {strides = array<i32>} : memref<6x4x32xf32, #tpu.memory_space<vmem>>, vector<1x4x32xf32>,
    %c5_i32 = arith.constant 5 : i32
    %460 = arith.index_cast %c5_i32 : i32 to index
    %c0_224 = arith.constant 0 : index
    %c0_225 = arith.constant 0 : index
    %461 = vector.load %arg0[%460, %c0_224, %c0_225] : memref<6x4x128xf32, #tpu.memory_space<vmem>>, vector<1x4x128xf32>
    %462 = vector.shape_cast %461 : vector<1x4x128xf32> to vector<4x128xf32>
    %463 = arith.truncf %456 : vector<4x32xf32> to vector<4x32xbf16>
    %c0_226 = arith.constant 0 : index
    %c0_227 = arith.constant 0 : index
    %c0_228 = arith.constant 0 : index
    %464 = vector.load %arg3[%c0_226, %c0_227, %c0_228] : memref<4x32x128xbf16, #tpu.memory_space<vmem>>, vector<1x32x128xbf16>
    %465 = vector.shape_cast %464 : vector<1x32x128xbf16> to vector<32x128xbf16>
    %cst_229 = arith.constant dense<0.000000e+00> : vector<4x128xf32>
    %466 = tpu.matmul %463, %465, %cst_229 {dimension_numbers = #tpu.dot_dimension_numbers<[1], [0], [0], [1], [0, 0, 1, 1], [], []>} : vector<4x32xbf16>, vector<32x128xbf16>, vector<4x128xf32> -> vector<4x128xf32>
    %467 = arith.addf %462, %466 : vector<4x128xf32>
    %468 = arith.truncf %397 : vector<4x32xf32> to vector<4x32xbf16>
    %c1_230 = arith.constant 1 : index
    %c0_231 = arith.constant 0 : index
    %c0_232 = arith.constant 0 : index
    %469 = vector.load %arg3[%c1_230, %c0_231, %c0_232] : memref<4x32x128xbf16, #tpu.memory_space<vmem>>, vector<1x32x128xbf16>
    %470 = vector.shape_cast %469 : vector<1x32x128xbf16> to vector<32x128xbf16>
    %cst_233 = arith.constant dense<0.000000e+00> : vector<4x128xf32>
    %471 = tpu.matmul %468, %470, %cst_233 {dimension_numbers = #tpu.dot_dimension_numbers<[1], [0], [0], [1], [0, 0, 1, 1], [], []>} : vector<4x32xbf16>, vector<32x128xbf16>, vector<4x128xf32> -> vector<4x128xf32>
    %472 = arith.addf %467, %471 : vector<4x128xf32>
    %473 = arith.negf %472 : vector<4x128xf32>
    %474 = math.exp %473 : vector<4x128xf32>
    %cst_234 = arith.constant 1.000000e+00 : f32
    %475 = vector.broadcast %cst_234 : f32 to vector<4x128xf32>
    %476 = arith.addf %475, %474 : vector<4x128xf32>
    %477 = arith.divf %475, %476 : vector<4x128xf32>
    %478 = math.tanh %472 : vector<4x128xf32>
    %479 = vector.extract_strided_slice %477 {offsets = [0, 0], sizes = [4, 32], strides = [1, 1]} : vector<4x128xf32> to vector<4x32xf32>
    %480 = vector.extract_strided_slice %477 {offsets = [0, 32], sizes = [4, 32], strides = [1, 1]} : vector<4x128xf32> to vector<4x32xf32>
    %481 = vector.extract_strided_slice %477 {offsets = [0, 64], sizes = [4, 32], strides = [1, 1]} : vector<4x128xf32> to vector<4x32xf32>
    %482 = vector.extract_strided_slice %478 {offsets = [0, 96], sizes = [4, 32], strides = [1, 1]} : vector<4x128xf32> to vector<4x32xf32>
    %483 = arith.mulf %480, %395 : vector<4x32xf32>
    %484 = arith.mulf %479, %482 : vector<4x32xf32>
    %485 = arith.addf %483, %484 : vector<4x32xf32>
    %486 = math.tanh %485 : vector<4x32xf32>
    %487 = arith.mulf %481, %486 : vector<4x32xf32>
    %c0_235 = arith.constant 0 : index
    %c0_236 = arith.constant 0 : index
    %488 = vector.load %arg5[%c0_235, %c0_236] : memref<1x128xf32, #tpu.memory_space<vmem>>, vector<1x128xf32>
    %489 = arith.truncf %487 : vector<4x32xf32> to vector<4x32xbf16>
    %c2_237 = arith.constant 2 : index
    %c0_238 = arith.constant 0 : index
    %c0_239 = arith.constant 0 : index
    %490 = vector.load %arg3[%c2_237, %c0_238, %c0_239] : memref<4x32x128xbf16, #tpu.memory_space<vmem>>, vector<1x32x128xbf16>
    %491 = vector.shape_cast %490 : vector<1x32x128xbf16> to vector<32x128xbf16>
    %cst_240 = arith.constant dense<0.000000e+00> : vector<4x128xf32>
    %492 = tpu.matmul %489, %491, %cst_240 {dimension_numbers = #tpu.dot_dimension_numbers<[1], [0], [0], [1], [0, 0, 1, 1], [], []>} : vector<4x32xbf16>, vector<32x128xbf16>, vector<4x128xf32> -> vector<4x128xf32>
    %493 = vector.broadcast %488 : vector<1x128xf32> to vector<4x128xf32>
    %494 = arith.addf %493, %492 : vector<4x128xf32>
    %495 = arith.truncf %424 : vector<4x32xf32> to vector<4x32xbf16>
    %c3_241 = arith.constant 3 : index
    %c0_242 = arith.constant 0 : index
    %c0_243 = arith.constant 0 : index
    %496 = vector.load %arg3[%c3_241, %c0_242, %c0_243] : memref<4x32x128xbf16, #tpu.memory_space<vmem>>, vector<1x32x128xbf16>
    %497 = vector.shape_cast %496 : vector<1x32x128xbf16> to vector<32x128xbf16>
    %cst_244 = arith.constant dense<0.000000e+00> : vector<4x128xf32>
    %498 = tpu.matmul %495, %497, %cst_244 {dimension_numbers = #tpu.dot_dimension_numbers<[1], [0], [0], [1], [0, 0, 1, 1], [], []>} : vector<4x32xbf16>, vector<32x128xbf16>, vector<4x128xf32> -> vector<4x128xf32>
    %499 = arith.addf %494, %498 : vector<4x128xf32>
    %500 = arith.negf %499 : vector<4x128xf32>
    %501 = math.exp %500 : vector<4x128xf32>
    %cst_245 = arith.constant 1.000000e+00 : f32
    %502 = vector.broadcast %cst_245 : f32 to vector<4x128xf32>
    %503 = arith.addf %502, %501 : vector<4x128xf32>
    %504 = arith.divf %502, %503 : vector<4x128xf32>
    %505 = math.tanh %499 : vector<4x128xf32>
    %506 = vector.extract_strided_slice %504 {offsets = [0, 0], sizes = [4, 32], strides = [1, 1]} : vector<4x128xf32> to vector<4x32xf32>
    %507 = vector.extract_strided_slice %504 {offsets = [0, 32], sizes = [4, 32], strides = [1, 1]} : vector<4x128xf32> to vector<4x32xf32>
    %508 = vector.extract_strided_slice %504 {offsets = [0, 64], sizes = [4, 32], strides = [1, 1]} : vector<4x128xf32> to vector<4x32xf32>
    %509 = vector.extract_strided_slice %505 {offsets = [0, 96], sizes = [4, 32], strides = [1, 1]} : vector<4x128xf32> to vector<4x32xf32>
    %510 = arith.mulf %507, %422 : vector<4x32xf32>
    %511 = arith.mulf %506, %509 : vector<4x32xf32>
    %512 = arith.addf %510, %511 : vector<4x32xf32>
    %513 = math.tanh %512 : vector<4x32xf32>
    %514 = arith.mulf %508, %513 : vector<4x32xf32>
    %c0_246 = arith.constant 0 : index
    %c0_247 = arith.constant 0 : index
    %c0_248 = arith.constant 0 : index
    %515 = vector.load %arg1[%c0_246, %c0_247, %c0_248] : memref<4x8x32xf32, #tpu.memory_space<vmem>>, vector<4x8x32xf32>
    %516 = arith.truncf %514 : vector<4x32xf32> to vector<4x32xbf16>
    %c0_249 = arith.constant 0 : index
    %c0_250 = arith.constant 0 : index
    %c0_251 = arith.constant 0 : index
    %517 = vector.load %arg4[%c0_249, %c0_250, %c0_251] : memref<3x32x32xbf16, #tpu.memory_space<vmem>>, vector<1x32x32xbf16>
    %518 = vector.shape_cast %517 : vector<1x32x32xbf16> to vector<32x32xbf16>
    %cst_252 = arith.constant dense<0.000000e+00> : vector<4x32xf32>
    %519 = tpu.matmul %516, %518, %cst_252 {dimension_numbers = #tpu.dot_dimension_numbers<[1], [0], [0], [1], [0, 0, 1, 1], [], []>} : vector<4x32xbf16>, vector<32x32xbf16>, vector<4x32xf32> -> vector<4x32xf32>
    %520 = vector.shape_cast %519 : vector<4x32xf32> to vector<4x1x32xf32>
    %521 = vector.broadcast %520 : vector<4x1x32xf32> to vector<4x8x32xf32>
    %522 = arith.mulf %515, %521 : vector<4x8x32xf32>
    %cst_253 = arith.constant dense<0.000000e+00> : vector<4x8xf32>
    %523 = vector.multi_reduction <add>, %522, %cst_253 [2] : vector<4x8x32xf32> to vector<4x8xf32>
    %cst_254 = arith.constant dense<0xFF800000> : vector<4xf32>
    %524 = vector.multi_reduction <maximumf>, %523, %cst_254 [1] : vector<4x8xf32> to vector<4xf32>
    %525 = vector.shape_cast %524 : vector<4xf32> to vector<4x1xf32>
    %526 = vector.broadcast %525 : vector<4x1xf32> to vector<4x8xf32>
    %527 = arith.subf %523, %526 : vector<4x8xf32>
    %528 = math.exp %527 : vector<4x8xf32>
    %cst_255 = arith.constant dense<0.000000e+00> : vector<4xf32>
    %529 = vector.multi_reduction <add>, %528, %cst_255 [1] : vector<4x8xf32> to vector<4xf32>
    %530 = vector.shape_cast %529 : vector<4xf32> to vector<4x1xf32>
    %531 = tpu.reciprocal %530 {approx = true} : vector<4x1xf32> -> vector<4x1xf32>
    %532 = vector.broadcast %531 : vector<4x1xf32> to vector<4x8xf32>
    %533 = arith.mulf %528, %532 : vector<4x8xf32>
    %534 = vector.shape_cast %533 : vector<4x8xf32> to vector<4x8x1xf32>
    %535 = vector.broadcast %534 : vector<4x8x1xf32> to vector<4x8x32xf32>
    %536 = arith.mulf %515, %535 : vector<4x8x32xf32>
    %cst_256 = arith.constant dense<0.000000e+00> : vector<4x32xf32>
    %537 = vector.multi_reduction <add>, %536, %cst_256 [1] : vector<4x8x32xf32> to vector<4x32xf32>
    %538 = arith.truncf %537 : vector<4x32xf32> to vector<4x32xbf16>
    %c1_257 = arith.constant 1 : index
    %c0_258 = arith.constant 0 : index
    %c0_259 = arith.constant 0 : index
    %539 = vector.load %arg4[%c1_257, %c0_258, %c0_259] : memref<3x32x32xbf16, #tpu.memory_space<vmem>>, vector<1x32x32xbf16>
    %540 = vector.shape_cast %539 : vector<1x32x32xbf16> to vector<32x32xbf16>
    %cst_260 = arith.constant dense<0.000000e+00> : vector<4x32xf32>
    %541 = tpu.matmul %538, %540, %cst_260 {dimension_numbers = #tpu.dot_dimension_numbers<[1], [0], [0], [1], [0, 0, 1, 1], [], []>} : vector<4x32xbf16>, vector<32x32xbf16>, vector<4x32xf32> -> vector<4x32xf32>
    %c2_261 = arith.constant 2 : index
    %c0_262 = arith.constant 0 : index
    %c0_263 = arith.constant 0 : index
    %542 = vector.load %arg4[%c2_261, %c0_262, %c0_263] : memref<3x32x32xbf16, #tpu.memory_space<vmem>>, vector<1x32x32xbf16>
    %543 = vector.shape_cast %542 : vector<1x32x32xbf16> to vector<32x32xbf16>
    %cst_264 = arith.constant dense<0.000000e+00> : vector<4x32xf32>
    %544 = tpu.matmul %516, %543, %cst_264 {dimension_numbers = #tpu.dot_dimension_numbers<[1], [0], [0], [1], [0, 0, 1, 1], [], []>} : vector<4x32xbf16>, vector<32x32xbf16>, vector<4x32xf32> -> vector<4x32xf32>
    %545 = arith.addf %541, %544 : vector<4x32xf32>
    %546 = math.tanh %545 : vector<4x32xf32>
    %547 = vector.shape_cast %546 : vector<4x32xf32> to vector<1x4x32xf32>
    %548 = arith.index_cast %c5_i32 : i32 to index
    %c0_265 = arith.constant 0 : index
    %c0_266 = arith.constant 0 : index
    %549 = vector.load %arg6[%548, %c0_265, %c0_266] : memref<6x4x32xf32, #tpu.memory_space<vmem>>, vector<1x4x32xf32>
    tpu.vector_store %arg6[%548, %c0_265, %c0_266], %547 {strides = array<i32>} : memref<6x4x32xf32, #tpu.memory_space<vmem>>, vector<1x4x32xf32>,
    %c6_i32 = arith.constant 6 : i32
    return
  }
}

</mosaic_0001>

<bundles_post_ra>
// kernel: tpu_custom_call.1
= control target key start
LH: loop header
LB: loop body
LE: loop exit
PB: predicated region body
PF: predicated region fallthrough
CT: control target
= control target key end

     0   :  { %11 = vsyncpa [#allocation3], 0  ;;  %s6370_s0 = inlined_call_operand.hbm [shape: f32[6,4,128], index: 0, kind: input, shape index: {}]   ;;  %s6371_s1 = inlined_call_operand.hbm [shape: f32[4,8,32], index: 1, kind: input, shape index: {}]   ;;  %s6372_s2 = inlined_call_operand.hbm [shape: f32[5,4,32], index: 2, kind: input, shape index: {}]   ;;  %s6373_s3 = inlined_call_operand.hbm [shape: bf16[4,32,128], index: 3, kind: input, shape index: {}]   ;;  %s6374_s4 = inlined_call_operand.hbm [shape: bf16[3,32,32], index: 4, kind: input, shape index: {}]   ;;  %s6375_s5 = inlined_call_operand.vmem [shape: f32[1,128], index: 5, kind: input, shape index: {}]   ;;  %s6376_s6 = inlined_call_operand.hbm [shape: f32[6,4,32], index: 6, kind: output, shape index: {}]  }
   0x1   :  { %12 = vsyncpa [#allocation6], 0 }
   0x2   :  { %13 = vsyncpa [#allocation9], 0 }
   0x3   :  { %14 = vsyncpa [#allocation4], 0  ;;  %s5561_s21 = smov [#allocation5]  }
   0x4   :  { %s32_s22 = sshll.u32 %s5561_s21, 4  ;;  %s33_s22 = int_to_ptr.vmem [resolvable:$true] %s32_s22 }
   0x5   :  { %s5441_s23 = scalar_lea.vmem %s33_s22, 512  ;;  %p5446_p1 = scmp.lt.s32.totalorder %s33_s22, %s33_s22 }
   0x6   :  { %p5442_p0 = scmp.ne.s32.totalorder %s33_s22, %s5441_s23  ;;  %p5447_p2 = scmp.lt.s32.totalorder %s5441_s23, %s5441_s23 }
   0x8   :  { %p5448_p3 = por %p5447_p2, %p5446_p1 }
   0xa   :  { %p5449_p4 = pnand %p5448_p3, %p5442_p0 }
   0xc   :  { %5452 = shalt.err (!%p5449_p4)
}
   0xd   :  { %s5562_s24 = smov 128   ;;  %s5563_s25 = smov 8  }
   0xe   :  { %38 = dma.hbm_to_vmem [thread:$0]  %s6371_s1, 512, %s33_s22, [#allocation6], %s5562_s24, %s5562_s24, %s5563_s25  }
   0xf   :  { %s5564_s28 = smov [#allocation8]   ;;  %s5565_s30 = smov [#allocation2]  }
  0x10   :  { %s56_s29 = sshll.u32 %s5564_s28, 4  ;;  %s20_s7 = sshll.u32 %s5565_s30, 4  ;;  %s57_s29 = int_to_ptr.vmem [resolvable:$true] %s56_s29  ;;  %s21_s7 = int_to_ptr.vmem [resolvable:$true] %s20_s7 }
  0x11   :  { %s5461_s8 = scalar_lea.vmem %s57_s29, 1024  ;;  %p5466_p6 = scmp.lt.s32.totalorder %s57_s29, %s57_s29 }
  0x12   :  { %p5462_p5 = scmp.ne.s32.totalorder %s57_s29, %s5461_s8  ;;  %p5467_p7 = scmp.lt.s32.totalorder %s5461_s8, %s5461_s8 }
  0x14   :  { %p5468_p8 = por %p5467_p7, %p5466_p6 }
  0x16   :  { %p5469_p9 = pnand %p5468_p8, %p5462_p5 }
  0x18   :  { %5472 = shalt.err (!%p5469_p9)
}
  0x19   :  { %s5566_s9 = smov 64   ;;  %s5567_s10 = smov 4  }
  0x1a   :  { %62 = dma.hbm_to_vmem [thread:$0]  %s6373_s3, 1024, %s57_s29, [#allocation9], %s5566_s9, %s5566_s9, %s5567_s10  }
  0x1b   :  { %s5481_s1 = scalar_lea.vmem %s21_s7, 384  ;;  %p5486_p11 = scmp.lt.s32.totalorder %s21_s7, %s21_s7 }
  0x1c   :  { %p5482_p10 = scmp.ne.s32.totalorder %s21_s7, %s5481_s1  ;;  %p5487_p12 = scmp.lt.s32.totalorder %s5481_s1, %s5481_s1 }
  0x1e   :  { %p5488_p13 = por %p5487_p12, %p5486_p11 }
  0x20   :  { %p5489_p0 = pnand %p5488_p13, %p5482_p10 }
  0x22   :  { %5492 = shalt.err (!%p5489_p0)
}
  0x23   :  { %26 = dma.hbm_to_vmem [thread:$0]  %s6370_s0, 384, %s21_s7, [#allocation3], %s5566_s9, %s5566_s9, %s5567_s10  }
  0x24   :  { %s5568_s15 = smov [#allocation7]   ;;  %s5569_s17 = smov [#allocation10]  }
  0x25   :  { %s44_s16 = sshll.u32 %s5568_s15, 4  ;;  %s68_s3 = sshll.u32 %s5569_s17, 4  ;;  %s45_s16 = int_to_ptr.vmem [resolvable:$true] %s44_s16  ;;  %s69_s3 = int_to_ptr.vmem [resolvable:$true] %s68_s3 }
  0x26   :  { %s5501_s18 = scalar_lea.vmem %s45_s16, 320  ;;  %p5506_p2 = scmp.lt.s32.totalorder %s45_s16, %s45_s16 }
  0x27   :  { %p5502_p1 = scmp.ne.s32.totalorder %s45_s16, %s5501_s18  ;;  %p5507_p3 = scmp.lt.s32.totalorder %s5501_s18, %s5501_s18 }
  0x29   :  { %p5508_p4 = por %p5507_p3, %p5506_p2 }
  0x2b   :  { %p5509_p5 = pnand %p5508_p4, %p5502_p1 }
  0x2d   :  { %5512 = shalt.err (!%p5509_p5)
}
  0x2e   :  { %50 = dma.hbm_to_vmem [thread:$0]  %s6372_s2, 320, %s45_s16, [#allocation6], %s5566_s9, %s5566_s9, %s5567_s10  }
  0x2f   :  { %s5521_s0 = scalar_lea.vmem %s69_s3, 768  ;;  %p5526_p7 = scmp.lt.s32.totalorder %s69_s3, %s69_s3 }
  0x30   :  { %p5522_p6 = scmp.ne.s32.totalorder %s69_s3, %s5521_s0  ;;  %p5527_p8 = scmp.lt.s32.totalorder %s5521_s0, %s5521_s0 }
  0x32   :  { %p5528_p9 = por %p5527_p8, %p5526_p7 }
  0x34   :  { %p5529_p10 = pnand %p5528_p9, %p5522_p6 }
  0x36   :  { %5532 = shalt.err (!%p5529_p10)
}
  0x37   :  { %74 = dma.hbm_to_vmem [thread:$0]  %s6374_s4, 768, %s69_s3, [#allocation9], %s5566_s9, %s5566_s9, %s5567_s10  }
  0x38   :  { %5553 = dma.done.wait [#allocation3], 384  }
  0x39   :  { %5554 = vsyncadd [#allocation3], 4294966912 }
  0x3a   :  { %5555 = dma.done.wait [#allocation6], 832  }
  0x3b   :  { %5556 = vsyncadd [#allocation6], 4294966464 }
  0x3c   :  { %5557 = dma.done.wait [#allocation9], 1792  }
  0x3d   :  { %5558 = vsyncadd [#allocation9], 4294965504  ;;  %v5570_v0 = vmov 0.0   ;;  %vm5571_vm0 = vmmov 0   ;;  %v5181_v1 = vld [vmem:[#allocation8 + $0x8] sm:$0xff]   ;;  %v5182_v2 = vld [vmem:[#allocation8 + $0x18] sm:$0xff]  }
  0x3e   :  { %4828 = vmatprep.subr.bf16.mxu0 %v5570_v0  ;;  %4836 = vmatprep.subr.bf16.mxu1 %v5570_v0  ;;  %v5183_v3 = vld [vmem:[#allocation8] sm:$0xff]   ;;  %v5184_v4 = vld [vmem:[#allocation8 + $0x10] sm:$0xff]   ;;  %v101_v5 = vld [vmem:[#allocation7 + $0x10] sm:$0xf]  ;;  %vm120_vm1 = vcmask 261120   ;;  %s5572_s2 = smov 32  }
  0x3f   :  { %4832 = vmatprep.mubr.msk.bf16.mxu0 %vm5571_vm0, %v5570_v0  ;;  %4840 = vmatprep.mubr.msk.bf16.mxu1 %vm5571_vm0, %v5570_v0  ;;  %v93_v6 = vld [vmem:[#allocation7] sm:$0xf]  ;;  %v103_v7 = vpack.c.bf16 %v101_v5, %v101_v5  ;;  %v102_v9 = vld [vmem:[#allocation2] sm:$0xf]  ;;  %v95_v21 = vld [vmem:[#allocation7 + $0x4] sm:$0xf] }
  0x40   :  { %4829 = vmatpush3.bf16.msra.mxu0 %v5181_v1  ;;  %4837 = vmatpush3.bf16.msra.mxu1 %v5182_v2  ;;  %v165_v8 = vpack.c.bf16 %v93_v6, %v93_v6  ;;  %v5185_v32 = vld [vmem:[#allocation8 + $0x38] sm:$0xff]   ;;  %v5186_v33 = vld [vmem:[#allocation8 + $0x28] sm:$0xff]   ;;  %v5187_v34 = vld [vmem:[#allocation8 + $0x30] sm:$0xff]   ;;  %vm567_vm2 = vcmask 1041409   ;;  %vm569_vm3 = vcmask 1042434   ;;  %vm571_vm4 = vcmask 1043459  }
  0x41   :  { %4830 = vmatprep.subr.bf16.mxu0 %v5570_v0  ;;  %4838 = vmatprep.subr.bf16.mxu1 %v5570_v0  ;;  %v5188_v35 = vld [vmem:[#allocation8 + $0x20] sm:$0xff]   ;;  %v97_v36 = vld [vmem:[#allocation7 + $0x8] sm:$0xf]  ;;  %v99_v42 = vld [vmem:[#allocation7 + $0xc] sm:$0xf]  ;;  %vm574_vm5 = vcmask 60416  }
  0x42   :  { %v327_v37 = vpack.c.bf16 %v97_v36, %v97_v36  ;;  %v5679_v48 = vld [vmem:[%s6375_s5] ss:$0 sm:$0xff]  ;;  %v5191_v5 = vld [vmem:[#allocation10] sm:$0xff]   ;;  %vm862_vm6 = vcmask 257024  }
  0x43   :  { %v5192_v6 = vld [vmem:[#allocation10 + $0x20] sm:$0xff]  }
  0x44   :  { %4831 = vmatpush3.bf16.msra.mxu0 %v5183_v3  ;;  %4839 = vmatpush3.bf16.msra.mxu1 %v5184_v4  ;;  %v5189_v3 = vld [vmem:[#allocation10 + $0x8] sm:$0xff]   ;;  %v5717_v36 = vld [vmem:[#allocation5 + $0x10] sm:$0xff] }
  0x45   :  { %4844 = vmatprep.subr.bf16.mxu0 %v5570_v0  ;;  %4852 = vmatprep.subr.bf16.mxu1 %v5570_v0  ;;  %v5190_v4 = vld [vmem:[#allocation10 + $0x28] sm:$0xff]  }
  0x47   :  { %4833 = vmatmul.mubr.msk.bf16.vlgmr.msra.gmra.mxu0 %vm120_vm1, %v103_v7  ;;  %4841 = vmatmul.mubr.msk.bf16.vlgmr.msra.gmra.mxu1 %vm120_vm1, %v165_v8 }
  0x48   :  { %4848 = vmatprep.mubr.msk.bf16.mxu0 %vm5571_vm0, %v5570_v0  ;;  %4856 = vmatprep.mubr.msk.bf16.mxu1 %vm5571_vm0, %v5570_v0 }
  0x49   :  { %4853 = vmatpush3.bf16.msra.mxu1 %v5185_v32  ;;  %4845 = vmatpush3.bf16.msra.mxu0 %v5186_v33 }
  0x4a   :  { %4854 = vmatprep.subr.bf16.mxu1 %v5570_v0  ;;  %4846 = vmatprep.subr.bf16.mxu0 %v5570_v0 }
  0x4d   :  { %4855 = vmatpush3.bf16.msra.mxu1 %v5187_v34  ;;  %4847 = vmatpush3.bf16.msra.mxu0 %v5188_v35  ;;  %v5715_v35 = vld [vmem:[#allocation5 + $0x8] sm:$0xff] }
  0x4e   :  { %4860 = vmatprep.subr.bf16.mxu0 %v5570_v0  ;;  %4868 = vmatprep.subr.bf16.mxu1 %v5570_v0 }
  0x50   :  { %4857 = vmatmul.mubr.msk.bf16.vlgmr.msra.gmra.mxu1 %vm120_vm1, %v327_v37 }
  0x51   :  { %4872 = vmatprep.mubr.msk.bf16.mxu1 %vm5571_vm0, %v5570_v0  ;;  %4869 = vmatpush3.bf16.msra.mxu1 %v5190_v4  ;;  %v5574_v4 = vmov 0  }
  0x52   :  { %4870 = vmatprep.subr.bf16.mxu1 %v5570_v0  ;;  %5180 = vset.pattern.permute.xlu1 %v5574_v4 }
  0x53   :  { %5179 = vset.pattern.permute.xlu0 %v5574_v4 }
  0x55   :  { %4871 = vmatpush3.bf16.msra.mxu1 %v5192_v6 }
  0x56   :  { %4884 = vmatprep.subr.bf16.mxu1 %v5570_v0 }
 0x107   :  { %v158_v10 = vpop.f32.mrf.mxu0  ;;  %v220_v12 = vpop.f32.mrf.mxu1 }
 0x108   :  { %v164_v11 = vadd.f32 %v158_v10, %v102_v9 }
 0x109   :  { %v4834_v13 = vpop.f32.mrf.mxu0  ;;  %v4842_v15 = vpop.f32.mrf.mxu1 }
 0x10a   :  { %v226_v14 = vadd.f32 %v220_v12, %v164_v11  ;;  %v5573_v12 = vmov 1966171168  }
 0x10b   :  { %v161_v16 = vpop.f32.mrf.mxu0  ;;  %v223_v17 = vpop.f32.mrf.mxu1  ;;  %v486_v13 = vunpack.c.l.s4 %v5573_v12 }
 0x10c   :  { %5265 = vtanh.f32 %v226_v14  ;;  %v4564_v22 = vmul.f32 -1.442695, %v226_v14  ;;  %v488_v14 = vlaneseq }
 0x10d   :  { %v4835_v18 = vpop.f32.mrf.mxu0  ;;  %v4843_v19 = vpop.f32.mrf.mxu1  ;;  %v487_v15 = vunpack.c.0.s8 %v486_v13 }
 0x10e   :  { %5267 = vpow2.f32 %v4564_v22  ;;  %v489_v16 = vshrl.u32 %v488_v14, 7 }
 0x110   :  { %v382_v43 = vpop.f32.mrf.mxu1  ;;  %v5703_v17 = vsub.s32 %v487_v15, %v489_v16  ;;  %v5744_v6 = vsub.s32 2, %v489_v16 }
 0x112   :  { %v4858_v44 = vpop.f32.mrf.mxu1 }
 0x114   :  { %v385_v45 = vpop.f32.mrf.mxu1 }
 0x115   :  { %v5726_v45 = vld [vmem:[#allocation5 + $0x18] sm:$0xff] }
 0x116   :  { %v4859_v46 = vpop.f32.mrf.mxu1 }
 0x119   :  { %v5266_v20 = vpop.eup %5265 }
 0x11a   :  { %240 = vrot.lane.b32.xlu0 %v5266_v20, %s5572_s2 }
 0x11b   :  { %v5268_v23 = vpop.eup %5267 }
 0x11c   :  { %v230_v24 = vadd.f32 1.0, %v5268_v23 }
 0x11e   :  { %235 = vrot.lane.b32.xlu0 %v95_v21, %s5572_s2  ;;  %5269 = vrcp.f32 %v230_v24  ;;  %v5708_v21 = vsub.s32 0, %v489_v16 }
 0x12b   :  { %v5270_v25 = vpop.eup %5269 }
 0x18c   :  { %v241_v26 = vpop.permute.xlu0 %240 }
 0x18d   :  { %v243_v27 = vmul.f32 %v5270_v25, %v241_v26 }
 0x18f   :  { %245 = vrot.lane.b32.xlu1 %v243_v27, %s5572_s2 }
 0x190   :  { %v236_v28 = vpop.permute.xlu0 %235 }
 0x191   :  { %v238_v29 = vmul.f32 %v5270_v25, %v236_v28  ;;  %v5711_v28 = vld [vmem:[#allocation5] sm:$0xff] }
 0x201   :  { %v246_v30 = vpop.permute.xlu1 %245 }
 0x202   :  { %v5657_v31 = vadd.f32 %v246_v30, %v238_v29 }
 0x204   :  { %5271 = vtanh.f32 %v5657_v31 }
 0x211   :  { %v5272_v38 = vpop.eup %5271 }
 0x212   :  { %251 = vrot.lane.b32.xlu1 %v5272_v38, %s5572_s2 }
 0x284   :  { %v252_v39 = vpop.permute.xlu1 %251 }
 0x285   :  { %v254_v40 = vmul.f32 %v5270_v25, %v252_v39 }
 0x287   :  { %v256_v41 = vpack.c.bf16 %v254_v40, %v254_v40 }
 0x289   :  { %263 = vrot.lane.b32.xlu0 %v256_v41, %s5566_s9 }
 0x28d   :  { %397 = vrot.lane.b32.xlu0 %v99_v42, %s5572_s2 }
 0x2fb   :  { %v5670_v47 = vpop.permute.xlu0 %263 }
 0x2fc   :  { %4849 = vmatmul.mubr.msk.bf16.vlgmr.msra.gmra.mxu0 %vm120_vm1, %v5670_v47 }
 0x2fd   :  { %4864 = vmatprep.mubr.msk.bf16.mxu0 %vm5571_vm0, %v5570_v0  ;;  %4861 = vmatpush3.bf16.msra.mxu0 %v5189_v3 }
 0x2fe   :  { %4862 = vmatprep.subr.bf16.mxu0 %v5570_v0 }
 0x2ff   :  { %v398_v62 = vpop.permute.xlu0 %397 }
 0x301   :  { %4863 = vmatpush3.bf16.msra.mxu0 %v5191_v5  ;;  %v5742_v5 = vsub.s32 1, %v489_v16 }
 0x302   :  { %4876 = vmatprep.subr.bf16.mxu0 %v5570_v0 }
 0x3bc   :  { %v314_v49 = vpop.f32.mrf.mxu0 }
 0x3bd   :  { %v326_v50 = vadd.f32 %v5679_v48, %v314_v49 }
 0x3be   :  { %v4850_v51 = vpop.f32.mrf.mxu0 }
 0x3bf   :  { %v388_v52 = vadd.f32 %v382_v43, %v326_v50 }
 0x3c0   :  { %v317_v53 = vpop.f32.mrf.mxu0 }
 0x3c1   :  { %5273 = vtanh.f32 %v388_v52  ;;  %v4572_v56 = vmul.f32 -1.442695, %v388_v52  ;;  %v550_v52 = vand.u32 127, %v488_v14 }
 0x3c2   :  { %v4851_v54 = vpop.f32.mrf.mxu0 }
 0x3c3   :  { %5275 = vpow2.f32 %v4572_v56  ;;  %v5732_v54 = vsub.s32 %v550_v52, %v489_v16 }
 0x3ce   :  { %v5274_v55 = vpop.eup %5273 }
 0x3cf   :  { %402 = vrot.lane.b32.xlu1 %v5274_v55, %s5572_s2 }
 0x3d0   :  { %v5276_v57 = vpop.eup %5275 }
 0x3d1   :  { %v392_v58 = vadd.f32 1.0, %v5276_v57 }
 0x3d3   :  { %5277 = vrcp.f32 %v392_v58 }
 0x3e0   :  { %v5278_v59 = vpop.eup %5277 }
 0x3e1   :  { %v400_v63 = vmul.f32 %v5278_v59, %v398_v62 }
 0x441   :  { %v403_v60 = vpop.permute.xlu1 %402 }
 0x442   :  { %v405_v61 = vmul.f32 %v5278_v59, %v403_v60 }
 0x444   :  { %407 = vrot.lane.b32.xlu1 %v405_v61, %s5572_s2 }
 0x4b6   :  { %v408_v1 = vpop.permute.xlu1 %407 }
 0x4b7   :  { %v5684_v2 = vadd.f32 %v408_v1, %v400_v63 }
 0x4b9   :  { %5279 = vtanh.f32 %v5684_v2 }
 0x4c6   :  { %v5280_v7 = vpop.eup %5279 }
 0x4c7   :  { %413 = vrot.lane.b32.xlu0 %v5280_v7, %s5572_s2  ;;  %v5746_v7 = vsub.s32 3, %v489_v16 }
 0x539   :  { %v414_v8 = vpop.permute.xlu0 %413 }
 0x53a   :  { %v416_v9 = vmul.f32 %v5278_v59, %v414_v8 }
 0x53c   :  { %v421_v10 = vpack.c.bf16 %v416_v9, %v416_v9 }
 0x53e   :  { %427 = vrot.lane.b32.xlu1 %v421_v10, %s5566_s9 }
 0x5b0   :  { %v5693_v11 = vpop.permute.xlu1 %427 }
 0x5b1   :  { %4865 = vmatmul.mubr.msk.bf16.vlgmr.msra.gmra.mxu0 %vm120_vm1, %v5693_v11  ;;  %4873 = vmatmul.mubr.msk.bf16.vlgmr.msra.gmra.mxu1 %vm120_vm1, %v5693_v11 }
 0x5b2   :  { %4880 = vmatprep.mubr.msk.bf16.mxu0 %vm5571_vm0, %v5570_v0  ;;  %4888 = vmatprep.mubr.msk.bf16.mxu1 %vm5571_vm0, %v5570_v0 }
 0x671   :  { %v478_v18 = vpop.f32.mrf.mxu0  ;;  %v5705_v19 = vpop.f32.mrf.mxu1 }
 0x672   :  { %v491_v20 = vrot.slane %v478_v18, %v5703_v17 }
 0x673   :  { %v4866_v22 = vpop.f32.mrf.mxu0  ;;  %v4874_v23 = vpop.f32.mrf.mxu1 }
 0x674   :  { %v492_v24 = vcombine.high %v491_v20, %v491_v20  ;;  %v499_v25 = vrot.slane %v491_v20, %v5703_v17 }
 0x675   :  { %v481_v26 = vpop.f32.mrf.mxu0  ;;  %v791_v27 = vpop.f32.mrf.mxu1 }
 0x676   :  { %v506_v29 = vrot.slane %v492_v24, %v5703_v17  ;;  %v507_v30 = vcombine.high %v499_v25, %v499_v25  ;;  %v512_v32 = vrot.slane %v499_v25, %v5708_v21 }
 0x677   :  { %v4867_v33 = vpop.f32.mrf.mxu0  ;;  %v4875_v34 = vpop.f32.mrf.mxu1 }
 0x678   :  { %v529_v37 = vmul.f32 %v512_v32, %v5711_v28  ;;  %v516_v38 = vrot.slane %v506_v29, %v5708_v21  ;;  %v520_v39 = vrot.slane %v507_v30, %v5708_v21  ;;  %v508_v40 = vcombine.high %v506_v29, %v506_v29 }
 0x67a   :  { %v533_v41 = vsel %vm120_vm1, %v529_v37, 0.0  ;;  %v530_v42 = vmul.f32 %v516_v38, %v5715_v35  ;;  %v531_v43 = vmul.f32 %v520_v39, %v5717_v36  ;;  %v524_v44 = vrot.slane %v508_v40, %v5708_v21 }
 0x67b   :  { %534 = vadd.xlane.f32.xlu0 %v533_v41 }
 0x67c   :  { %v536_v46 = vsel %vm120_vm1, %v530_v42, 0.0  ;;  %v539_v49 = vsel %vm120_vm1, %v531_v43, 0.0  ;;  %v532_v50 = vmul.f32 %v524_v44, %v5726_v45 }
 0x67d   :  { %537 = vadd.xlane.f32.xlu1 %v536_v46 }
 0x67e   :  { %v542_v51 = vsel %vm120_vm1, %v532_v50, 0.0 }
 0x67f   :  { %540 = vadd.xlane.f32.xlu0 %v539_v49 }
 0x683   :  { %543 = vadd.xlane.f32.xlu0 %v542_v51 }
 0x704   :  { %v535_v53 = vpop.xlane.xlu0 %534 }
 0x705   :  { %v554_v58 = vrot.slane %v535_v53, %v5732_v54 }
 0x706   :  { %v538_v55 = vpop.xlane.xlu1 %537 }
 0x707   :  { %v558_v56 = vrot.slane %v538_v55, %v5732_v54 }
 0x708   :  { %v541_v57 = vpop.xlane.xlu0 %540 }
 0x709   :  { %v562_v59 = vrot.slane %v541_v57, %v5732_v54  ;;  %v568_v60 = vsel %vm567_vm2, %v558_v56, %v554_v58 }
 0x70b   :  { %v570_v63 = vsel %vm569_vm3, %v562_v59, %v568_v60  ;;  %v5193_v59 = vld [vmem:[#allocation10 + $0x18] sm:$0xff]   ;;  %v5194_v60 = vld [vmem:[#allocation10 + $0x10] sm:$0xff]  }
 0x70c   :  { %v544_v61 = vpop.xlane.xlu0 %543  ;;  %4877 = vmatpush3.bf16.msra.mxu0 %v5193_v59 }
 0x70d   :  { %v566_v62 = vrot.slane %v544_v61, %v5732_v54  ;;  %4878 = vmatprep.subr.bf16.mxu0 %v5570_v0 }
 0x70f   :  { %v572_v1 = vsel %vm571_vm4, %v566_v62, %v570_v63 }
 0x710   :  { %v575_v3 = vsel %vm574_vm5, %v572_v1, -inf  ;;  %4879 = vmatpush3.bf16.msra.mxu0 %v5194_v60 }
 0x711   :  { %576 = vmax.xlane.f32.xlu1 %v575_v3  ;;  %4892 = vmatprep.subr.bf16.mxu0 %v5570_v0 }
 0x79a   :  { %v577_v8 = vpop.xlane.xlu1 %576 }
 0x79b   :  { %v582_v9 = vrot.slane %v577_v8, %v5708_v21  ;;  %v586_v10 = vrot.slane %v577_v8, %v5742_v5  ;;  %v590_v12 = vrot.slane %v577_v8, %v5744_v6  ;;  %v594_v15 = vrot.slane %v577_v8, %v5746_v7 }
 0x79d   :  { %v599_v13 = vsub.f32 %v535_v53, %v582_v9  ;;  %v600_v14 = vsub.f32 %v538_v55, %v586_v10  ;;  %v601_v18 = vsub.f32 %v541_v57, %v590_v12  ;;  %v602_v23 = vsub.f32 %v544_v61, %v594_v15 }
 0x79f   :  { %v603_v20 = vmul.f32 1.442695, %v599_v13  ;;  %v605_v22 = vmul.f32 1.442695, %v600_v14  ;;  %v607_v24 = vmul.f32 1.442695, %v601_v18 }
 0x7a0   :  { %v609_v16 = vmul.f32 1.442695, %v602_v23 }
 0x7a1   :  { %5281 = vpow2.f32 %v603_v20 }
 0x7a2   :  { %5283 = vpow2.f32 %v605_v22 }
 0x7a3   :  { %5285 = vpow2.f32 %v607_v24 }
 0x7a4   :  { %5287 = vpow2.f32 %v609_v16 }
 0x7ae   :  { %v5282_v25 = vpop.eup %5281 }
 0x7af   :  { %v5284_v26 = vpop.eup %5283  ;;  %616 = vperm.xlu0 %5179, %v5282_v25  }
 0x7b0   :  { %619 = vperm.xlu1 %5180, %v5284_v26   ;;  %v5286_v27 = vpop.eup %5285 }
 0x7b1   :  { %v5288_v29 = vpop.eup %5287 }
 0x7b4   :  { %622 = vperm.xlu1 %5180, %v5286_v27  }
 0x7b8   :  { %625 = vperm.xlu1 %5180, %v5288_v29  }
 0x82a   :  { %v617_v32 = vpop.permute.xlu0 %616 }
 0x82b   :  { %v620_v30 = vpop.permute.xlu1 %619  ;;  %v630_v37 = vrot.slane %v617_v32, %v5732_v54 }
 0x82c   :  { %v634_v34 = vrot.slane %v620_v30, %v5732_v54 }
 0x82e   :  { %v643_v41 = vsel %vm567_vm2, %v634_v34, %v630_v37 }
 0x82f   :  { %v623_v33 = vpop.permute.xlu1 %622 }
 0x830   :  { %v638_v38 = vrot.slane %v623_v33, %v5732_v54 }
 0x832   :  { %v644_v42 = vsel %vm569_vm3, %v638_v38, %v643_v41 }
 0x833   :  { %v626_v39 = vpop.permute.xlu1 %625 }
 0x834   :  { %v642_v40 = vrot.slane %v626_v39, %v5732_v54 }
 0x836   :  { %v645_v43 = vsel %vm571_vm4, %v642_v40, %v644_v42 }
 0x837   :  { %v647_v44 = vsel %vm574_vm5, %v645_v43, 0.0 }
 0x838   :  { %648 = vadd.xlane.f32.xlu1 %v647_v44 }
 0x8c1   :  { %v649_v46 = vpop.xlane.xlu1 %648 }
 0x8c2   :  { %5289 = vrcp.f32 %v649_v46 }
 0x8cf   :  { %v5290_v49 = vpop.eup %5289 }
 0x8d0   :  { %v655_v50 = vrot.slane %v5290_v49, %v5708_v21  ;;  %v659_v52 = vrot.slane %v5290_v49, %v5742_v5  ;;  %v663_v55 = vrot.slane %v5290_v49, %v5744_v6  ;;  %v667_v57 = vrot.slane %v5290_v49, %v5746_v7 }
 0x8d2   :  { %v672_v51 = vmul.f32 %v5282_v25, %v655_v50  ;;  %v673_v53 = vmul.f32 %v5284_v26, %v659_v52  ;;  %v674_v56 = vmul.f32 %v5286_v27, %v663_v55  ;;  %v675_v58 = vmul.f32 %v5288_v29, %v667_v57 }
 0x8d4   :  { %678 = vperm.xlu0 %5179, %v672_v51  }
 0x8d8   :  { %683 = vperm.xlu0 %5179, %v673_v53  }
 0x8dc   :  { %688 = vperm.xlu0 %5179, %v674_v56  }
 0x8e0   :  { %693 = vperm.xlu0 %5179, %v675_v58  }
 0x94f   :  { %v679_v61 = vpop.permute.xlu0 %678 }
 0x950   :  { %v696_v62 = vmul.f32 %v679_v61, %v5711_v28  ;;  %v5195_v61 = vld [vmem:[#allocation8 + $0x18] sm:$0xff]  }
 0x952   :  { %v700_v63 = vsel %vm120_vm1, %v696_v62, 0.0 }
 0x953   :  { %v701_v1 = vrot.slane %v700_v63, 4  ;;  %v684_v3 = vpop.permute.xlu0 %683 }
 0x954   :  { %v697_v4 = vmul.f32 %v684_v3, %v5715_v35  ;;  %v5198_v3 = vld [vmem:[#allocation8 + $0x30] sm:$0xff]  }
 0x955   :  { %v702_v8 = vadd.f32 %v701_v1, %v700_v63  ;;  %v5196_v63 = vld [vmem:[#allocation8 + $0x10] sm:$0xff]   ;;  %v5197_v1 = vld [vmem:[#allocation8 + $0x38] sm:$0xff]  }
 0x956   :  { %v707_v9 = vsel %vm120_vm1, %v697_v4, 0.0  ;;  %v5199_v4 = vld [vmem:[#allocation8 + $0x8] sm:$0xff]  }
 0x957   :  { %v703_v10 = vrot.slane %v702_v8, 2  ;;  %v708_v12 = vrot.slane %v707_v9, 4  ;;  %v689_v13 = vpop.permute.xlu0 %688  ;;  %4885 = vmatpush3.bf16.msra.mxu1 %v5199_v4 }
 0x958   :  { %v698_v14 = vmul.f32 %v689_v13, %v5717_v36  ;;  %4886 = vmatprep.subr.bf16.mxu1 %v5570_v0 }
 0x959   :  { %v709_v15 = vadd.f32 %v708_v12, %v707_v9  ;;  %v704_v20 = vadd.f32 %v703_v10, %v702_v8 }
 0x95a   :  { %v714_v18 = vsel %vm120_vm1, %v698_v14, 0.0 }
 0x95b   :  { %v710_v22 = vrot.slane %v709_v15, 2  ;;  %v715_v23 = vrot.slane %v714_v18, 4  ;;  %v694_v24 = vpop.permute.xlu0 %693  ;;  %v705_v29 = vrot.slane %v704_v20, 1 }
 0x95c   :  { %v699_v16 = vmul.f32 %v694_v24, %v5726_v45 }
 0x95d   :  { %v711_v25 = vadd.f32 %v710_v22, %v709_v15  ;;  %v716_v26 = vadd.f32 %v715_v23, %v714_v18  ;;  %v706_v39 = vadd.f32 %v705_v29, %v704_v20 }
 0x95e   :  { %v721_v27 = vsel %vm120_vm1, %v699_v16, 0.0 }
 0x95f   :  { %v712_v30 = vrot.slane %v711_v25, 1  ;;  %v717_v32 = vrot.slane %v716_v26, 2  ;;  %v722_v33 = vrot.slane %v721_v27, 4  ;;  %v728_v46 = vpack.c.bf16 %v706_v39, %v706_v39 }
 0x961   :  { %v713_v34 = vadd.f32 %v712_v30, %v711_v25  ;;  %v718_v37 = vadd.f32 %v717_v32, %v716_v26  ;;  %v723_v38 = vadd.f32 %v722_v33, %v721_v27  ;;  %v798_v55 = vunpack.c.l.b16 %v728_v46  ;;  %v865_v25 = vld [vmem:[#allocation2 + $0x4] sm:$0xf] }
 0x963   :  { %v719_v40 = vrot.slane %v718_v37, 1  ;;  %v724_v41 = vrot.slane %v723_v38, 2  ;;  %v729_v42 = vpack.c.bf16 %v713_v34, %v713_v34 }
 0x965   :  { %v720_v43 = vadd.f32 %v719_v40, %v718_v37  ;;  %v725_v44 = vadd.f32 %v724_v41, %v723_v38  ;;  %v799_v51 = vunpack.c.l.b16 %v729_v42 }
 0x967   :  { %v730_v49 = vpack.c.bf16 %v720_v43, %v720_v43  ;;  %v726_v50 = vrot.slane %v725_v44, 1  ;;  %v802_v57 = vsel %vm567_vm2, %v799_v51, %v798_v55 }
 0x969   :  { %v727_v52 = vadd.f32 %v726_v50, %v725_v44  ;;  %v800_v53 = vunpack.c.l.b16 %v730_v49  ;;  %v5201_v49 = vld [vmem:[#allocation8 + $0x28] sm:$0xff]   ;;  %v5202_v50 = vld [vmem:[#allocation8 + $0x20] sm:$0xff]  }
 0x96b   :  { %v731_v56 = vpack.c.bf16 %v727_v52, %v727_v52  ;;  %v803_v59 = vsel %vm569_vm3, %v800_v53, %v802_v57 }
 0x96d   :  { %v801_v58 = vunpack.c.l.b16 %v731_v56 }
 0x96f   :  { %v804_v60 = vsel %vm571_vm4, %v801_v58, %v803_v59 }
 0x970   :  { %v805_v62 = vpack.c.b16 %v804_v60, %v804_v60 }
 0x972   :  { %4881 = vmatmul.mubr.msk.bf16.vlgmr.msra.gmra.mxu0 %vm120_vm1, %v805_v62 }
 0x973   :  { %4893 = vmatpush3.bf16.msra.mxu0 %v5195_v61  ;;  %4896 = vmatprep.mubr.msk.bf16.mxu0 %vm5571_vm0, %v5570_v0 }
 0x974   :  { %4894 = vmatprep.subr.bf16.mxu0 %v5570_v0 }
 0x977   :  { %4895 = vmatpush3.bf16.msra.mxu0 %v5196_v63 }
 0x978   :  { %4908 = vmatprep.subr.bf16.mxu0 %v5570_v0 }
 0x97a   :  { %4897 = vmatmul.mubr.msk.bf16.vlgmr.msra.gmra.mxu0 %vm120_vm1, %v5670_v47  ;;  %v5200_v47 = vld [vmem:[#allocation8] sm:$0xff]  }
 0x97b   :  { %4909 = vmatpush3.bf16.msra.mxu0 %v5197_v1  ;;  %4912 = vmatprep.mubr.msk.bf16.mxu0 %vm5571_vm0, %v5570_v0 }
 0x97c   :  { %4910 = vmatprep.subr.bf16.mxu0 %v5570_v0  ;;  %4887 = vmatpush3.bf16.msra.mxu1 %v5200_v47 }
 0x97d   :  { %4900 = vmatprep.subr.bf16.mxu1 %v5570_v0 }
 0x97f   :  { %4911 = vmatpush3.bf16.msra.mxu0 %v5198_v3 }
 0x980   :  { %4924 = vmatprep.subr.bf16.mxu0 %v5570_v0 }
 0x982   :  { %4913 = vmatmul.mubr.msk.bf16.vlgmr.msra.gmra.mxu0 %vm120_vm1, %v5693_v11 }
 0x983   :  { %4928 = vmatprep.mubr.msk.bf16.mxu0 %vm5571_vm0, %v5570_v0 }
 0xa32   :  { %v855_v8 = vpop.f32.mrf.mxu0 }
 0xa33   :  { %v856_v9 = vadd.f32 %v855_v8, %v5705_v19 }
 0xa34   :  { %v4882_v10 = vpop.f32.mrf.mxu0 }
 0xa35   :  { %5291 = vtanh.f32 %v856_v9 }
 0xa36   :  { %v858_v12 = vpop.f32.mrf.mxu0 }
 0xa37   :  { %v5203_v12 = vld [vmem:[#allocation10 + $0x8] sm:$0xff]  }
 0xa38   :  { %v4883_v13 = vpop.f32.mrf.mxu0 }
 0xa39   :  { %v5204_v13 = vld [vmem:[#allocation10 + $0x28] sm:$0xff]  }
 0xa3a   :  { %v977_v14 = vpop.f32.mrf.mxu0  ;;  %4925 = vmatpush3.bf16.msra.mxu0 %v5204_v13 }
 0xa3b   :  { %4926 = vmatprep.subr.bf16.mxu0 %v5570_v0 }
 0xa3c   :  { %v4898_v11 = vpop.f32.mrf.mxu0 }
 0xa3d   :  { %v5206_v11 = vld [vmem:[#allocation10 + $0x20] sm:$0xff]  }
 0xa3e   :  { %v980_v15 = vpop.f32.mrf.mxu0  ;;  %4927 = vmatpush3.bf16.msra.mxu0 %v5206_v11 }
 0xa3f   :  { %4940 = vmatprep.subr.bf16.mxu0 %v5570_v0 }
 0xa40   :  { %v4899_v18 = vpop.f32.mrf.mxu0 }
 0xa42   :  { %v5292_v20 = vpop.eup %5291  ;;  %v1129_v22 = vpop.f32.mrf.mxu0 }
 0xa43   :  { %v866_v23 = vpack.c.bf16 %v5292_v20, %v5292_v20  ;;  %863 = vst.msk [vmem:[#allocation11] sm:$0xf] %vm862_vm6, %v5292_v20 }
 0xa44   :  { %v4914_v24 = vpop.f32.mrf.mxu0 }
 0xa45   :  { %4889 = vmatmul.mubr.msk.bf16.vlgmr.msra.gmra.mxu1 %vm120_vm1, %v866_v23 }
 0xa46   :  { %v1132_v16 = vpop.f32.mrf.mxu0  ;;  %4904 = vmatprep.mubr.msk.bf16.mxu1 %vm5571_vm0, %v5570_v0  ;;  %4901 = vmatpush3.bf16.msra.mxu1 %v5201_v49 }
 0xa47   :  { %4902 = vmatprep.subr.bf16.mxu1 %v5570_v0 }
 0xa48   :  { %v4915_v19 = vpop.f32.mrf.mxu0 }
 0xa4a   :  { %4903 = vmatpush3.bf16.msra.mxu1 %v5202_v50 }
 0xa4b   :  { %4916 = vmatprep.subr.bf16.mxu1 %v5570_v0 }
 0xb05   :  { %v920_v26 = vpop.f32.mrf.mxu1 }
 0xb06   :  { %v926_v27 = vadd.f32 %v920_v26, %v865_v25 }
 0xb07   :  { %v4890_v29 = vpop.f32.mrf.mxu1 }
 0xb08   :  { %v983_v30 = vadd.f32 %v977_v14, %v926_v27  ;;  %v5205_v14 = vld [vmem:[#allocation10] sm:$0xff]  }
 0xb09   :  { %v923_v32 = vpop.f32.mrf.mxu1 }
 0xb0a   :  { %5293 = vtanh.f32 %v983_v30  ;;  %v4588_v37 = vmul.f32 -1.442695, %v983_v30 }
 0xb0b   :  { %v4891_v33 = vpop.f32.mrf.mxu1 }
 0xb0c   :  { %5295 = vpow2.f32 %v4588_v37 }
 0xb17   :  { %v5294_v34 = vpop.eup %5293 }
 0xb18   :  { %993 = vrot.lane.b32.xlu0 %v5294_v34, %s5572_s2 }
 0xb19   :  { %v5296_v38 = vpop.eup %5295 }
 0xb1a   :  { %v987_v39 = vadd.f32 1.0, %v5296_v38 }
 0xb1c   :  { %5297 = vrcp.f32 %v987_v39 }
 0xb29   :  { %v5298_v40 = vpop.eup %5297 }
 0xb2a   :  { %v991_v43 = vmul.f32 %v5298_v40, %v5657_v31 }
 0xb8a   :  { %v994_v41 = vpop.permute.xlu0 %993 }
 0xb8b   :  { %v996_v42 = vmul.f32 %v5298_v40, %v994_v41 }
 0xb8d   :  { %998 = vrot.lane.b32.xlu1 %v996_v42, %s5572_s2 }
 0xbff   :  { %v999_v44 = vpop.permute.xlu1 %998 }
 0xc00   :  { %v5802_v46 = vadd.f32 %v999_v44, %v991_v43 }
 0xc02   :  { %5299 = vtanh.f32 %v5802_v46 }
 0xc0f   :  { %v5300_v51 = vpop.eup %5299 }
 0xc10   :  { %1004 = vrot.lane.b32.xlu0 %v5300_v51, %s5572_s2 }
 0xc82   :  { %v1005_v52 = vpop.permute.xlu0 %1004 }
 0xc83   :  { %v1007_v53 = vmul.f32 %v5298_v40, %v1005_v52 }
 0xc85   :  { %v1009_v55 = vpack.c.bf16 %v1007_v53, %v1007_v53 }
 0xc87   :  { %1015 = vrot.lane.b32.xlu0 %v1009_v55, %s5566_s9 }
 0xcf9   :  { %v5809_v31 = vpop.permute.xlu0 %1015 }
 0xcfa   :  { %4905 = vmatmul.mubr.msk.bf16.vlgmr.msra.gmra.mxu1 %vm120_vm1, %v5809_v31 }
 0xcfb   :  { %4920 = vmatprep.mubr.msk.bf16.mxu1 %vm5571_vm0, %v5570_v0  ;;  %4917 = vmatpush3.bf16.msra.mxu1 %v5203_v12 }
 0xcfc   :  { %4918 = vmatprep.subr.bf16.mxu1 %v5570_v0 }
 0xcff   :  { %4919 = vmatpush3.bf16.msra.mxu1 %v5205_v14 }
 0xd00   :  { %4932 = vmatprep.subr.bf16.mxu1 %v5570_v0 }
 0xdba   :  { %v1066_v56 = vpop.f32.mrf.mxu1 }
 0xdbb   :  { %v1078_v57 = vadd.f32 %v5679_v48, %v1066_v56 }
 0xdbc   :  { %v4906_v58 = vpop.f32.mrf.mxu1 }
 0xdbd   :  { %v1135_v59 = vadd.f32 %v1129_v22, %v1078_v57 }
 0xdbe   :  { %v1069_v60 = vpop.f32.mrf.mxu1 }
 0xdbf   :  { %5301 = vtanh.f32 %v1135_v59  ;;  %v4596_v63 = vmul.f32 -1.442695, %v1135_v59 }
 0xdc0   :  { %v4907_v61 = vpop.f32.mrf.mxu1 }
 0xdc1   :  { %5303 = vpow2.f32 %v4596_v63 }
 0xdcc   :  { %v5302_v62 = vpop.eup %5301 }
 0xdcd   :  { %1145 = vrot.lane.b32.xlu0 %v5302_v62, %s5572_s2 }
 0xdce   :  { %v5304_v1 = vpop.eup %5303 }
 0xdcf   :  { %v1139_v3 = vadd.f32 1.0, %v5304_v1 }
 0xdd1   :  { %5305 = vrcp.f32 %v1139_v3 }
 0xdde   :  { %v5306_v4 = vpop.eup %5305 }
 0xddf   :  { %v1143_v48 = vmul.f32 %v5306_v4, %v5684_v2 }
 0xe3f   :  { %v1146_v47 = vpop.permute.xlu0 %1145 }
 0xe40   :  { %v1148_v8 = vmul.f32 %v5306_v4, %v1146_v47 }
 0xe42   :  { %1150 = vrot.lane.b32.xlu0 %v1148_v8, %s5572_s2 }
 0xeb4   :  { %v1151_v9 = vpop.permute.xlu0 %1150 }
 0xeb5   :  { %v5819_v10 = vadd.f32 %v1151_v9, %v1143_v48 }
 0xeb7   :  { %5307 = vtanh.f32 %v5819_v10 }
 0xec4   :  { %v5308_v2 = vpop.eup %5307 }
 0xec5   :  { %1156 = vrot.lane.b32.xlu1 %v5308_v2, %s5572_s2 }
 0xf37   :  { %v1157_v15 = vpop.permute.xlu1 %1156 }
 0xf38   :  { %v1159_v18 = vmul.f32 %v5306_v4, %v1157_v15 }
 0xf3a   :  { %v1164_v20 = vpack.c.bf16 %v1159_v18, %v1159_v18 }
 0xf3c   :  { %1170 = vrot.lane.b32.xlu0 %v1164_v20, %s5566_s9 }
 0xfae   :  { %v5828_v22 = vpop.permute.xlu0 %1170 }
 0xfaf   :  { %4921 = vmatmul.mubr.msk.bf16.vlgmr.msra.gmra.mxu1 %vm120_vm1, %v5828_v22  ;;  %4929 = vmatmul.mubr.msk.bf16.vlgmr.msra.gmra.mxu0 %vm120_vm1, %v5828_v22 }
 0xfb0   :  { %4936 = vmatprep.mubr.msk.bf16.mxu1 %vm5571_vm0, %v5570_v0  ;;  %4944 = vmatprep.mubr.msk.bf16.mxu0 %vm5571_vm0, %v5570_v0 }
0x106f   :  { %v1221_v23 = vpop.f32.mrf.mxu1  ;;  %v5838_v24 = vpop.f32.mrf.mxu0 }
0x1070   :  { %v1234_v16 = vrot.slane %v1221_v23, %v5703_v17 }
0x1071   :  { %v4922_v19 = vpop.f32.mrf.mxu1  ;;  %v4930_v25 = vpop.f32.mrf.mxu0 }
0x1072   :  { %v1235_v26 = vcombine.high %v1234_v16, %v1234_v16  ;;  %v1242_v27 = vrot.slane %v1234_v16, %v5703_v17 }
0x1073   :  { %v1224_v29 = vpop.f32.mrf.mxu1  ;;  %v1526_v30 = vpop.f32.mrf.mxu0 }
0x1074   :  { %v1249_v32 = vrot.slane %v1235_v26, %v5703_v17  ;;  %v1250_v33 = vcombine.high %v1242_v27, %v1242_v27  ;;  %v1255_v34 = vrot.slane %v1242_v27, %v5708_v21 }
0x1075   :  { %v4923_v37 = vpop.f32.mrf.mxu1  ;;  %v4931_v38 = vpop.f32.mrf.mxu0 }
0x1076   :  { %v1272_v39 = vmul.f32 %v1255_v34, %v5711_v28  ;;  %v1259_v40 = vrot.slane %v1249_v32, %v5708_v21  ;;  %v1263_v41 = vrot.slane %v1250_v33, %v5708_v21  ;;  %v1251_v42 = vcombine.high %v1249_v32, %v1249_v32 }
0x1078   :  { %v1276_v43 = vsel %vm120_vm1, %v1272_v39, 0.0  ;;  %v1273_v44 = vmul.f32 %v1259_v40, %v5715_v35  ;;  %v1274_v50 = vmul.f32 %v1263_v41, %v5717_v36  ;;  %v1267_v51 = vrot.slane %v1251_v42, %v5708_v21 }
0x1079   :  { %1277 = vadd.xlane.f32.xlu1 %v1276_v43 }
0x107a   :  { %v1279_v49 = vsel %vm120_vm1, %v1273_v44, 0.0  ;;  %v1282_v52 = vsel %vm120_vm1, %v1274_v50, 0.0  ;;  %v1275_v53 = vmul.f32 %v1267_v51, %v5726_v45 }
0x107b   :  { %1280 = vadd.xlane.f32.xlu0 %v1279_v49 }
0x107c   :  { %v1285_v55 = vsel %vm120_vm1, %v1275_v53, 0.0 }
0x107f   :  { %1283 = vadd.xlane.f32.xlu0 %v1282_v52 }
0x1083   :  { %1286 = vadd.xlane.f32.xlu0 %v1285_v55 }
0x1102   :  { %v1278_v57 = vpop.xlane.xlu1 %1277 }
0x1103   :  { %v1295_v61 = vrot.slane %v1278_v57, %v5732_v54 }
0x1104   :  { %v1281_v56 = vpop.xlane.xlu0 %1280 }
0x1105   :  { %v1299_v59 = vrot.slane %v1281_v56, %v5732_v54 }
0x1107   :  { %v1308_v1 = vsel %vm567_vm2, %v1299_v59, %v1295_v61  ;;  %v5207_v59 = vld [vmem:[#allocation10 + $0x18] sm:$0xff]  }
0x1108   :  { %v1284_v58 = vpop.xlane.xlu0 %1283  ;;  %4933 = vmatpush3.bf16.msra.mxu1 %v5207_v59  ;;  %v5211_v59 = vld [vmem:[#allocation8 + $0x38] sm:$0xff]  }
0x1109   :  { %v1303_v60 = vrot.slane %v1284_v58, %v5732_v54  ;;  %4934 = vmatprep.subr.bf16.mxu1 %v5570_v0 }
0x110b   :  { %v1309_v3 = vsel %vm569_vm3, %v1303_v60, %v1308_v1  ;;  %v5208_v60 = vld [vmem:[#allocation10 + $0x10] sm:$0xff]  }
0x110c   :  { %v1287_v62 = vpop.xlane.xlu0 %1286  ;;  %4935 = vmatpush3.bf16.msra.mxu1 %v5208_v60  ;;  %v5212_v60 = vld [vmem:[#allocation8 + $0x30] sm:$0xff]  }
0x110d   :  { %v1307_v63 = vrot.slane %v1287_v62, %v5732_v54  ;;  %4948 = vmatprep.subr.bf16.mxu1 %v5570_v0 }
0x110f   :  { %v1310_v4 = vsel %vm571_vm4, %v1307_v63, %v1309_v3 }
0x1110   :  { %v1312_v47 = vsel %vm574_vm5, %v1310_v4, -inf }
0x1111   :  { %1313 = vmax.xlane.f32.xlu1 %v1312_v47 }
0x119a   :  { %v1314_v8 = vpop.xlane.xlu1 %1313 }
0x119b   :  { %v1319_v48 = vrot.slane %v1314_v8, %v5708_v21  ;;  %v1323_v9 = vrot.slane %v1314_v8, %v5742_v5  ;;  %v1327_v12 = vrot.slane %v1314_v8, %v5744_v6  ;;  %v1331_v11 = vrot.slane %v1314_v8, %v5746_v7 }
0x119d   :  { %v1336_v13 = vsub.f32 %v1278_v57, %v1319_v48  ;;  %v1337_v14 = vsub.f32 %v1281_v56, %v1323_v9  ;;  %v1338_v2 = vsub.f32 %v1284_v58, %v1327_v12  ;;  %v1339_v20 = vsub.f32 %v1287_v62, %v1331_v11 }
0x119f   :  { %v1340_v15 = vmul.f32 1.442695, %v1336_v13  ;;  %v1342_v18 = vmul.f32 1.442695, %v1337_v14  ;;  %v1344_v23 = vmul.f32 1.442695, %v1338_v2 }
0x11a0   :  { %v1346_v16 = vmul.f32 1.442695, %v1339_v20 }
0x11a1   :  { %5309 = vpow2.f32 %v1340_v15 }
0x11a2   :  { %5311 = vpow2.f32 %v1342_v18 }
0x11a3   :  { %5313 = vpow2.f32 %v1344_v23 }
0x11a4   :  { %5315 = vpow2.f32 %v1346_v16 }
0x11ae   :  { %v5310_v19 = vpop.eup %5309 }
0x11af   :  { %v5312_v25 = vpop.eup %5311  ;;  %1353 = vperm.xlu0 %5179, %v5310_v19  }
0x11b0   :  { %1356 = vperm.xlu1 %5180, %v5312_v25   ;;  %v5314_v26 = vpop.eup %5313 }
0x11b1   :  { %v5316_v27 = vpop.eup %5315 }
0x11b4   :  { %1359 = vperm.xlu1 %5180, %v5314_v26  }
0x11b8   :  { %1362 = vperm.xlu1 %5180, %v5316_v27  }
0x122a   :  { %v1354_v30 = vpop.permute.xlu0 %1353 }
0x122b   :  { %v1357_v29 = vpop.permute.xlu1 %1356  ;;  %v1367_v34 = vrot.slane %v1354_v30, %v5732_v54 }
0x122c   :  { %v1371_v33 = vrot.slane %v1357_v29, %v5732_v54 }
0x122e   :  { %v1380_v39 = vsel %vm567_vm2, %v1371_v33, %v1367_v34 }
0x122f   :  { %v1360_v32 = vpop.permute.xlu1 %1359 }
0x1230   :  { %v1375_v37 = vrot.slane %v1360_v32, %v5732_v54 }
0x1232   :  { %v1381_v41 = vsel %vm569_vm3, %v1375_v37, %v1380_v39 }
0x1233   :  { %v1363_v38 = vpop.permute.xlu1 %1362 }
0x1234   :  { %v1379_v40 = vrot.slane %v1363_v38, %v5732_v54 }
0x1236   :  { %v1382_v42 = vsel %vm571_vm4, %v1379_v40, %v1381_v41 }
0x1237   :  { %v1384_v43 = vsel %vm574_vm5, %v1382_v42, 0.0 }
0x1238   :  { %1385 = vadd.xlane.f32.xlu0 %v1384_v43 }
0x12c1   :  { %v1386_v44 = vpop.xlane.xlu0 %1385 }
0x12c2   :  { %5317 = vrcp.f32 %v1386_v44 }
0x12cf   :  { %v5318_v49 = vpop.eup %5317 }
0x12d0   :  { %v1392_v50 = vrot.slane %v5318_v49, %v5708_v21  ;;  %v1396_v52 = vrot.slane %v5318_v49, %v5742_v5  ;;  %v1400_v55 = vrot.slane %v5318_v49, %v5744_v6  ;;  %v1404_v57 = vrot.slane %v5318_v49, %v5746_v7 }
0x12d2   :  { %v1409_v51 = vmul.f32 %v5310_v19, %v1392_v50  ;;  %v1410_v53 = vmul.f32 %v5312_v25, %v1396_v52  ;;  %v1411_v56 = vmul.f32 %v5314_v26, %v1400_v55  ;;  %v1412_v58 = vmul.f32 %v5316_v27, %v1404_v57 }
0x12d4   :  { %1415 = vperm.xlu1 %5180, %v1409_v51  }
0x12d8   :  { %1420 = vperm.xlu1 %5180, %v1410_v53  }
0x12dc   :  { %1425 = vperm.xlu1 %5180, %v1411_v56   ;;  %v5209_v56 = vld [vmem:[#allocation8 + $0x18] sm:$0xff]  }
0x12e0   :  { %1430 = vperm.xlu1 %5180, %v1412_v58   ;;  %v5210_v58 = vld [vmem:[#allocation8 + $0x10] sm:$0xff]  }
0x134f   :  { %v1416_v61 = vpop.permute.xlu1 %1415 }
0x1350   :  { %v1433_v62 = vmul.f32 %v1416_v61, %v5711_v28  ;;  %v5213_v61 = vld [vmem:[#allocation8 + $0x8] sm:$0xff]  }
0x1351   :  { %4941 = vmatpush3.bf16.msra.mxu0 %v5213_v61 }
0x1352   :  { %v1437_v63 = vsel %vm120_vm1, %v1433_v62, 0.0  ;;  %4942 = vmatprep.subr.bf16.mxu0 %v5570_v0 }
0x1353   :  { %v1438_v1 = vrot.slane %v1437_v63, 4  ;;  %v1421_v3 = vpop.permute.xlu1 %1420 }
0x1354   :  { %v1434_v4 = vmul.f32 %v1421_v3, %v5715_v35 }
0x1355   :  { %v1439_v47 = vadd.f32 %v1438_v1, %v1437_v63 }
0x1356   :  { %v1444_v8 = vsel %vm120_vm1, %v1434_v4, 0.0 }
0x1357   :  { %v1440_v48 = vrot.slane %v1439_v47, 2  ;;  %v1445_v9 = vrot.slane %v1444_v8, 4  ;;  %v1426_v12 = vpop.permute.xlu1 %1425 }
0x1358   :  { %v1435_v13 = vmul.f32 %v1426_v12, %v5717_v36 }
0x1359   :  { %v1446_v14 = vadd.f32 %v1445_v9, %v1444_v8  ;;  %v1441_v2 = vadd.f32 %v1440_v48, %v1439_v47 }
0x135a   :  { %v1451_v11 = vsel %vm120_vm1, %v1435_v13, 0.0 }
0x135b   :  { %v1447_v15 = vrot.slane %v1446_v14, 2  ;;  %v1452_v28 = vrot.slane %v1451_v11, 4  ;;  %v1431_v18 = vpop.permute.xlu1 %1430  ;;  %v1442_v19 = vrot.slane %v1441_v2, 1 }
0x135c   :  { %v1436_v20 = vmul.f32 %v1431_v18, %v5726_v45 }
0x135d   :  { %v1448_v23 = vadd.f32 %v1447_v15, %v1446_v14  ;;  %v1453_v16 = vadd.f32 %v1452_v28, %v1451_v11  ;;  %v1443_v32 = vadd.f32 %v1442_v19, %v1441_v2  ;;  %v1600_v2 = vld [vmem:[#allocation2 + $0x8] sm:$0xf] }
0x135e   :  { %v1458_v35 = vsel %vm120_vm1, %v1436_v20, 0.0 }
0x135f   :  { %v1449_v25 = vrot.slane %v1448_v23, 1  ;;  %v1454_v26 = vrot.slane %v1453_v16, 2  ;;  %v1459_v27 = vrot.slane %v1458_v35, 4  ;;  %v1465_v40 = vpack.c.bf16 %v1443_v32, %v1443_v32 }
0x1361   :  { %v1450_v29 = vadd.f32 %v1449_v25, %v1448_v23  ;;  %v1455_v30 = vadd.f32 %v1454_v26, %v1453_v16  ;;  %v1460_v36 = vadd.f32 %v1459_v27, %v1458_v35  ;;  %v1533_v49 = vunpack.c.l.b16 %v1465_v40 }
0x1363   :  { %v1456_v33 = vrot.slane %v1455_v30, 1  ;;  %v1461_v34 = vrot.slane %v1460_v36, 2  ;;  %v1466_v37 = vpack.c.bf16 %v1450_v29, %v1450_v29 }
0x1365   :  { %v1457_v38 = vadd.f32 %v1456_v33, %v1455_v30  ;;  %v1462_v39 = vadd.f32 %v1461_v34, %v1460_v36  ;;  %v1534_v42 = vunpack.c.l.b16 %v1466_v37  ;;  %v5215_v34 = vld [vmem:[#allocation8 + $0x28] sm:$0xff]   ;;  %v5216_v37 = vld [vmem:[#allocation8 + $0x20] sm:$0xff]  }
0x1367   :  { %v1467_v41 = vpack.c.bf16 %v1457_v38, %v1457_v38  ;;  %v1463_v45 = vrot.slane %v1462_v39, 1  ;;  %v1537_v51 = vsel %vm567_vm2, %v1534_v42, %v1533_v49 }
0x1369   :  { %v1464_v43 = vadd.f32 %v1463_v45, %v1462_v39  ;;  %v1535_v44 = vunpack.c.l.b16 %v1467_v41  ;;  %v5933_v45 = vld [vmem:[%s6375_s5] ss:$0 sm:$0xff] }
0x136b   :  { %v1468_v50 = vpack.c.bf16 %v1464_v43, %v1464_v43  ;;  %v1538_v53 = vsel %vm569_vm3, %v1535_v44, %v1537_v51 }
0x136d   :  { %v1536_v52 = vunpack.c.l.b16 %v1468_v50 }
0x136f   :  { %v1539_v55 = vsel %vm571_vm4, %v1536_v52, %v1538_v53 }
0x1370   :  { %v1540_v57 = vpack.c.b16 %v1539_v55, %v1539_v55 }
0x1372   :  { %4937 = vmatmul.mubr.msk.bf16.vlgmr.msra.gmra.mxu1 %vm120_vm1, %v1540_v57 }
0x1373   :  { %4949 = vmatpush3.bf16.msra.mxu1 %v5209_v56  ;;  %4952 = vmatprep.mubr.msk.bf16.mxu1 %vm5571_vm0, %v5570_v0 }
0x1374   :  { %4950 = vmatprep.subr.bf16.mxu1 %v5570_v0 }
0x1377   :  { %4951 = vmatpush3.bf16.msra.mxu1 %v5210_v58 }
0x1378   :  { %4964 = vmatprep.subr.bf16.mxu1 %v5570_v0 }
0x137a   :  { %4953 = vmatmul.mubr.msk.bf16.vlgmr.msra.gmra.mxu1 %vm120_vm1, %v5809_v31  ;;  %v5214_v31 = vld [vmem:[#allocation8] sm:$0xff]  }
0x137b   :  { %4965 = vmatpush3.bf16.msra.mxu1 %v5211_v59  ;;  %4968 = vmatprep.mubr.msk.bf16.mxu1 %vm5571_vm0, %v5570_v0 }
0x137c   :  { %4966 = vmatprep.subr.bf16.mxu1 %v5570_v0  ;;  %4943 = vmatpush3.bf16.msra.mxu0 %v5214_v31 }
0x137d   :  { %4956 = vmatprep.subr.bf16.mxu0 %v5570_v0 }
0x137f   :  { %4967 = vmatpush3.bf16.msra.mxu1 %v5212_v60 }
0x1380   :  { %4980 = vmatprep.subr.bf16.mxu1 %v5570_v0 }
0x1382   :  { %4969 = vmatmul.mubr.msk.bf16.vlgmr.msra.gmra.mxu1 %vm120_vm1, %v5828_v22 }
0x1383   :  { %4984 = vmatprep.mubr.msk.bf16.mxu1 %vm5571_vm0, %v5570_v0 }
0x1432   :  { %v1590_v62 = vpop.f32.mrf.mxu1 }
0x1433   :  { %v1591_v63 = vadd.f32 %v1590_v62, %v5838_v24  ;;  %v5217_v62 = vld [vmem:[#allocation10 + $0x8] sm:$0xff]  }
0x1434   :  { %v4938_v1 = vpop.f32.mrf.mxu1 }
0x1435   :  { %5319 = vtanh.f32 %v1591_v63  ;;  %v5218_v63 = vld [vmem:[#allocation10 + $0x28] sm:$0xff]   ;;  %v5219_v1 = vld [vmem:[#allocation10] sm:$0xff]  }
0x1436   :  { %v1593_v3 = vpop.f32.mrf.mxu1  ;;  %4981 = vmatpush3.bf16.msra.mxu1 %v5218_v63 }
0x1437   :  { %v5220_v3 = vld [vmem:[#allocation10 + $0x20] sm:$0xff]   ;;  %4982 = vmatprep.subr.bf16.mxu1 %v5570_v0 }
0x1438   :  { %v4939_v4 = vpop.f32.mrf.mxu1 }
0x143a   :  { %v1712_v47 = vpop.f32.mrf.mxu1  ;;  %4983 = vmatpush3.bf16.msra.mxu1 %v5220_v3 }
0x143b   :  { %4996 = vmatprep.subr.bf16.mxu1 %v5570_v0 }
0x143c   :  { %v4954_v22 = vpop.f32.mrf.mxu1 }
0x143e   :  { %v1715_v8 = vpop.f32.mrf.mxu1 }
0x1440   :  { %v4955_v48 = vpop.f32.mrf.mxu1 }
0x1442   :  { %v5320_v9 = vpop.eup %5319  ;;  %v1864_v12 = vpop.f32.mrf.mxu1 }
0x1443   :  { %v1601_v13 = vpack.c.bf16 %v5320_v9, %v5320_v9  ;;  %1598 = vst.msk [vmem:[#allocation11 + $0x4] sm:$0xf] %vm862_vm6, %v5320_v9 }
0x1444   :  { %v4970_v14 = vpop.f32.mrf.mxu1 }
0x1445   :  { %4945 = vmatmul.mubr.msk.bf16.vlgmr.msra.gmra.mxu0 %vm120_vm1, %v1601_v13 }
0x1446   :  { %v1867_v11 = vpop.f32.mrf.mxu1  ;;  %4960 = vmatprep.mubr.msk.bf16.mxu0 %vm5571_vm0, %v5570_v0  ;;  %4957 = vmatpush3.bf16.msra.mxu0 %v5215_v34 }
0x1447   :  { %4958 = vmatprep.subr.bf16.mxu0 %v5570_v0 }
0x1448   :  { %v4971_v24 = vpop.f32.mrf.mxu1 }
0x144a   :  { %4959 = vmatpush3.bf16.msra.mxu0 %v5216_v37 }
0x144b   :  { %4972 = vmatprep.subr.bf16.mxu0 %v5570_v0 }
0x1505   :  { %v1655_v15 = vpop.f32.mrf.mxu0 }
0x1506   :  { %v1661_v28 = vadd.f32 %v1655_v15, %v1600_v2 }
0x1507   :  { %v4946_v18 = vpop.f32.mrf.mxu0 }
0x1508   :  { %v1718_v20 = vadd.f32 %v1712_v47, %v1661_v28  ;;  %v5962_v28 = vld [vmem:[#allocation5] sm:$0xff] }
0x1509   :  { %v1658_v23 = vpop.f32.mrf.mxu0 }
0x150a   :  { %5321 = vtanh.f32 %v1718_v20  ;;  %v4612_v19 = vmul.f32 -1.442695, %v1718_v20 }
0x150b   :  { %v4947_v16 = vpop.f32.mrf.mxu0 }
0x150c   :  { %5323 = vpow2.f32 %v4612_v19  ;;  %v5966_v19 = vld [vmem:[#allocation5 + $0x8] sm:$0xff] }
0x1517   :  { %v5322_v35 = vpop.eup %5321 }
0x1518   :  { %1728 = vrot.lane.b32.xlu1 %v5322_v35, %s5572_s2 }
0x1519   :  { %v5324_v25 = vpop.eup %5323 }
0x151a   :  { %v1722_v26 = vadd.f32 1.0, %v5324_v25  ;;  %v5968_v25 = vld [vmem:[#allocation5 + $0x10] sm:$0xff] }
0x151c   :  { %5325 = vrcp.f32 %v1722_v26 }
0x1529   :  { %v5326_v27 = vpop.eup %5325 }
0x152a   :  { %v1726_v36 = vmul.f32 %v5326_v27, %v5802_v46 }
0x158a   :  { %v1729_v29 = vpop.permute.xlu1 %1728 }
0x158b   :  { %v1731_v30 = vmul.f32 %v5326_v27, %v1729_v29 }
0x158d   :  { %1733 = vrot.lane.b32.xlu1 %v1731_v30, %s5572_s2 }
0x15ff   :  { %v1734_v32 = vpop.permute.xlu1 %1733 }
0x1600   :  { %v5917_v33 = vadd.f32 %v1734_v32, %v1726_v36  ;;  %v5973_v36 = vld [vmem:[#allocation5 + $0x18] sm:$0xff] }
0x1602   :  { %5327 = vtanh.f32 %v5917_v33 }
0x160f   :  { %v5328_v38 = vpop.eup %5327 }
0x1610   :  { %1739 = vrot.lane.b32.xlu1 %v5328_v38, %s5572_s2 }
0x1682   :  { %v1740_v39 = vpop.permute.xlu1 %1739 }
0x1683   :  { %v1742_v40 = vmul.f32 %v5326_v27, %v1740_v39 }
0x1685   :  { %v1744_v41 = vpack.c.bf16 %v1742_v40, %v1742_v40 }
0x1687   :  { %1750 = vrot.lane.b32.xlu0 %v1744_v41, %s5566_s9 }
0x16f9   :  { %v5924_v46 = vpop.permute.xlu0 %1750 }
0x16fa   :  { %4961 = vmatmul.mubr.msk.bf16.vlgmr.msra.gmra.mxu0 %vm120_vm1, %v5924_v46 }
0x16fb   :  { %4976 = vmatprep.mubr.msk.bf16.mxu0 %vm5571_vm0, %v5570_v0  ;;  %4973 = vmatpush3.bf16.msra.mxu0 %v5217_v62 }
0x16fc   :  { %4974 = vmatprep.subr.bf16.mxu0 %v5570_v0 }
0x16ff   :  { %4975 = vmatpush3.bf16.msra.mxu0 %v5219_v1 }
0x1700   :  { %4988 = vmatprep.subr.bf16.mxu0 %v5570_v0 }
0x17ba   :  { %v1801_v42 = vpop.f32.mrf.mxu0 }
0x17bb   :  { %v1813_v43 = vadd.f32 %v5933_v45, %v1801_v42 }
0x17bc   :  { %v4962_v44 = vpop.f32.mrf.mxu0 }
0x17bd   :  { %v1870_v49 = vadd.f32 %v1864_v12, %v1813_v43 }
0x17be   :  { %v1804_v50 = vpop.f32.mrf.mxu0 }
0x17bf   :  { %5329 = vtanh.f32 %v1870_v49  ;;  %v4620_v53 = vmul.f32 -1.442695, %v1870_v49 }
0x17c0   :  { %v4963_v51 = vpop.f32.mrf.mxu0 }
0x17c1   :  { %5331 = vpow2.f32 %v4620_v53 }
0x17cc   :  { %v5330_v52 = vpop.eup %5329 }
0x17cd   :  { %1880 = vrot.lane.b32.xlu1 %v5330_v52, %s5572_s2 }
0x17ce   :  { %v5332_v55 = vpop.eup %5331 }
0x17cf   :  { %v1874_v56 = vadd.f32 1.0, %v5332_v55 }
0x17d1   :  { %5333 = vrcp.f32 %v1874_v56 }
0x17de   :  { %v5334_v57 = vpop.eup %5333 }
0x17df   :  { %v1878_v60 = vmul.f32 %v5334_v57, %v5819_v10 }
0x183f   :  { %v1881_v58 = vpop.permute.xlu1 %1880 }
0x1840   :  { %v1883_v59 = vmul.f32 %v5334_v57, %v1881_v58 }
0x1842   :  { %1885 = vrot.lane.b32.xlu1 %v1883_v59, %s5572_s2 }
0x18b4   :  { %v1886_v61 = vpop.permute.xlu1 %1885 }
0x18b5   :  { %v5939_v31 = vadd.f32 %v1886_v61, %v1878_v60 }
0x18b7   :  { %5335 = vtanh.f32 %v5939_v31 }
0x18c4   :  { %v5336_v10 = vpop.eup %5335 }
0x18c5   :  { %1891 = vrot.lane.b32.xlu1 %v5336_v10, %s5572_s2 }
0x1937   :  { %v1892_v4 = vpop.permute.xlu1 %1891 }
0x1938   :  { %v1894_v47 = vmul.f32 %v5334_v57, %v1892_v4 }
0x193a   :  { %v1899_v22 = vpack.c.bf16 %v1894_v47, %v1894_v47 }
0x193c   :  { %1905 = vrot.lane.b32.xlu1 %v1899_v22, %s5566_s9 }
0x19ae   :  { %v5948_v8 = vpop.permute.xlu1 %1905 }
0x19af   :  { %4977 = vmatmul.mubr.msk.bf16.vlgmr.msra.gmra.mxu0 %vm120_vm1, %v5948_v8  ;;  %4985 = vmatmul.mubr.msk.bf16.vlgmr.msra.gmra.mxu1 %vm120_vm1, %v5948_v8 }
0x19b0   :  { %4992 = vmatprep.mubr.msk.bf16.mxu0 %vm5571_vm0, %v5570_v0  ;;  %5000 = vmatprep.mubr.msk.bf16.mxu1 %vm5571_vm0, %v5570_v0 }
0x1a6f   :  { %v1956_v48 = vpop.f32.mrf.mxu0  ;;  %v5958_v9 = vpop.f32.mrf.mxu1 }
0x1a70   :  { %v1969_v12 = vrot.slane %v1956_v48, %v5703_v17 }
0x1a71   :  { %v4978_v13 = vpop.f32.mrf.mxu0  ;;  %v4986_v14 = vpop.f32.mrf.mxu1 }
0x1a72   :  { %v1970_v11 = vcombine.high %v1969_v12, %v1969_v12  ;;  %v1977_v24 = vrot.slane %v1969_v12, %v5703_v17 }
0x1a73   :  { %v1959_v2 = vpop.f32.mrf.mxu0  ;;  %v2261_v15 = vpop.f32.mrf.mxu1 }
0x1a74   :  { %v1984_v18 = vrot.slane %v1970_v11, %v5703_v17  ;;  %v1985_v20 = vcombine.high %v1977_v24, %v1977_v24  ;;  %v1990_v23 = vrot.slane %v1977_v24, %v5708_v21 }
0x1a75   :  { %v4979_v16 = vpop.f32.mrf.mxu0  ;;  %v4987_v35 = vpop.f32.mrf.mxu1 }
0x1a76   :  { %v2007_v26 = vmul.f32 %v1990_v23, %v5962_v28  ;;  %v1994_v27 = vrot.slane %v1984_v18, %v5708_v21  ;;  %v1998_v29 = vrot.slane %v1985_v20, %v5708_v21  ;;  %v1986_v30 = vcombine.high %v1984_v18, %v1984_v18 }
0x1a78   :  { %v2011_v32 = vsel %vm120_vm1, %v2007_v26, 0.0  ;;  %v2008_v34 = vmul.f32 %v1994_v27, %v5966_v19  ;;  %v2009_v37 = vmul.f32 %v1998_v29, %v5968_v25  ;;  %v2002_v38 = vrot.slane %v1986_v30, %v5708_v21 }
0x1a79   :  { %2012 = vadd.xlane.f32.xlu1 %v2011_v32 }
0x1a7a   :  { %v2014_v39 = vsel %vm120_vm1, %v2008_v34, 0.0  ;;  %v2010_v40 = vmul.f32 %v2002_v38, %v5973_v36  ;;  %v2017_v41 = vsel %vm120_vm1, %v2009_v37, 0.0 }
0x1a7b   :  { %2015 = vadd.xlane.f32.xlu0 %v2014_v39 }
0x1a7c   :  { %v2020_v42 = vsel %vm120_vm1, %v2010_v40, 0.0 }
0x1a7d   :  { %2018 = vadd.xlane.f32.xlu1 %v2017_v41 }
0x1a7f   :  { %2021 = vadd.xlane.f32.xlu0 %v2020_v42 }
0x1b02   :  { %v2013_v43 = vpop.xlane.xlu1 %2012 }
0x1b03   :  { %v2030_v49 = vrot.slane %v2013_v43, %v5732_v54 }
0x1b04   :  { %v2016_v44 = vpop.xlane.xlu0 %2015 }
0x1b05   :  { %v2034_v50 = vrot.slane %v2016_v44, %v5732_v54 }
0x1b06   :  { %v2019_v51 = vpop.xlane.xlu1 %2018 }
0x1b07   :  { %v2038_v52 = vrot.slane %v2019_v51, %v5732_v54  ;;  %v2043_v53 = vsel %vm567_vm2, %v2034_v50, %v2030_v49 }
0x1b08   :  { %v2022_v55 = vpop.xlane.xlu0 %2021 }
0x1b09   :  { %v2042_v56 = vrot.slane %v2022_v55, %v5732_v54  ;;  %v2044_v57 = vsel %vm569_vm3, %v2038_v52, %v2043_v53  ;;  %v5222_v52 = vld [vmem:[#allocation10 + $0x10] sm:$0xff]  }
0x1b0b   :  { %v2045_v58 = vsel %vm571_vm4, %v2042_v56, %v2044_v57 }
0x1b0c   :  { %v2047_v59 = vsel %vm574_vm5, %v2045_v58, -inf }
0x1b0d   :  { %2048 = vmax.xlane.f32.xlu1 %v2047_v59 }
0x1b96   :  { %v2049_v60 = vpop.xlane.xlu1 %2048 }
0x1b97   :  { %v2054_v61 = vrot.slane %v2049_v60, %v5708_v21  ;;  %v2058_v62 = vrot.slane %v2049_v60, %v5742_v5  ;;  %v2062_v63 = vrot.slane %v2049_v60, %v5744_v6  ;;  %v2066_v1 = vrot.slane %v2049_v60, %v5746_v7 }
0x1b99   :  { %v2071_v3 = vsub.f32 %v2013_v43, %v2054_v61  ;;  %v2072_v10 = vsub.f32 %v2016_v44, %v2058_v62  ;;  %v2074_v4 = vsub.f32 %v2022_v55, %v2066_v1  ;;  %v2073_v47 = vsub.f32 %v2019_v51, %v2062_v63  ;;  %v5221_v51 = vld [vmem:[#allocation10 + $0x18] sm:$0xff]  }
0x1b9a   :  { %4989 = vmatpush3.bf16.msra.mxu0 %v5221_v51 }
0x1b9b   :  { %v2075_v22 = vmul.f32 1.442695, %v2071_v3  ;;  %v2077_v48 = vmul.f32 1.442695, %v2072_v10  ;;  %v2081_v12 = vmul.f32 1.442695, %v2074_v4  ;;  %4990 = vmatprep.subr.bf16.mxu0 %v5570_v0 }
0x1b9c   :  { %v2079_v13 = vmul.f32 1.442695, %v2073_v47 }
0x1b9d   :  { %5337 = vpow2.f32 %v2075_v22 }
0x1b9e   :  { %5339 = vpow2.f32 %v2077_v48  ;;  %4991 = vmatpush3.bf16.msra.mxu0 %v5222_v52 }
0x1b9f   :  { %5341 = vpow2.f32 %v2081_v12  ;;  %5004 = vmatprep.subr.bf16.mxu0 %v5570_v0 }
0x1ba0   :  { %5343 = vpow2.f32 %v2079_v13 }
0x1baa   :  { %v5338_v14 = vpop.eup %5337 }
0x1bab   :  { %v5340_v11 = vpop.eup %5339  ;;  %2088 = vperm.xlu0 %5179, %v5338_v14  }
0x1bac   :  { %2091 = vperm.xlu1 %5180, %v5340_v11   ;;  %v5342_v24 = vpop.eup %5341 }
0x1bad   :  { %v5344_v2 = vpop.eup %5343 }
0x1baf   :  { %2097 = vperm.xlu0 %5179, %v5342_v24  }
0x1bb0   :  { %2094 = vperm.xlu1 %5180, %v5344_v2  }
0x1c26   :  { %v2089_v15 = vpop.permute.xlu0 %2088 }
0x1c27   :  { %v2092_v18 = vpop.permute.xlu1 %2091  ;;  %v2102_v23 = vrot.slane %v2089_v15, %v5732_v54 }
0x1c28   :  { %v2106_v20 = vrot.slane %v2092_v18, %v5732_v54 }
0x1c2a   :  { %v2098_v16 = vpop.permute.xlu0 %2097  ;;  %v2115_v29 = vsel %vm567_vm2, %v2106_v20, %v2102_v23 }
0x1c2b   :  { %v2095_v35 = vpop.permute.xlu1 %2094  ;;  %v2114_v26 = vrot.slane %v2098_v16, %v5732_v54 }
0x1c2c   :  { %v2110_v27 = vrot.slane %v2095_v35, %v5732_v54 }
0x1c2e   :  { %v2116_v30 = vsel %vm569_vm3, %v2110_v27, %v2115_v29 }
0x1c2f   :  { %v2117_v32 = vsel %vm571_vm4, %v2114_v26, %v2116_v30 }
0x1c30   :  { %v2119_v34 = vsel %vm574_vm5, %v2117_v32, 0.0 }
0x1c31   :  { %2120 = vadd.xlane.f32.xlu1 %v2119_v34 }
0x1cba   :  { %v2121_v37 = vpop.xlane.xlu1 %2120 }
0x1cbb   :  { %5345 = vrcp.f32 %v2121_v37 }
0x1cc8   :  { %v5346_v38 = vpop.eup %5345 }
0x1cc9   :  { %v2127_v39 = vrot.slane %v5346_v38, %v5708_v21  ;;  %v2131_v41 = vrot.slane %v5346_v38, %v5742_v5  ;;  %v2135_v43 = vrot.slane %v5346_v38, %v5744_v6  ;;  %v2139_v49 = vrot.slane %v5346_v38, %v5746_v7 }
0x1ccb   :  { %v2144_v40 = vmul.f32 %v5338_v14, %v2127_v39  ;;  %v2145_v42 = vmul.f32 %v5340_v11, %v2131_v41  ;;  %v2146_v44 = vmul.f32 %v5344_v2, %v2135_v43  ;;  %v2147_v50 = vmul.f32 %v5342_v24, %v2139_v49 }
0x1ccd   :  { %2150 = vperm.xlu0 %5179, %v2144_v40  }
0x1cd1   :  { %2155 = vperm.xlu0 %5179, %v2145_v42  }
0x1cd5   :  { %2160 = vperm.xlu0 %5179, %v2146_v44  }
0x1cd9   :  { %2165 = vperm.xlu0 %5179, %v2147_v50  }
0x1d48   :  { %v2151_v53 = vpop.permute.xlu0 %2150 }
0x1d49   :  { %v2168_v55 = vmul.f32 %v2151_v53, %v5962_v28  ;;  %v5223_v53 = vld [vmem:[#allocation8 + $0x18] sm:$0xff]  }
0x1d4b   :  { %v2172_v56 = vsel %vm120_vm1, %v2168_v55, 0.0 }
0x1d4c   :  { %v2173_v57 = vrot.slane %v2172_v56, 4  ;;  %v2156_v58 = vpop.permute.xlu0 %2155 }
0x1d4d   :  { %v2169_v59 = vmul.f32 %v2156_v58, %v5966_v19  ;;  %v5226_v58 = vld [vmem:[#allocation8 + $0x30] sm:$0xff]  }
0x1d4e   :  { %v2174_v60 = vadd.f32 %v2173_v57, %v2172_v56  ;;  %v5224_v56 = vld [vmem:[#allocation8 + $0x10] sm:$0xff]   ;;  %v5225_v57 = vld [vmem:[#allocation8 + $0x38] sm:$0xff]  }
0x1d4f   :  { %v2179_v61 = vsel %vm120_vm1, %v2169_v59, 0.0  ;;  %v5227_v59 = vld [vmem:[#allocation8 + $0x8] sm:$0xff]  }
0x1d50   :  { %v2175_v62 = vrot.slane %v2174_v60, 2  ;;  %v2180_v63 = vrot.slane %v2179_v61, 4  ;;  %v2161_v1 = vpop.permute.xlu0 %2160  ;;  %4997 = vmatpush3.bf16.msra.mxu1 %v5227_v59 }
0x1d51   :  { %v2170_v3 = vmul.f32 %v2161_v1, %v5968_v25  ;;  %4998 = vmatprep.subr.bf16.mxu1 %v5570_v0 }
0x1d52   :  { %v2181_v10 = vadd.f32 %v2180_v63, %v2179_v61  ;;  %v2176_v47 = vadd.f32 %v2175_v62, %v2174_v60 }
0x1d53   :  { %v2186_v4 = vsel %vm120_vm1, %v2170_v3, 0.0 }
0x1d54   :  { %v2182_v22 = vrot.slane %v2181_v10, 2  ;;  %v2187_v48 = vrot.slane %v2186_v4, 4  ;;  %v2166_v12 = vpop.permute.xlu0 %2165  ;;  %v2177_v2 = vrot.slane %v2176_v47, 1 }
0x1d55   :  { %v2171_v13 = vmul.f32 %v2166_v12, %v5973_v36 }
0x1d56   :  { %v2183_v14 = vadd.f32 %v2182_v22, %v2181_v10  ;;  %v2188_v11 = vadd.f32 %v2187_v48, %v2186_v4  ;;  %v2178_v26 = vadd.f32 %v2177_v2, %v2176_v47 }
0x1d57   :  { %v2193_v24 = vsel %vm120_vm1, %v2171_v13, 0.0 }
0x1d58   :  { %v2184_v15 = vrot.slane %v2183_v14, 1  ;;  %v2189_v18 = vrot.slane %v2188_v11, 2  ;;  %v2194_v20 = vrot.slane %v2193_v24, 4  ;;  %v2200_v37 = vpack.c.bf16 %v2178_v26, %v2178_v26 }
0x1d5a   :  { %v2185_v23 = vadd.f32 %v2184_v15, %v2183_v14  ;;  %v2190_v16 = vadd.f32 %v2189_v18, %v2188_v11  ;;  %v2195_v35 = vadd.f32 %v2194_v20, %v2193_v24  ;;  %v2268_v43 = vunpack.c.l.b16 %v2200_v37  ;;  %v2335_v14 = vld [vmem:[#allocation2 + $0xc] sm:$0xf] }
0x1d5c   :  { %v2191_v27 = vrot.slane %v2190_v16, 1  ;;  %v2196_v29 = vrot.slane %v2195_v35, 2  ;;  %v2201_v30 = vpack.c.bf16 %v2185_v23, %v2185_v23 }
0x1d5e   :  { %v2192_v32 = vadd.f32 %v2191_v27, %v2190_v16  ;;  %v2197_v34 = vadd.f32 %v2196_v29, %v2195_v35  ;;  %v2269_v40 = vunpack.c.l.b16 %v2201_v30 }
0x1d60   :  { %v2202_v38 = vpack.c.bf16 %v2192_v32, %v2192_v32  ;;  %v2198_v39 = vrot.slane %v2197_v34, 1  ;;  %v2272_v49 = vsel %vm567_vm2, %v2269_v40, %v2268_v43 }
0x1d62   :  { %v2199_v41 = vadd.f32 %v2198_v39, %v2197_v34  ;;  %v2270_v42 = vunpack.c.l.b16 %v2202_v38  ;;  %v5229_v38 = vld [vmem:[#allocation8 + $0x28] sm:$0xff]   ;;  %v5230_v39 = vld [vmem:[#allocation8 + $0x20] sm:$0xff]  }
0x1d64   :  { %v2203_v44 = vpack.c.bf16 %v2199_v41, %v2199_v41  ;;  %v2273_v51 = vsel %vm569_vm3, %v2270_v42, %v2272_v49 }
0x1d66   :  { %v2271_v50 = vunpack.c.l.b16 %v2203_v44 }
0x1d68   :  { %v2274_v52 = vsel %vm571_vm4, %v2271_v50, %v2273_v51 }
0x1d69   :  { %v2275_v55 = vpack.c.b16 %v2274_v52, %v2274_v52 }
0x1d6b   :  { %4993 = vmatmul.mubr.msk.bf16.vlgmr.msra.gmra.mxu0 %vm120_vm1, %v2275_v55 }
0x1d6c   :  { %5005 = vmatpush3.bf16.msra.mxu0 %v5223_v53  ;;  %5008 = vmatprep.mubr.msk.bf16.mxu0 %vm5571_vm0, %v5570_v0 }
0x1d6d   :  { %5006 = vmatprep.subr.bf16.mxu0 %v5570_v0 }
0x1d70   :  { %5007 = vmatpush3.bf16.msra.mxu0 %v5224_v56 }
0x1d71   :  { %5020 = vmatprep.subr.bf16.mxu0 %v5570_v0 }
0x1d73   :  { %5009 = vmatmul.mubr.msk.bf16.vlgmr.msra.gmra.mxu0 %vm120_vm1, %v5924_v46  ;;  %v5228_v46 = vld [vmem:[#allocation8] sm:$0xff]  }
0x1d74   :  { %5021 = vmatpush3.bf16.msra.mxu0 %v5225_v57  ;;  %5024 = vmatprep.mubr.msk.bf16.mxu0 %vm5571_vm0, %v5570_v0 }
0x1d75   :  { %5022 = vmatprep.subr.bf16.mxu0 %v5570_v0  ;;  %4999 = vmatpush3.bf16.msra.mxu1 %v5228_v46 }
0x1d76   :  { %5012 = vmatprep.subr.bf16.mxu1 %v5570_v0 }
0x1d78   :  { %5023 = vmatpush3.bf16.msra.mxu0 %v5226_v58 }
0x1d79   :  { %5036 = vmatprep.subr.bf16.mxu0 %v5570_v0 }
0x1d7b   :  { %5025 = vmatmul.mubr.msk.bf16.vlgmr.msra.gmra.mxu0 %vm120_vm1, %v5948_v8 }
0x1d7c   :  { %5040 = vmatprep.mubr.msk.bf16.mxu0 %vm5571_vm0, %v5570_v0 }
0x1e2b   :  { %v2325_v60 = vpop.f32.mrf.mxu0 }
0x1e2c   :  { %v2326_v61 = vadd.f32 %v2325_v60, %v5958_v9 }
0x1e2d   :  { %v4994_v62 = vpop.f32.mrf.mxu0 }
0x1e2e   :  { %5347 = vtanh.f32 %v2326_v61 }
0x1e2f   :  { %v2328_v63 = vpop.f32.mrf.mxu0 }
0x1e30   :  { %v5231_v63 = vld [vmem:[#allocation10 + $0x8] sm:$0xff]  }
0x1e31   :  { %v4995_v1 = vpop.f32.mrf.mxu0 }
0x1e32   :  { %v5232_v1 = vld [vmem:[#allocation10 + $0x28] sm:$0xff]  }
0x1e33   :  { %v2447_v3 = vpop.f32.mrf.mxu0  ;;  %5037 = vmatpush3.bf16.msra.mxu0 %v5232_v1 }
0x1e34   :  { %5038 = vmatprep.subr.bf16.mxu0 %v5570_v0 }
0x1e35   :  { %v5010_v8 = vpop.f32.mrf.mxu0 }
0x1e36   :  { %v5234_v8 = vld [vmem:[#allocation10 + $0x20] sm:$0xff]  }
0x1e37   :  { %v2450_v10 = vpop.f32.mrf.mxu0  ;;  %5039 = vmatpush3.bf16.msra.mxu0 %v5234_v8 }
0x1e38   :  { %5052 = vmatprep.subr.bf16.mxu0 %v5570_v0 }
0x1e39   :  { %v5011_v4 = vpop.f32.mrf.mxu0 }
0x1e3b   :  { %v5348_v47 = vpop.eup %5347  ;;  %v2599_v22 = vpop.f32.mrf.mxu0 }
0x1e3c   :  { %v2336_v48 = vpack.c.bf16 %v5348_v47, %v5348_v47  ;;  %2333 = vst.msk [vmem:[#allocation11 + $0x8] sm:$0xf] %vm862_vm6, %v5348_v47 }
0x1e3d   :  { %v5026_v12 = vpop.f32.mrf.mxu0 }
0x1e3e   :  { %5001 = vmatmul.mubr.msk.bf16.vlgmr.msra.gmra.mxu1 %vm120_vm1, %v2336_v48 }
0x1e3f   :  { %v2602_v13 = vpop.f32.mrf.mxu0  ;;  %5016 = vmatprep.mubr.msk.bf16.mxu1 %vm5571_vm0, %v5570_v0  ;;  %5013 = vmatpush3.bf16.msra.mxu1 %v5229_v38 }
0x1e40   :  { %5014 = vmatprep.subr.bf16.mxu1 %v5570_v0 }
0x1e41   :  { %v5027_v9 = vpop.f32.mrf.mxu0 }
0x1e43   :  { %5015 = vmatpush3.bf16.msra.mxu1 %v5230_v39 }
0x1e44   :  { %5028 = vmatprep.subr.bf16.mxu1 %v5570_v0 }
0x1efe   :  { %v2390_v11 = vpop.f32.mrf.mxu1 }
0x1eff   :  { %v2396_v24 = vadd.f32 %v2390_v11, %v2335_v14 }
0x1f00   :  { %v5002_v2 = vpop.f32.mrf.mxu1 }
0x1f01   :  { %v2453_v15 = vadd.f32 %v2447_v3, %v2396_v24  ;;  %v5233_v3 = vld [vmem:[#allocation10] sm:$0xff]  }
0x1f02   :  { %v2393_v18 = vpop.f32.mrf.mxu1 }
0x1f03   :  { %5349 = vtanh.f32 %v2453_v15  ;;  %v4636_v16 = vmul.f32 -1.442695, %v2453_v15 }
0x1f04   :  { %v5003_v20 = vpop.f32.mrf.mxu1 }
0x1f05   :  { %5351 = vpow2.f32 %v4636_v16 }
0x1f10   :  { %v5350_v23 = vpop.eup %5349 }
0x1f11   :  { %2463 = vrot.lane.b32.xlu0 %v5350_v23, %s5572_s2 }
0x1f12   :  { %v5352_v35 = vpop.eup %5351 }
0x1f13   :  { %v2457_v26 = vadd.f32 1.0, %v5352_v35 }
0x1f15   :  { %5353 = vrcp.f32 %v2457_v26 }
0x1f22   :  { %v5354_v27 = vpop.eup %5353 }
0x1f23   :  { %v2461_v32 = vmul.f32 %v5354_v27, %v5917_v33 }
0x1f83   :  { %v2464_v29 = vpop.permute.xlu0 %2463 }
0x1f84   :  { %v2466_v30 = vmul.f32 %v5354_v27, %v2464_v29 }
0x1f86   :  { %2468 = vrot.lane.b32.xlu0 %v2466_v30, %s5572_s2 }
0x1ff8   :  { %v2469_v34 = vpop.permute.xlu0 %2468 }
0x1ff9   :  { %v6045_v37 = vadd.f32 %v2469_v34, %v2461_v32 }
0x1ffb   :  { %5355 = vtanh.f32 %v6045_v37 }
0x2008   :  { %v5356_v40 = vpop.eup %5355 }
0x2009   :  { %2474 = vrot.lane.b32.xlu0 %v5356_v40, %s5572_s2 }
0x207b   :  { %v2475_v41 = vpop.permute.xlu0 %2474 }
0x207c   :  { %v2477_v42 = vmul.f32 %v5354_v27, %v2475_v41 }
0x207e   :  { %v2479_v43 = vpack.c.bf16 %v2477_v42, %v2477_v42 }
0x2080   :  { %2485 = vrot.lane.b32.xlu0 %v2479_v43, %s5566_s9 }
0x20f2   :  { %v6052_v33 = vpop.permute.xlu0 %2485 }
0x20f3   :  { %5017 = vmatmul.mubr.msk.bf16.vlgmr.msra.gmra.mxu1 %vm120_vm1, %v6052_v33 }
0x20f4   :  { %5032 = vmatprep.mubr.msk.bf16.mxu1 %vm5571_vm0, %v5570_v0  ;;  %5029 = vmatpush3.bf16.msra.mxu1 %v5231_v63 }
0x20f5   :  { %5030 = vmatprep.subr.bf16.mxu1 %v5570_v0 }
0x20f8   :  { %5031 = vmatpush3.bf16.msra.mxu1 %v5233_v3 }
0x20f9   :  { %5044 = vmatprep.subr.bf16.mxu1 %v5570_v0 }
0x21b3   :  { %v2536_v44 = vpop.f32.mrf.mxu1 }
0x21b4   :  { %v2548_v49 = vadd.f32 %v5933_v45, %v2536_v44 }
0x21b5   :  { %v5018_v50 = vpop.f32.mrf.mxu1 }
0x21b6   :  { %v2605_v51 = vadd.f32 %v2599_v22, %v2548_v49 }
0x21b7   :  { %v2539_v52 = vpop.f32.mrf.mxu1 }
0x21b8   :  { %5357 = vtanh.f32 %v2605_v51  ;;  %v4644_v56 = vmul.f32 -1.442695, %v2605_v51 }
0x21b9   :  { %v5019_v53 = vpop.f32.mrf.mxu1 }
0x21ba   :  { %5359 = vpow2.f32 %v4644_v56 }
0x21c5   :  { %v5358_v55 = vpop.eup %5357 }
0x21c6   :  { %2615 = vrot.lane.b32.xlu0 %v5358_v55, %s5572_s2 }
0x21c7   :  { %v5360_v57 = vpop.eup %5359 }
0x21c8   :  { %v2609_v58 = vadd.f32 1.0, %v5360_v57 }
0x21ca   :  { %5361 = vrcp.f32 %v2609_v58 }
0x21d7   :  { %v5362_v59 = vpop.eup %5361 }
0x21d8   :  { %v2613_v45 = vmul.f32 %v5362_v59, %v5939_v31 }
0x2238   :  { %v2616_v46 = vpop.permute.xlu0 %2615 }
0x2239   :  { %v2618_v60 = vmul.f32 %v5362_v59, %v2616_v46 }
0x223b   :  { %2620 = vrot.lane.b32.xlu1 %v2618_v60, %s5572_s2 }
0x22ad   :  { %v2621_v61 = vpop.permute.xlu1 %2620 }
0x22ae   :  { %v6062_v62 = vadd.f32 %v2621_v61, %v2613_v45 }
0x22b0   :  { %5363 = vtanh.f32 %v6062_v62 }
0x22bd   :  { %v5364_v31 = vpop.eup %5363 }
0x22be   :  { %2626 = vrot.lane.b32.xlu0 %v5364_v31, %s5572_s2 }
0x2330   :  { %v2627_v10 = vpop.permute.xlu0 %2626 }
0x2331   :  { %v2629_v4 = vmul.f32 %v5362_v59, %v2627_v10 }
0x2333   :  { %v2634_v47 = vpack.c.bf16 %v2629_v4, %v2629_v4 }
0x2335   :  { %2640 = vrot.lane.b32.xlu0 %v2634_v47, %s5566_s9 }
0x23a7   :  { %v6071_v22 = vpop.permute.xlu0 %2640 }
0x23a8   :  { %5033 = vmatmul.mubr.msk.bf16.vlgmr.msra.gmra.mxu1 %vm120_vm1, %v6071_v22  ;;  %5041 = vmatmul.mubr.msk.bf16.vlgmr.msra.gmra.mxu0 %vm120_vm1, %v6071_v22 }
0x23a9   :  { %5048 = vmatprep.mubr.msk.bf16.mxu1 %vm5571_vm0, %v5570_v0  ;;  %5056 = vmatprep.mubr.msk.bf16.mxu0 %vm5571_vm0, %v5570_v0 }
0x2468   :  { %v2691_v48 = vpop.f32.mrf.mxu1  ;;  %v6081_v12 = vpop.f32.mrf.mxu0 }
0x2469   :  { %v2704_v13 = vrot.slane %v2691_v48, %v5703_v17 }
0x246a   :  { %v5034_v9 = vpop.f32.mrf.mxu1  ;;  %v5042_v14 = vpop.f32.mrf.mxu0 }
0x246b   :  { %v2705_v11 = vcombine.high %v2704_v13, %v2704_v13  ;;  %v2712_v24 = vrot.slane %v2704_v13, %v5703_v17 }
0x246c   :  { %v2694_v2 = vpop.f32.mrf.mxu1  ;;  %v2996_v15 = vpop.f32.mrf.mxu0 }
0x246d   :  { %v2719_v18 = vrot.slane %v2705_v11, %v5703_v17  ;;  %v2720_v20 = vcombine.high %v2712_v24, %v2712_v24  ;;  %v2725_v23 = vrot.slane %v2712_v24, %v5708_v21 }
0x246e   :  { %v5035_v16 = vpop.f32.mrf.mxu1  ;;  %v5043_v35 = vpop.f32.mrf.mxu0 }
0x246f   :  { %v2742_v26 = vmul.f32 %v2725_v23, %v5962_v28  ;;  %v2729_v27 = vrot.slane %v2719_v18, %v5708_v21  ;;  %v2733_v29 = vrot.slane %v2720_v20, %v5708_v21  ;;  %v2721_v30 = vcombine.high %v2719_v18, %v2719_v18 }
0x2471   :  { %v2746_v32 = vsel %vm120_vm1, %v2742_v26, 0.0  ;;  %v2743_v34 = vmul.f32 %v2729_v27, %v5966_v19  ;;  %v2744_v38 = vmul.f32 %v2733_v29, %v5968_v25  ;;  %v2737_v39 = vrot.slane %v2721_v30, %v5708_v21 }
0x2472   :  { %2747 = vadd.xlane.f32.xlu0 %v2746_v32 }
0x2473   :  { %v2749_v40 = vsel %vm120_vm1, %v2743_v34, 0.0  ;;  %v2752_v41 = vsel %vm120_vm1, %v2744_v38, 0.0  ;;  %v2745_v42 = vmul.f32 %v2737_v39, %v5973_v36 }
0x2474   :  { %2750 = vadd.xlane.f32.xlu1 %v2749_v40 }
0x2475   :  { %v2755_v43 = vsel %vm120_vm1, %v2745_v42, 0.0 }
0x2476   :  { %2753 = vadd.xlane.f32.xlu0 %v2752_v41 }
0x247a   :  { %2756 = vadd.xlane.f32.xlu0 %v2755_v43 }
0x24fb   :  { %v2748_v44 = vpop.xlane.xlu0 %2747 }
0x24fc   :  { %v2765_v52 = vrot.slane %v2748_v44, %v5732_v54 }
0x24fd   :  { %v2751_v49 = vpop.xlane.xlu1 %2750 }
0x24fe   :  { %v2769_v50 = vrot.slane %v2751_v49, %v5732_v54 }
0x24ff   :  { %v2754_v51 = vpop.xlane.xlu0 %2753 }
0x2500   :  { %v2773_v53 = vrot.slane %v2754_v51, %v5732_v54  ;;  %v2778_v55 = vsel %vm567_vm2, %v2769_v50, %v2765_v52  ;;  %v5236_v52 = vld [vmem:[#allocation10 + $0x10] sm:$0xff]  }
0x2502   :  { %v2779_v58 = vsel %vm569_vm3, %v2773_v53, %v2778_v55 }
0x2503   :  { %v2757_v56 = vpop.xlane.xlu0 %2756 }
0x2504   :  { %v2777_v57 = vrot.slane %v2757_v56, %v5732_v54 }
0x2506   :  { %v2780_v59 = vsel %vm571_vm4, %v2777_v57, %v2779_v58 }
0x2507   :  { %v2782_v46 = vsel %vm574_vm5, %v2780_v59, -inf }
0x2508   :  { %2783 = vmax.xlane.f32.xlu0 %v2782_v46 }
0x2591   :  { %v2784_v60 = vpop.xlane.xlu0 %2783 }
0x2592   :  { %v2789_v45 = vrot.slane %v2784_v60, %v5708_v21  ;;  %v2793_v61 = vrot.slane %v2784_v60, %v5742_v5  ;;  %v2797_v63 = vrot.slane %v2784_v60, %v5744_v6  ;;  %v2801_v8 = vrot.slane %v2784_v60, %v5746_v7 }
0x2594   :  { %v2806_v1 = vsub.f32 %v2748_v44, %v2789_v45  ;;  %v2807_v3 = vsub.f32 %v2751_v49, %v2793_v61  ;;  %v2808_v31 = vsub.f32 %v2754_v51, %v2797_v63  ;;  %v2809_v47 = vsub.f32 %v2757_v56, %v2801_v8  ;;  %v5235_v51 = vld [vmem:[#allocation10 + $0x18] sm:$0xff]  }
0x2595   :  { %5045 = vmatpush3.bf16.msra.mxu1 %v5235_v51  ;;  %v5239_v51 = vld [vmem:[#allocation8 + $0x38] sm:$0xff]  }
0x2596   :  { %v2810_v10 = vmul.f32 1.442695, %v2806_v1  ;;  %v2812_v4 = vmul.f32 1.442695, %v2807_v3  ;;  %v2814_v48 = vmul.f32 1.442695, %v2808_v31  ;;  %5046 = vmatprep.subr.bf16.mxu1 %v5570_v0 }
0x2597   :  { %v2816_v13 = vmul.f32 1.442695, %v2809_v47 }
0x2598   :  { %5365 = vpow2.f32 %v2810_v10 }
0x2599   :  { %5367 = vpow2.f32 %v2812_v4  ;;  %5047 = vmatpush3.bf16.msra.mxu1 %v5236_v52  ;;  %v5240_v52 = vld [vmem:[#allocation8 + $0x30] sm:$0xff]  }
0x259a   :  { %5369 = vpow2.f32 %v2814_v48  ;;  %5060 = vmatprep.subr.bf16.mxu1 %v5570_v0 }
0x259b   :  { %5371 = vpow2.f32 %v2816_v13 }
0x25a5   :  { %v5366_v9 = vpop.eup %5365 }
0x25a6   :  { %v5368_v14 = vpop.eup %5367  ;;  %2823 = vperm.xlu0 %5179, %v5366_v9  }
0x25a7   :  { %2826 = vperm.xlu1 %5180, %v5368_v14   ;;  %v5370_v11 = vpop.eup %5369 }
0x25a8   :  { %v5372_v24 = vpop.eup %5371 }
0x25ab   :  { %2829 = vperm.xlu1 %5180, %v5370_v11  }
0x25af   :  { %2832 = vperm.xlu1 %5180, %v5372_v24  }
0x2621   :  { %v2824_v15 = vpop.permute.xlu0 %2823 }
0x2622   :  { %v2827_v2 = vpop.permute.xlu1 %2826  ;;  %v2837_v23 = vrot.slane %v2824_v15, %v5732_v54 }
0x2623   :  { %v2841_v20 = vrot.slane %v2827_v2, %v5732_v54 }
0x2625   :  { %v2850_v26 = vsel %vm567_vm2, %v2841_v20, %v2837_v23 }
0x2626   :  { %v2830_v18 = vpop.permute.xlu1 %2829 }
0x2627   :  { %v2845_v16 = vrot.slane %v2830_v18, %v5732_v54 }
0x2629   :  { %v2851_v29 = vsel %vm569_vm3, %v2845_v16, %v2850_v26 }
0x262a   :  { %v2833_v35 = vpop.permute.xlu1 %2832 }
0x262b   :  { %v2849_v27 = vrot.slane %v2833_v35, %v5732_v54 }
0x262d   :  { %v2852_v30 = vsel %vm571_vm4, %v2849_v27, %v2851_v29 }
0x262e   :  { %v2854_v32 = vsel %vm574_vm5, %v2852_v30, 0.0 }
0x262f   :  { %2855 = vadd.xlane.f32.xlu0 %v2854_v32 }
0x26b8   :  { %v2856_v34 = vpop.xlane.xlu0 %2855 }
0x26b9   :  { %5373 = vrcp.f32 %v2856_v34 }
0x26c6   :  { %v5374_v38 = vpop.eup %5373 }
0x26c7   :  { %v2862_v39 = vrot.slane %v5374_v38, %v5708_v21  ;;  %v2866_v41 = vrot.slane %v5374_v38, %v5742_v5  ;;  %v2870_v43 = vrot.slane %v5374_v38, %v5744_v6  ;;  %v2874_v49 = vrot.slane %v5374_v38, %v5746_v7 }
0x26c9   :  { %v2879_v40 = vmul.f32 %v5366_v9, %v2862_v39  ;;  %v2880_v42 = vmul.f32 %v5368_v14, %v2866_v41  ;;  %v2881_v44 = vmul.f32 %v5370_v11, %v2870_v43  ;;  %v2882_v50 = vmul.f32 %v5372_v24, %v2874_v49 }
0x26cb   :  { %2885 = vperm.xlu1 %5180, %v2879_v40  }
0x26cf   :  { %2890 = vperm.xlu1 %5180, %v2880_v42  }
0x26d3   :  { %2895 = vperm.xlu1 %5180, %v2881_v44   ;;  %v5237_v44 = vld [vmem:[#allocation8 + $0x18] sm:$0xff]  }
0x26d7   :  { %2900 = vperm.xlu1 %5180, %v2882_v50   ;;  %v5238_v50 = vld [vmem:[#allocation8 + $0x10] sm:$0xff]  }
0x2746   :  { %v2886_v53 = vpop.permute.xlu1 %2885 }
0x2747   :  { %v2903_v55 = vmul.f32 %v2886_v53, %v5962_v28  ;;  %v5241_v53 = vld [vmem:[#allocation8 + $0x8] sm:$0xff]  }
0x2748   :  { %5053 = vmatpush3.bf16.msra.mxu0 %v5241_v53 }
0x2749   :  { %v2907_v56 = vsel %vm120_vm1, %v2903_v55, 0.0  ;;  %5054 = vmatprep.subr.bf16.mxu0 %v5570_v0 }
0x274a   :  { %v2908_v57 = vrot.slane %v2907_v56, 4  ;;  %v2891_v58 = vpop.permute.xlu1 %2890 }
0x274b   :  { %v2904_v59 = vmul.f32 %v2891_v58, %v5966_v19 }
0x274c   :  { %v2909_v46 = vadd.f32 %v2908_v57, %v2907_v56 }
0x274d   :  { %v2914_v60 = vsel %vm120_vm1, %v2904_v59, 0.0 }
0x274e   :  { %v2910_v45 = vrot.slane %v2909_v46, 2  ;;  %v2915_v61 = vrot.slane %v2914_v60, 4  ;;  %v2896_v63 = vpop.permute.xlu1 %2895 }
0x274f   :  { %v2905_v1 = vmul.f32 %v2896_v63, %v5968_v25 }
0x2750   :  { %v2916_v3 = vadd.f32 %v2915_v61, %v2914_v60  ;;  %v2911_v31 = vadd.f32 %v2910_v45, %v2909_v46 }
0x2751   :  { %v2921_v8 = vsel %vm120_vm1, %v2905_v1, 0.0 }
0x2752   :  { %v2917_v10 = vrot.slane %v2916_v3, 2  ;;  %v2922_v28 = vrot.slane %v2921_v8, 4  ;;  %v2901_v4 = vpop.permute.xlu1 %2900  ;;  %v2912_v9 = vrot.slane %v2911_v31, 1 }
0x2753   :  { %v2906_v47 = vmul.f32 %v2901_v4, %v5973_v36 }
0x2754   :  { %v2918_v48 = vadd.f32 %v2917_v10, %v2916_v3  ;;  %v2923_v13 = vadd.f32 %v2922_v28, %v2921_v8  ;;  %v2913_v18 = vadd.f32 %v2912_v9, %v2911_v31  ;;  %v3070_v31 = vld [vmem:[#allocation2 + $0x10] sm:$0xf] }
0x2755   :  { %v2928_v19 = vsel %vm120_vm1, %v2906_v47, 0.0 }
0x2756   :  { %v2919_v14 = vrot.slane %v2918_v48, 1  ;;  %v2924_v11 = vrot.slane %v2923_v13, 2  ;;  %v2929_v24 = vrot.slane %v2928_v19, 4  ;;  %v2935_v27 = vpack.c.bf16 %v2913_v18, %v2913_v18 }
0x2758   :  { %v2920_v2 = vadd.f32 %v2919_v14, %v2918_v48  ;;  %v2925_v15 = vadd.f32 %v2924_v11, %v2923_v13  ;;  %v2930_v25 = vadd.f32 %v2929_v24, %v2928_v19  ;;  %v3003_v38 = vunpack.c.l.b16 %v2935_v27 }
0x275a   :  { %v2926_v20 = vrot.slane %v2925_v15, 1  ;;  %v2931_v23 = vrot.slane %v2930_v25, 2  ;;  %v2936_v16 = vpack.c.bf16 %v2920_v2, %v2920_v2 }
0x275c   :  { %v2927_v35 = vadd.f32 %v2926_v20, %v2925_v15  ;;  %v2932_v26 = vadd.f32 %v2931_v23, %v2930_v25  ;;  %v3004_v30 = vunpack.c.l.b16 %v2936_v16  ;;  %v5243_v23 = vld [vmem:[#allocation8 + $0x28] sm:$0xff]   ;;  %v5244_v16 = vld [vmem:[#allocation8 + $0x20] sm:$0xff]  }
0x275e   :  { %v2937_v29 = vpack.c.bf16 %v2927_v35, %v2927_v35  ;;  %v2933_v36 = vrot.slane %v2932_v26, 1  ;;  %v3007_v40 = vsel %vm567_vm2, %v3004_v30, %v3003_v38 }
0x2760   :  { %v2934_v32 = vadd.f32 %v2933_v36, %v2932_v26  ;;  %v3005_v34 = vunpack.c.l.b16 %v2937_v29  ;;  %v6176_v36 = vld [vmem:[%s6375_s5] ss:$0 sm:$0xff]  ;;  %s5575_s5 = smov [#allocation11]  }
0x2761   :  { %s4544_s28 = sshll.u32 %s5575_s5, 4  ;;  %s4545_s28 = int_to_ptr.vmem [resolvable:$true] %s4544_s28 }
0x2762   :  { %v2938_v39 = vpack.c.bf16 %v2934_v32, %v2934_v32  ;;  %v3008_v42 = vsel %vm569_vm3, %v3005_v34, %v3007_v40  ;;  %s5533_s29 = scalar_lea.vmem %s4545_s28, 384  ;;  %p5538_p12 = scmp.lt.s32.totalorder %s4545_s28, %s4545_s28 }
0x2763   :  { %p5534_p11 = scmp.ne.s32.totalorder %s4545_s28, %s5533_s29  ;;  %p5539_p13 = scmp.lt.s32.totalorder %s5533_s29, %s5533_s29 }
0x2764   :  { %v3006_v41 = vunpack.c.l.b16 %v2938_v39 }
0x2765   :  { %p5540_p0 = por %p5539_p13, %p5538_p12 }
0x2766   :  { %v3009_v43 = vsel %vm571_vm4, %v3006_v41, %v3008_v42 }
0x2767   :  { %v3010_v49 = vpack.c.b16 %v3009_v43, %v3009_v43  ;;  %p5541_p1 = pnand %p5540_p0, %p5534_p11 }
0x2769   :  { %5049 = vmatmul.mubr.msk.bf16.vlgmr.msra.gmra.mxu1 %vm120_vm1, %v3010_v49 }
0x276a   :  { %5061 = vmatpush3.bf16.msra.mxu1 %v5237_v44  ;;  %5064 = vmatprep.mubr.msk.bf16.mxu1 %vm5571_vm0, %v5570_v0 }
0x276b   :  { %5062 = vmatprep.subr.bf16.mxu1 %v5570_v0 }
0x276e   :  { %5063 = vmatpush3.bf16.msra.mxu1 %v5238_v50 }
0x276f   :  { %5076 = vmatprep.subr.bf16.mxu1 %v5570_v0 }
0x2771   :  { %5065 = vmatmul.mubr.msk.bf16.vlgmr.msra.gmra.mxu1 %vm120_vm1, %v6052_v33  ;;  %v5242_v33 = vld [vmem:[#allocation8] sm:$0xff]  }
0x2772   :  { %5077 = vmatpush3.bf16.msra.mxu1 %v5239_v51  ;;  %5080 = vmatprep.mubr.msk.bf16.mxu1 %vm5571_vm0, %v5570_v0 }
0x2773   :  { %5078 = vmatprep.subr.bf16.mxu1 %v5570_v0  ;;  %5055 = vmatpush3.bf16.msra.mxu0 %v5242_v33 }
0x2774   :  { %5068 = vmatprep.subr.bf16.mxu0 %v5570_v0 }
0x2776   :  { %5079 = vmatpush3.bf16.msra.mxu1 %v5240_v52 }
0x2777   :  { %5092 = vmatprep.subr.bf16.mxu1 %v5570_v0 }
0x2779   :  { %5081 = vmatmul.mubr.msk.bf16.vlgmr.msra.gmra.mxu1 %vm120_vm1, %v6071_v22 }
0x277a   :  { %5096 = vmatprep.mubr.msk.bf16.mxu1 %vm5571_vm0, %v5570_v0 }
0x2829   :  { %v3060_v55 = vpop.f32.mrf.mxu1 }
0x282a   :  { %v3061_v56 = vadd.f32 %v3060_v55, %v6081_v12  ;;  %v5245_v55 = vld [vmem:[#allocation10 + $0x8] sm:$0xff]  }
0x282b   :  { %v5050_v57 = vpop.f32.mrf.mxu1 }
0x282c   :  { %5375 = vtanh.f32 %v3061_v56  ;;  %v5246_v56 = vld [vmem:[#allocation10 + $0x28] sm:$0xff]   ;;  %v5247_v57 = vld [vmem:[#allocation10] sm:$0xff]  }
0x282d   :  { %v3063_v58 = vpop.f32.mrf.mxu1  ;;  %5093 = vmatpush3.bf16.msra.mxu1 %v5246_v56 }
0x282e   :  { %v5248_v58 = vld [vmem:[#allocation10 + $0x20] sm:$0xff]   ;;  %5094 = vmatprep.subr.bf16.mxu1 %v5570_v0 }
0x282f   :  { %v5051_v59 = vpop.f32.mrf.mxu1 }
0x2831   :  { %v3182_v46 = vpop.f32.mrf.mxu1  ;;  %5095 = vmatpush3.bf16.msra.mxu1 %v5248_v58 }
0x2832   :  { %5108 = vmatprep.subr.bf16.mxu1 %v5570_v0 }
0x2833   :  { %v5066_v22 = vpop.f32.mrf.mxu1 }
0x2835   :  { %v3185_v60 = vpop.f32.mrf.mxu1 }
0x2837   :  { %v5067_v45 = vpop.f32.mrf.mxu1 }
0x2839   :  { %v5376_v61 = vpop.eup %5375  ;;  %v3334_v63 = vpop.f32.mrf.mxu1 }
0x283a   :  { %v3071_v1 = vpack.c.bf16 %v5376_v61, %v5376_v61  ;;  %3068 = vst.msk [vmem:[#allocation11 + $0xc] sm:$0xf] %vm862_vm6, %v5376_v61 }
0x283b   :  { %v5082_v3 = vpop.f32.mrf.mxu1 }
0x283c   :  { %5057 = vmatmul.mubr.msk.bf16.vlgmr.msra.gmra.mxu0 %vm120_vm1, %v3071_v1 }
0x283d   :  { %v3337_v8 = vpop.f32.mrf.mxu1  ;;  %5072 = vmatprep.mubr.msk.bf16.mxu0 %vm5571_vm0, %v5570_v0  ;;  %5069 = vmatpush3.bf16.msra.mxu0 %v5243_v23 }
0x283e   :  { %5070 = vmatprep.subr.bf16.mxu0 %v5570_v0 }
0x283f   :  { %v5083_v12 = vpop.f32.mrf.mxu1 }
0x2841   :  { %5071 = vmatpush3.bf16.msra.mxu0 %v5244_v16 }
0x2842   :  { %5084 = vmatprep.subr.bf16.mxu0 %v5570_v0 }
0x28fc   :  { %v3125_v10 = vpop.f32.mrf.mxu0 }
0x28fd   :  { %v3131_v28 = vadd.f32 %v3125_v10, %v3070_v31 }
0x28fe   :  { %v5058_v4 = vpop.f32.mrf.mxu0 }
0x28ff   :  { %v3188_v47 = vadd.f32 %v3182_v46, %v3131_v28  ;;  %v6205_v28 = vld [vmem:[#allocation5] sm:$0xff] }
0x2900   :  { %v3128_v48 = vpop.f32.mrf.mxu0 }
0x2901   :  { %5377 = vtanh.f32 %v3188_v47  ;;  %v4660_v9 = vmul.f32 -1.442695, %v3188_v47 }
0x2902   :  { %v5059_v13 = vpop.f32.mrf.mxu0 }
0x2903   :  { %5379 = vpow2.f32 %v4660_v9  ;;  %v6209_v9 = vld [vmem:[#allocation5 + $0x8] sm:$0xff] }
0x290e   :  { %v5378_v19 = vpop.eup %5377 }
0x290f   :  { %3198 = vrot.lane.b32.xlu1 %v5378_v19, %s5572_s2 }
0x2910   :  { %v5380_v14 = vpop.eup %5379 }
0x2911   :  { %v3192_v11 = vadd.f32 1.0, %v5380_v14  ;;  %v6211_v14 = vld [vmem:[#allocation5 + $0x10] sm:$0xff] }
0x2913   :  { %5381 = vrcp.f32 %v3192_v11 }
0x2920   :  { %v5382_v24 = vpop.eup %5381 }
0x2921   :  { %v3196_v25 = vmul.f32 %v5382_v24, %v6045_v37 }
0x2981   :  { %v3199_v2 = vpop.permute.xlu1 %3198 }
0x2982   :  { %v3201_v15 = vmul.f32 %v5382_v24, %v3199_v2 }
0x2984   :  { %3203 = vrot.lane.b32.xlu1 %v3201_v15, %s5572_s2 }
0x29f6   :  { %v3204_v18 = vpop.permute.xlu1 %3203 }
0x29f7   :  { %v6160_v20 = vadd.f32 %v3204_v18, %v3196_v25  ;;  %v6216_v25 = vld [vmem:[#allocation5 + $0x18] sm:$0xff] }
0x29f9   :  { %5383 = vtanh.f32 %v6160_v20 }
0x2a06   :  { %v5384_v35 = vpop.eup %5383 }
0x2a07   :  { %3209 = vrot.lane.b32.xlu1 %v5384_v35, %s5572_s2 }
0x2a79   :  { %v3210_v26 = vpop.permute.xlu1 %3209 }
0x2a7a   :  { %v3212_v27 = vmul.f32 %v5382_v24, %v3210_v26 }
0x2a7c   :  { %v3214_v29 = vpack.c.bf16 %v3212_v27, %v3212_v27 }
0x2a7e   :  { %3220 = vrot.lane.b32.xlu0 %v3214_v29, %s5566_s9 }
0x2af0   :  { %v6167_v37 = vpop.permute.xlu0 %3220 }
0x2af1   :  { %5073 = vmatmul.mubr.msk.bf16.vlgmr.msra.gmra.mxu0 %vm120_vm1, %v6167_v37 }
0x2af2   :  { %5088 = vmatprep.mubr.msk.bf16.mxu0 %vm5571_vm0, %v5570_v0  ;;  %5085 = vmatpush3.bf16.msra.mxu0 %v5245_v55 }
0x2af3   :  { %5086 = vmatprep.subr.bf16.mxu0 %v5570_v0 }
0x2af6   :  { %5087 = vmatpush3.bf16.msra.mxu0 %v5247_v57 }
0x2af7   :  { %5100 = vmatprep.subr.bf16.mxu0 %v5570_v0 }
0x2bb1   :  { %v3271_v30 = vpop.f32.mrf.mxu0 }
0x2bb2   :  { %v3283_v32 = vadd.f32 %v6176_v36, %v3271_v30 }
0x2bb3   :  { %v5074_v34 = vpop.f32.mrf.mxu0 }
0x2bb4   :  { %v3340_v38 = vadd.f32 %v3334_v63, %v3283_v32 }
0x2bb5   :  { %v3274_v39 = vpop.f32.mrf.mxu0 }
0x2bb6   :  { %5385 = vtanh.f32 %v3340_v38  ;;  %v4668_v42 = vmul.f32 -1.442695, %v3340_v38 }
0x2bb7   :  { %v5075_v40 = vpop.f32.mrf.mxu0 }
0x2bb8   :  { %5387 = vpow2.f32 %v4668_v42 }
0x2bc3   :  { %v5386_v41 = vpop.eup %5385 }
0x2bc4   :  { %3350 = vrot.lane.b32.xlu1 %v5386_v41, %s5572_s2 }
0x2bc5   :  { %v5388_v43 = vpop.eup %5387 }
0x2bc6   :  { %v3344_v44 = vadd.f32 1.0, %v5388_v43 }
0x2bc8   :  { %5389 = vrcp.f32 %v3344_v44 }
0x2bd5   :  { %v5390_v49 = vpop.eup %5389 }
0x2bd6   :  { %v3348_v52 = vmul.f32 %v5390_v49, %v6062_v62 }
0x2c36   :  { %v3351_v50 = vpop.permute.xlu1 %3350 }
0x2c37   :  { %v3353_v51 = vmul.f32 %v5390_v49, %v3351_v50 }
0x2c39   :  { %3355 = vrot.lane.b32.xlu1 %v3353_v51, %s5572_s2 }
0x2cab   :  { %v3356_v53 = vpop.permute.xlu1 %3355 }
0x2cac   :  { %v6182_v33 = vadd.f32 %v3356_v53, %v3348_v52 }
0x2cae   :  { %5391 = vtanh.f32 %v6182_v33 }
0x2cbb   :  { %v5392_v62 = vpop.eup %5391 }
0x2cbc   :  { %3361 = vrot.lane.b32.xlu1 %v5392_v62, %s5572_s2 }
0x2d2e   :  { %v3362_v59 = vpop.permute.xlu1 %3361 }
0x2d2f   :  { %v3364_v46 = vmul.f32 %v5390_v49, %v3362_v59 }
0x2d31   :  { %v3369_v22 = vpack.c.bf16 %v3364_v46, %v3364_v46 }
0x2d33   :  { %3375 = vrot.lane.b32.xlu1 %v3369_v22, %s5566_s9 }
0x2da5   :  { %v6191_v60 = vpop.permute.xlu1 %3375 }
0x2da6   :  { %5089 = vmatmul.mubr.msk.bf16.vlgmr.msra.gmra.mxu0 %vm120_vm1, %v6191_v60  ;;  %5097 = vmatmul.mubr.msk.bf16.vlgmr.msra.gmra.mxu1 %vm120_vm1, %v6191_v60 }
0x2da7   :  { %5104 = vmatprep.mubr.msk.bf16.mxu0 %vm5571_vm0, %v5570_v0  ;;  %5112 = vmatprep.mubr.msk.bf16.mxu1 %vm5571_vm0, %v5570_v0 }
0x2e66   :  { %v3426_v45 = vpop.f32.mrf.mxu0  ;;  %v6201_v61 = vpop.f32.mrf.mxu1 }
0x2e67   :  { %v3439_v63 = vrot.slane %v3426_v45, %v5703_v17 }
0x2e68   :  { %v5090_v1 = vpop.f32.mrf.mxu0  ;;  %v5098_v3 = vpop.f32.mrf.mxu1 }
0x2e69   :  { %v3440_v8 = vcombine.high %v3439_v63, %v3439_v63  ;;  %v3447_v12 = vrot.slane %v3439_v63, %v5703_v17 }
0x2e6a   :  { %v3429_v31 = vpop.f32.mrf.mxu0  ;;  %v3731_v10 = vpop.f32.mrf.mxu1 }
0x2e6b   :  { %v3454_v4 = vrot.slane %v3440_v8, %v5703_v17  ;;  %v3455_v47 = vcombine.high %v3447_v12, %v3447_v12  ;;  %v3460_v48 = vrot.slane %v3447_v12, %v5708_v21 }
0x2e6c   :  { %v5091_v13 = vpop.f32.mrf.mxu0  ;;  %v5099_v19 = vpop.f32.mrf.mxu1 }
0x2e6d   :  { %v3477_v11 = vmul.f32 %v3460_v48, %v6205_v28  ;;  %v3464_v24 = vrot.slane %v3454_v4, %v5708_v21  ;;  %v3468_v2 = vrot.slane %v3455_v47, %v5708_v21  ;;  %v3456_v15 = vcombine.high %v3454_v4, %v3454_v4 }
0x2e6f   :  { %v3481_v18 = vsel %vm120_vm1, %v3477_v11, 0.0  ;;  %v3478_v23 = vmul.f32 %v3464_v24, %v6209_v9  ;;  %v3479_v16 = vmul.f32 %v3468_v2, %v6211_v14  ;;  %v3472_v35 = vrot.slane %v3456_v15, %v5708_v21 }
0x2e70   :  { %3482 = vadd.xlane.f32.xlu1 %v3481_v18 }
0x2e71   :  { %v3484_v26 = vsel %vm120_vm1, %v3478_v23, 0.0  ;;  %v3480_v27 = vmul.f32 %v3472_v35, %v6216_v25  ;;  %v3487_v29 = vsel %vm120_vm1, %v3479_v16, 0.0 }
0x2e72   :  { %3485 = vadd.xlane.f32.xlu0 %v3484_v26 }
0x2e73   :  { %v3490_v30 = vsel %vm120_vm1, %v3480_v27, 0.0 }
0x2e74   :  { %3488 = vadd.xlane.f32.xlu1 %v3487_v29 }
0x2e76   :  { %3491 = vadd.xlane.f32.xlu0 %v3490_v30 }
0x2ef9   :  { %v3483_v32 = vpop.xlane.xlu1 %3482 }
0x2efa   :  { %v3500_v38 = vrot.slane %v3483_v32, %v5732_v54 }
0x2efb   :  { %v3486_v34 = vpop.xlane.xlu0 %3485 }
0x2efc   :  { %v3504_v39 = vrot.slane %v3486_v34, %v5732_v54 }
0x2efd   :  { %v3489_v40 = vpop.xlane.xlu1 %3488 }
0x2efe   :  { %v3513_v41 = vsel %vm567_vm2, %v3504_v39, %v3500_v38  ;;  %v3508_v42 = vrot.slane %v3489_v40, %v5732_v54 }
0x2eff   :  { %v3492_v43 = vpop.xlane.xlu0 %3491 }
0x2f00   :  { %v3512_v44 = vrot.slane %v3492_v43, %v5732_v54  ;;  %v3514_v49 = vsel %vm569_vm3, %v3508_v42, %v3513_v41  ;;  %v5250_v41 = vld [vmem:[#allocation10 + $0x10] sm:$0xff]  }
0x2f02   :  { %v3515_v50 = vsel %vm571_vm4, %v3512_v44, %v3514_v49 }
0x2f03   :  { %v3517_v51 = vsel %vm574_vm5, %v3515_v50, -inf }
0x2f04   :  { %3518 = vmax.xlane.f32.xlu1 %v3517_v51 }
0x2f8d   :  { %v3519_v52 = vpop.xlane.xlu1 %3518 }
0x2f8e   :  { %v3524_v53 = vrot.slane %v3519_v52, %v5708_v21  ;;  %v3528_v55 = vrot.slane %v3519_v52, %v5742_v5  ;;  %v3532_v56 = vrot.slane %v3519_v52, %v5744_v6  ;;  %v3536_v57 = vrot.slane %v3519_v52, %v5746_v7 }
0x2f90   :  { %v3541_v58 = vsub.f32 %v3483_v32, %v3524_v53  ;;  %v3542_v62 = vsub.f32 %v3486_v34, %v3528_v55  ;;  %v3544_v59 = vsub.f32 %v3492_v43, %v3536_v57  ;;  %v3543_v46 = vsub.f32 %v3489_v40, %v3532_v56  ;;  %v5249_v40 = vld [vmem:[#allocation10 + $0x18] sm:$0xff]  }
0x2f91   :  { %5101 = vmatpush3.bf16.msra.mxu0 %v5249_v40 }
0x2f92   :  { %v3545_v22 = vmul.f32 1.442695, %v3541_v58  ;;  %v3547_v45 = vmul.f32 1.442695, %v3542_v62  ;;  %v3551_v63 = vmul.f32 1.442695, %v3544_v59  ;;  %5102 = vmatprep.subr.bf16.mxu0 %v5570_v0 }
0x2f93   :  { %v3549_v1 = vmul.f32 1.442695, %v3543_v46 }
0x2f94   :  { %5393 = vpow2.f32 %v3545_v22 }
0x2f95   :  { %5395 = vpow2.f32 %v3547_v45  ;;  %5103 = vmatpush3.bf16.msra.mxu0 %v5250_v41 }
0x2f96   :  { %5397 = vpow2.f32 %v3551_v63  ;;  %5116 = vmatprep.subr.bf16.mxu0 %v5570_v0 }
0x2f97   :  { %5399 = vpow2.f32 %v3549_v1 }
0x2fa1   :  { %v5394_v3 = vpop.eup %5393 }
0x2fa2   :  { %v5396_v8 = vpop.eup %5395  ;;  %3558 = vperm.xlu0 %5179, %v5394_v3  }
0x2fa3   :  { %3561 = vperm.xlu1 %5180, %v5396_v8   ;;  %v5398_v12 = vpop.eup %5397 }
0x2fa4   :  { %v5400_v31 = vpop.eup %5399 }
0x2fa6   :  { %3567 = vperm.xlu0 %5179, %v5398_v12  }
0x2fa7   :  { %3564 = vperm.xlu1 %5180, %v5400_v31  }
0x301d   :  { %v3559_v10 = vpop.permute.xlu0 %3558 }
0x301e   :  { %v3562_v4 = vpop.permute.xlu1 %3561  ;;  %v3572_v48 = vrot.slane %v3559_v10, %v5732_v54 }
0x301f   :  { %v3576_v47 = vrot.slane %v3562_v4, %v5732_v54 }
0x3021   :  { %v3568_v13 = vpop.permute.xlu0 %3567  ;;  %v3585_v2 = vsel %vm567_vm2, %v3576_v47, %v3572_v48 }
0x3022   :  { %v3565_v19 = vpop.permute.xlu1 %3564  ;;  %v3584_v11 = vrot.slane %v3568_v13, %v5732_v54 }
0x3023   :  { %v3580_v24 = vrot.slane %v3565_v19, %v5732_v54 }
0x3025   :  { %v3586_v15 = vsel %vm569_vm3, %v3580_v24, %v3585_v2 }
0x3026   :  { %v3587_v18 = vsel %vm571_vm4, %v3584_v11, %v3586_v15 }
0x3027   :  { %v3589_v23 = vsel %vm574_vm5, %v3587_v18, 0.0 }
0x3028   :  { %3590 = vadd.xlane.f32.xlu1 %v3589_v23 }
0x30b1   :  { %v3591_v16 = vpop.xlane.xlu1 %3590 }
0x30b2   :  { %5401 = vrcp.f32 %v3591_v16 }
0x30bf   :  { %v5402_v35 = vpop.eup %5401 }
0x30c0   :  { %v3597_v26 = vrot.slane %v5402_v35, %v5708_v21  ;;  %v3601_v29 = vrot.slane %v5402_v35, %v5742_v5  ;;  %v3605_v32 = vrot.slane %v5402_v35, %v5744_v6  ;;  %v3609_v38 = vrot.slane %v5402_v35, %v5746_v7 }
0x30c2   :  { %v3614_v27 = vmul.f32 %v5394_v3, %v3597_v26  ;;  %v3615_v30 = vmul.f32 %v5396_v8, %v3601_v29  ;;  %v3616_v34 = vmul.f32 %v5400_v31, %v3605_v32  ;;  %v3617_v39 = vmul.f32 %v5398_v12, %v3609_v38 }
0x30c4   :  { %3620 = vperm.xlu0 %5179, %v3614_v27  }
0x30c8   :  { %3625 = vperm.xlu0 %5179, %v3615_v30  }
0x30cc   :  { %3630 = vperm.xlu0 %5179, %v3616_v34  }
0x30d0   :  { %3635 = vperm.xlu0 %5179, %v3617_v39  }
0x313f   :  { %v3621_v42 = vpop.permute.xlu0 %3620 }
0x3140   :  { %v3638_v43 = vmul.f32 %v3621_v42, %v6205_v28  ;;  %v5251_v42 = vld [vmem:[#allocation8 + $0x18] sm:$0xff]  }
0x3142   :  { %v3642_v44 = vsel %vm120_vm1, %v3638_v43, 0.0 }
0x3143   :  { %v3643_v49 = vrot.slane %v3642_v44, 4  ;;  %v3626_v50 = vpop.permute.xlu0 %3625 }
0x3144   :  { %v3639_v51 = vmul.f32 %v3626_v50, %v6209_v9  ;;  %v5254_v50 = vld [vmem:[#allocation8 + $0x30] sm:$0xff]  }
0x3145   :  { %v3644_v52 = vadd.f32 %v3643_v49, %v3642_v44  ;;  %v5252_v44 = vld [vmem:[#allocation8 + $0x10] sm:$0xff]   ;;  %v5253_v49 = vld [vmem:[#allocation8 + $0x38] sm:$0xff]  }
0x3146   :  { %v3649_v53 = vsel %vm120_vm1, %v3639_v51, 0.0  ;;  %v5255_v51 = vld [vmem:[#allocation8 + $0x8] sm:$0xff]  }
0x3147   :  { %v3645_v55 = vrot.slane %v3644_v52, 2  ;;  %v3650_v56 = vrot.slane %v3649_v53, 4  ;;  %v3631_v57 = vpop.permute.xlu0 %3630  ;;  %5109 = vmatpush3.bf16.msra.mxu1 %v5255_v51 }
0x3148   :  { %v3640_v58 = vmul.f32 %v3631_v57, %v6211_v14  ;;  %5110 = vmatprep.subr.bf16.mxu1 %v5570_v0 }
0x3149   :  { %v3651_v62 = vadd.f32 %v3650_v56, %v3649_v53  ;;  %v3646_v46 = vadd.f32 %v3645_v55, %v3644_v52 }
0x314a   :  { %v3656_v59 = vsel %vm120_vm1, %v3640_v58, 0.0 }
0x314b   :  { %v3652_v22 = vrot.slane %v3651_v62, 2  ;;  %v3657_v45 = vrot.slane %v3656_v59, 4  ;;  %v3636_v63 = vpop.permute.xlu0 %3635  ;;  %v3647_v31 = vrot.slane %v3646_v46, 1 }
0x314c   :  { %v3641_v1 = vmul.f32 %v3636_v63, %v6216_v25 }
0x314d   :  { %v3653_v3 = vadd.f32 %v3652_v22, %v3651_v62  ;;  %v3658_v8 = vadd.f32 %v3657_v45, %v3656_v59  ;;  %v3648_v11 = vadd.f32 %v3647_v31, %v3646_v46 }
0x314e   :  { %v3663_v12 = vsel %vm120_vm1, %v3641_v1, 0.0 }
0x314f   :  { %v3654_v10 = vrot.slane %v3653_v3, 1  ;;  %v3659_v4 = vrot.slane %v3658_v8, 2  ;;  %v3664_v47 = vrot.slane %v3663_v12, 4  ;;  %v3670_v16 = vpack.c.bf16 %v3648_v11, %v3648_v11 }
0x3151   :  { %v3655_v48 = vadd.f32 %v3654_v10, %v3653_v3  ;;  %v3660_v13 = vadd.f32 %v3659_v4, %v3658_v8  ;;  %v3665_v19 = vadd.f32 %v3664_v47, %v3663_v12  ;;  %v3738_v32 = vunpack.c.l.b16 %v3670_v16  ;;  %v3805_v3 = vld [vmem:[#allocation2 + $0x14] sm:$0xf] }
0x3153   :  { %v3661_v24 = vrot.slane %v3660_v13, 1  ;;  %v3666_v2 = vrot.slane %v3665_v19, 2  ;;  %v3671_v15 = vpack.c.bf16 %v3655_v48, %v3655_v48 }
0x3155   :  { %v3662_v18 = vadd.f32 %v3661_v24, %v3660_v13  ;;  %v3667_v23 = vadd.f32 %v3666_v2, %v3665_v19  ;;  %v3739_v27 = vunpack.c.l.b16 %v3671_v15 }
0x3157   :  { %v3672_v35 = vpack.c.bf16 %v3662_v18, %v3662_v18  ;;  %v3668_v26 = vrot.slane %v3667_v23, 1  ;;  %v3742_v38 = vsel %vm567_vm2, %v3739_v27, %v3738_v32 }
0x3159   :  { %v3669_v29 = vadd.f32 %v3668_v26, %v3667_v23  ;;  %v3740_v30 = vunpack.c.l.b16 %v3672_v35  ;;  %v5257_v35 = vld [vmem:[#allocation8 + $0x28] sm:$0xff]   ;;  %v5258_v26 = vld [vmem:[#allocation8 + $0x20] sm:$0xff]  }
0x315b   :  { %v3673_v34 = vpack.c.bf16 %v3669_v29, %v3669_v29  ;;  %v3743_v40 = vsel %vm569_vm3, %v3740_v30, %v3742_v38 }
0x315d   :  { %v3741_v39 = vunpack.c.l.b16 %v3673_v34 }
0x315f   :  { %v3744_v41 = vsel %vm571_vm4, %v3741_v39, %v3743_v40 }
0x3160   :  { %v3745_v43 = vpack.c.b16 %v3744_v41, %v3744_v41 }
0x3162   :  { %5105 = vmatmul.mubr.msk.bf16.vlgmr.msra.gmra.mxu0 %vm120_vm1, %v3745_v43 }
0x3163   :  { %5117 = vmatpush3.bf16.msra.mxu0 %v5251_v42  ;;  %5120 = vmatprep.mubr.msk.bf16.mxu0 %vm5571_vm0, %v5570_v0 }
0x3164   :  { %5118 = vmatprep.subr.bf16.mxu0 %v5570_v0 }
0x3167   :  { %5119 = vmatpush3.bf16.msra.mxu0 %v5252_v44 }
0x3168   :  { %5132 = vmatprep.subr.bf16.mxu0 %v5570_v0 }
0x316a   :  { %5121 = vmatmul.mubr.msk.bf16.vlgmr.msra.gmra.mxu0 %vm120_vm1, %v6167_v37  ;;  %v5256_v37 = vld [vmem:[#allocation8] sm:$0xff]  }
0x316b   :  { %5133 = vmatpush3.bf16.msra.mxu0 %v5253_v49  ;;  %5136 = vmatprep.mubr.msk.bf16.mxu0 %vm5571_vm0, %v5570_v0 }
0x316c   :  { %5134 = vmatprep.subr.bf16.mxu0 %v5570_v0  ;;  %5111 = vmatpush3.bf16.msra.mxu1 %v5256_v37 }
0x316d   :  { %5124 = vmatprep.subr.bf16.mxu1 %v5570_v0 }
0x316f   :  { %5135 = vmatpush3.bf16.msra.mxu0 %v5254_v50 }
0x3170   :  { %5148 = vmatprep.subr.bf16.mxu0 %v5570_v0 }
0x3172   :  { %5137 = vmatmul.mubr.msk.bf16.vlgmr.msra.gmra.mxu0 %vm120_vm1, %v6191_v60 }
0x3173   :  { %5152 = vmatprep.mubr.msk.bf16.mxu0 %vm5571_vm0, %v5570_v0 }
0x3222   :  { %v3795_v52 = vpop.f32.mrf.mxu0 }
0x3223   :  { %v3796_v53 = vadd.f32 %v3795_v52, %v6201_v61 }
0x3224   :  { %v5106_v55 = vpop.f32.mrf.mxu0 }
0x3225   :  { %5403 = vtanh.f32 %v3796_v53 }
0x3226   :  { %v3798_v56 = vpop.f32.mrf.mxu0 }
0x3227   :  { %v5259_v56 = vld [vmem:[#allocation10 + $0x8] sm:$0xff]  }
0x3228   :  { %v5107_v57 = vpop.f32.mrf.mxu0 }
0x3229   :  { %v5260_v57 = vld [vmem:[#allocation10 + $0x28] sm:$0xff]  }
0x322a   :  { %v3917_v58 = vpop.f32.mrf.mxu0  ;;  %5149 = vmatpush3.bf16.msra.mxu0 %v5260_v57 }
0x322b   :  { %5150 = vmatprep.subr.bf16.mxu0 %v5570_v0 }
0x322c   :  { %v5122_v60 = vpop.f32.mrf.mxu0 }
0x322d   :  { %v5262_v60 = vld [vmem:[#allocation10 + $0x20] sm:$0xff]  }
0x322e   :  { %v3920_v62 = vpop.f32.mrf.mxu0  ;;  %5151 = vmatpush3.bf16.msra.mxu0 %v5262_v60 }
0x3230   :  { %v5123_v59 = vpop.f32.mrf.mxu0 }
0x3232   :  { %v5404_v46 = vpop.eup %5403  ;;  %v4069_v22 = vpop.f32.mrf.mxu0 }
0x3233   :  { %v3806_v45 = vpack.c.bf16 %v5404_v46, %v5404_v46  ;;  %3803 = vst.msk [vmem:[#allocation11 + $0x10] sm:$0xf] %vm862_vm6, %v5404_v46 }
0x3234   :  { %v5138_v63 = vpop.f32.mrf.mxu0 }
0x3235   :  { %5113 = vmatmul.mubr.msk.bf16.vlgmr.msra.gmra.mxu1 %vm120_vm1, %v3806_v45 }
0x3236   :  { %v4072_v1 = vpop.f32.mrf.mxu0  ;;  %5128 = vmatprep.mubr.msk.bf16.mxu1 %vm5571_vm0, %v5570_v0  ;;  %5125 = vmatpush3.bf16.msra.mxu1 %v5257_v35 }
0x3237   :  { %5126 = vmatprep.subr.bf16.mxu1 %v5570_v0 }
0x3238   :  { %v5139_v61 = vpop.f32.mrf.mxu0 }
0x323a   :  { %5127 = vmatpush3.bf16.msra.mxu1 %v5258_v26 }
0x323b   :  { %5140 = vmatprep.subr.bf16.mxu1 %v5570_v0 }
0x32f5   :  { %v3860_v8 = vpop.f32.mrf.mxu1 }
0x32f6   :  { %v3866_v12 = vadd.f32 %v3860_v8, %v3805_v3 }
0x32f7   :  { %v5114_v31 = vpop.f32.mrf.mxu1 }
0x32f8   :  { %v3923_v10 = vadd.f32 %v3917_v58, %v3866_v12  ;;  %v5261_v58 = vld [vmem:[#allocation10] sm:$0xff]  }
0x32f9   :  { %v3863_v4 = vpop.f32.mrf.mxu1 }
0x32fa   :  { %5405 = vtanh.f32 %v3923_v10  ;;  %v4684_v13 = vmul.f32 -1.442695, %v3923_v10 }
0x32fb   :  { %v5115_v47 = vpop.f32.mrf.mxu1 }
0x32fc   :  { %5407 = vpow2.f32 %v4684_v13 }
0x3307   :  { %v5406_v48 = vpop.eup %5405 }
0x3308   :  { %3933 = vrot.lane.b32.xlu0 %v5406_v48, %s5572_s2 }
0x3309   :  { %v5408_v19 = vpop.eup %5407 }
0x330a   :  { %v3927_v11 = vadd.f32 1.0, %v5408_v19 }
0x330c   :  { %5409 = vrcp.f32 %v3927_v11 }
0x3319   :  { %v5410_v24 = vpop.eup %5409 }
0x331a   :  { %v3931_v18 = vmul.f32 %v5410_v24, %v6160_v20 }
0x337a   :  { %v3934_v2 = vpop.permute.xlu0 %3933 }
0x337b   :  { %v3936_v15 = vmul.f32 %v5410_v24, %v3934_v2 }
0x337d   :  { %3938 = vrot.lane.b32.xlu0 %v3936_v15, %s5572_s2 }
0x33ef   :  { %v3939_v23 = vpop.permute.xlu0 %3938 }
0x33f0   :  { %v3941_v16 = vadd.f32 %v3939_v23, %v3931_v18 }
0x33f2   :  { %5411 = vtanh.f32 %v3941_v16 }
0x33ff   :  { %v5412_v27 = vpop.eup %5411 }
0x3400   :  { %3944 = vrot.lane.b32.xlu0 %v5412_v27, %s5572_s2 }
0x3472   :  { %v3945_v29 = vpop.permute.xlu0 %3944 }
0x3473   :  { %v3947_v30 = vmul.f32 %v5410_v24, %v3945_v29 }
0x3475   :  { %v3949_v32 = vpack.c.bf16 %v3947_v30, %v3947_v30 }
0x3477   :  { %3955 = vrot.lane.b32.xlu0 %v3949_v32, %s5566_s9 }
0x34e9   :  { %v3956_v20 = vpop.permute.xlu0 %3955 }
0x34ea   :  { %5129 = vmatmul.mubr.msk.bf16.vlgmr.msra.gmra.mxu1 %vm120_vm1, %v3956_v20 }
0x34eb   :  { %5144 = vmatprep.mubr.msk.bf16.mxu1 %vm5571_vm0, %v5570_v0  ;;  %5141 = vmatpush3.bf16.msra.mxu1 %v5259_v56 }
0x34ec   :  { %5142 = vmatprep.subr.bf16.mxu1 %v5570_v0 }
0x34ef   :  { %5143 = vmatpush3.bf16.msra.mxu1 %v5261_v58 }
0x34f0   :  { %5156 = vmatprep.subr.bf16.mxu1 %v5570_v0 }
0x35aa   :  { %v4006_v34 = vpop.f32.mrf.mxu1 }
0x35ab   :  { %v4018_v38 = vadd.f32 %v6176_v36, %v4006_v34 }
0x35ac   :  { %v5130_v39 = vpop.f32.mrf.mxu1 }
0x35ad   :  { %v4075_v40 = vadd.f32 %v4069_v22, %v4018_v38 }
0x35ae   :  { %v4009_v41 = vpop.f32.mrf.mxu1 }
0x35af   :  { %5413 = vtanh.f32 %v4075_v40  ;;  %v4692_v44 = vmul.f32 -1.442695, %v4075_v40 }
0x35b0   :  { %v5131_v42 = vpop.f32.mrf.mxu1 }
0x35b1   :  { %5415 = vpow2.f32 %v4692_v44 }
0x35bc   :  { %v5414_v43 = vpop.eup %5413 }
0x35bd   :  { %4085 = vrot.lane.b32.xlu0 %v5414_v43, %s5572_s2 }
0x35be   :  { %v5416_v49 = vpop.eup %5415 }
0x35bf   :  { %v4079_v50 = vadd.f32 1.0, %v5416_v49 }
0x35c1   :  { %5417 = vrcp.f32 %v4079_v50 }
0x35ce   :  { %v5418_v51 = vpop.eup %5417 }
0x35cf   :  { %v4083_v36 = vmul.f32 %v5418_v51, %v6182_v33 }
0x362f   :  { %v4086_v37 = vpop.permute.xlu0 %4085 }
0x3630   :  { %v4088_v52 = vmul.f32 %v5418_v51, %v4086_v37 }
0x3632   :  { %4090 = vrot.lane.b32.xlu1 %v4088_v52, %s5572_s2 }
0x36a4   :  { %v4091_v53 = vpop.permute.xlu1 %4090 }
0x36a5   :  { %v4093_v55 = vadd.f32 %v4091_v53, %v4083_v36 }
0x36a7   :  { %5419 = vtanh.f32 %v4093_v55 }
0x36b4   :  { %v5420_v62 = vpop.eup %5419 }
0x36b5   :  { %4096 = vrot.lane.b32.xlu0 %v5420_v62, %s5572_s2 }
0x3727   :  { %v4097_v33 = vpop.permute.xlu0 %4096 }
0x3728   :  { %v4099_v59 = vmul.f32 %v5418_v51, %v4097_v33 }
0x372a   :  { %v4104_v46 = vpack.c.bf16 %v4099_v59, %v4099_v59 }
0x372c   :  { %4110 = vrot.lane.b32.xlu0 %v4104_v46, %s5566_s9 }
0x379e   :  { %v4111_v22 = vpop.permute.xlu0 %4110 }
0x379f   :  { %5145 = vmatmul.mubr.msk.bf16.vlgmr.msra.gmra.mxu1 %vm120_vm1, %v4111_v22  ;;  %5153 = vmatmul.mubr.msk.bf16.vlgmr.msra.gmra.mxu0 %vm120_vm1, %v4111_v22 }
0x37a0   :  { %5160 = vmatprep.mubr.msk.bf16.mxu1 %vm5571_vm0, %v5570_v0 }
0x385f   :  { %v4161_v45 = vpop.f32.mrf.mxu1  ;;  %v6308_v63 = vpop.f32.mrf.mxu0 }
0x3860   :  { %v4174_v1 = vrot.slane %v4161_v45, %v5703_v17 }
0x3861   :  { %v5146_v61 = vpop.f32.mrf.mxu1  ;;  %v5154_v3 = vpop.f32.mrf.mxu0 }
0x3862   :  { %v4175_v8 = vcombine.high %v4174_v1, %v4174_v1  ;;  %v4182_v12 = vrot.slane %v4174_v1, %v5703_v17 }
0x3863   :  { %v4164_v31 = vpop.f32.mrf.mxu1  ;;  %v4466_v10 = vpop.f32.mrf.mxu0 }
0x3864   :  { %v4189_v4 = vrot.slane %v4175_v8, %v5703_v17  ;;  %v4190_v47 = vcombine.high %v4182_v12, %v4182_v12  ;;  %v4195_v48 = vrot.slane %v4182_v12, %v5708_v21 }
0x3865   :  { %v5147_v13 = vpop.f32.mrf.mxu1  ;;  %v5155_v19 = vpop.f32.mrf.mxu0 }
0x3866   :  { %v4191_v11 = vcombine.high %v4189_v4, %v4189_v4  ;;  %v4212_v24 = vmul.f32 %v4195_v48, %v6205_v28  ;;  %v4199_v2 = vrot.slane %v4189_v4, %v5708_v21  ;;  %v4203_v15 = vrot.slane %v4190_v47, %v5708_v21 }
0x3868   :  { %v4216_v18 = vsel %vm120_vm1, %v4212_v24, 0.0  ;;  %v4213_v23 = vmul.f32 %v4199_v2, %v6209_v9  ;;  %v4214_v16 = vmul.f32 %v4203_v15, %v6211_v14  ;;  %v4207_v17 = vrot.slane %v4191_v11, %v5708_v21 }
0x3869   :  { %4217 = vadd.xlane.f32.xlu0 %v4216_v18 }
0x386a   :  { %v4219_v35 = vsel %vm120_vm1, %v4213_v23, 0.0  ;;  %v4222_v26 = vsel %vm120_vm1, %v4214_v16, 0.0  ;;  %v4215_v27 = vmul.f32 %v4207_v17, %v6216_v25 }
0x386b   :  { %4220 = vadd.xlane.f32.xlu1 %v4219_v35 }
0x386c   :  { %v4225_v29 = vsel %vm120_vm1, %v4215_v27, 0.0  ;;  %v5264_v27 = vld [vmem:[#allocation10 + $0x10] sm:$0xff]  }
0x386d   :  { %4223 = vadd.xlane.f32.xlu0 %v4222_v26  ;;  %v5263_v26 = vld [vmem:[#allocation10 + $0x18] sm:$0xff]  }
0x386e   :  { %5157 = vmatpush3.bf16.msra.mxu1 %v5263_v26 }
0x386f   :  { %5158 = vmatprep.subr.bf16.mxu1 %v5570_v0 }
0x3871   :  { %4226 = vadd.xlane.f32.xlu0 %v4225_v29 }
0x3872   :  { %5159 = vmatpush3.bf16.msra.mxu1 %v5264_v27 }
0x38f2   :  { %v4218_v30 = vpop.xlane.xlu0 %4217 }
0x38f3   :  { %v4235_v38 = vrot.slane %v4218_v30, %v5732_v54 }
0x38f4   :  { %v4221_v32 = vpop.xlane.xlu1 %4220 }
0x38f5   :  { %v4239_v20 = vrot.slane %v4221_v32, %v5732_v54 }
0x38f6   :  { %v4224_v34 = vpop.xlane.xlu0 %4223 }
0x38f7   :  { %v4243_v39 = vrot.slane %v4224_v34, %v5732_v54  ;;  %v4248_v40 = vsel %vm567_vm2, %v4239_v20, %v4235_v38 }
0x38f9   :  { %v4249_v43 = vsel %vm569_vm3, %v4243_v39, %v4248_v40 }
0x38fa   :  { %v4227_v41 = vpop.xlane.xlu0 %4226 }
0x38fb   :  { %v4247_v42 = vrot.slane %v4227_v41, %v5732_v54 }
0x38fd   :  { %v4250_v44 = vsel %vm571_vm4, %v4247_v42, %v4249_v43 }
0x38fe   :  { %v4252_v49 = vsel %vm574_vm5, %v4250_v44, -inf }
0x38ff   :  { %4253 = vmax.xlane.f32.xlu0 %v4252_v49 }
0x3988   :  { %v4254_v50 = vpop.xlane.xlu0 %4253 }
0x3989   :  { %v4259_v51 = vrot.slane %v4254_v50, %v5708_v21  ;;  %v4263_v37 = vrot.slane %v4254_v50, %v5742_v5  ;;  %v4267_v52 = vrot.slane %v4254_v50, %v5744_v6  ;;  %v4271_v55 = vrot.slane %v4254_v50, %v5746_v7 }
0x398b   :  { %v4276_v36 = vsub.f32 %v4218_v30, %v4259_v51  ;;  %v4277_v53 = vsub.f32 %v4221_v32, %v4263_v37  ;;  %v4278_v56 = vsub.f32 %v4224_v34, %v4267_v52  ;;  %v4279_v60 = vsub.f32 %v4227_v41, %v4271_v55 }
0x398d   :  { %v4280_v57 = vmul.f32 1.442695, %v4276_v36  ;;  %v4282_v58 = vmul.f32 1.442695, %v4277_v53  ;;  %v4284_v62 = vmul.f32 1.442695, %v4278_v56 }
0x398e   :  { %v4286_v33 = vmul.f32 1.442695, %v4279_v60 }
0x398f   :  { %5421 = vpow2.f32 %v4280_v57 }
0x3990   :  { %5423 = vpow2.f32 %v4282_v58 }
0x3991   :  { %5425 = vpow2.f32 %v4284_v62 }
0x3992   :  { %5427 = vpow2.f32 %v4286_v33 }
0x399c   :  { %v5422_v59 = vpop.eup %5421 }
0x399d   :  { %v5424_v46 = vpop.eup %5423  ;;  %4293 = vperm.xlu0 %5179, %v5422_v59  }
0x399e   :  { %4296 = vperm.xlu1 %5180, %v5424_v46   ;;  %v5426_v22 = vpop.eup %5425 }
0x399f   :  { %v5428_v45 = vpop.eup %5427 }
0x39a2   :  { %4299 = vperm.xlu1 %5180, %v5426_v22  }
0x39a6   :  { %4302 = vperm.xlu1 %5180, %v5428_v45  }
0x3a18   :  { %v4294_v61 = vpop.permute.xlu0 %4293 }
0x3a19   :  { %v4297_v1 = vpop.permute.xlu1 %4296  ;;  %v4307_v12 = vrot.slane %v4294_v61, %v5732_v54 }
0x3a1a   :  { %v4311_v8 = vrot.slane %v4297_v1, %v5732_v54 }
0x3a1c   :  { %v4320_v4 = vsel %vm567_vm2, %v4311_v8, %v4307_v12 }
0x3a1d   :  { %v4300_v3 = vpop.permute.xlu1 %4299 }
0x3a1e   :  { %v4315_v31 = vrot.slane %v4300_v3, %v5732_v54 }
0x3a20   :  { %v4321_v48 = vsel %vm569_vm3, %v4315_v31, %v4320_v4 }
0x3a21   :  { %v4303_v10 = vpop.permute.xlu1 %4302 }
0x3a22   :  { %v4319_v47 = vrot.slane %v4303_v10, %v5732_v54 }
0x3a24   :  { %v4322_v13 = vsel %vm571_vm4, %v4319_v47, %v4321_v48 }
0x3a25   :  { %v4324_v19 = vsel %vm574_vm5, %v4322_v13, 0.0 }
0x3a26   :  { %4325 = vadd.xlane.f32.xlu0 %v4324_v19 }
0x3aaf   :  { %v4326_v11 = vpop.xlane.xlu0 %4325 }
0x3ab0   :  { %5429 = vrcp.f32 %v4326_v11 }
0x3abd   :  { %v5430_v24 = vpop.eup %5429 }
0x3abe   :  { %v4332_v2 = vrot.slane %v5430_v24, %v5708_v21  ;;  %v4336_v18 = vrot.slane %v5430_v24, %v5742_v5  ;;  %v4340_v16 = vrot.slane %v5430_v24, %v5744_v6  ;;  %v4344_v17 = vrot.slane %v5430_v24, %v5746_v7 }
0x3ac0   :  { %v4349_v15 = vmul.f32 %v5422_v59, %v4332_v2  ;;  %v4350_v23 = vmul.f32 %v5424_v46, %v4336_v18  ;;  %v4351_v54 = vmul.f32 %v5426_v22, %v4340_v16  ;;  %v4352_v35 = vmul.f32 %v5428_v45, %v4344_v17 }
0x3ac2   :  { %4355 = vperm.xlu1 %5180, %v4349_v15  }
0x3ac6   :  { %4360 = vperm.xlu1 %5180, %v4350_v23  }
0x3aca   :  { %4365 = vperm.xlu1 %5180, %v4351_v54  }
0x3ace   :  { %4370 = vperm.xlu1 %5180, %v4352_v35  }
0x3b3d   :  { %v4356_v21 = vpop.permute.xlu1 %4355 }
0x3b3e   :  { %v4373_v5 = vmul.f32 %v4356_v21, %v6205_v28 }
0x3b40   :  { %v4377_v29 = vsel %vm120_vm1, %v4373_v5, 0.0 }
0x3b41   :  { %v4378_v30 = vrot.slane %v4377_v29, 4  ;;  %v4361_v6 = vpop.permute.xlu1 %4360 }
0x3b42   :  { %v4374_v32 = vmul.f32 %v4361_v6, %v6209_v9 }
0x3b43   :  { %v4379_v20 = vadd.f32 %v4378_v30, %v4377_v29 }
0x3b44   :  { %v4384_v7 = vsel %vm120_vm1, %v4374_v32, 0.0 }
0x3b45   :  { %v4380_v34 = vrot.slane %v4379_v20, 2  ;;  %v4385_v38 = vrot.slane %v4384_v7, 4  ;;  %v4366_v39 = vpop.permute.xlu1 %4365 }
0x3b46   :  { %v4375_v40 = vmul.f32 %v4366_v39, %v6211_v14 }
0x3b47   :  { %v4386_v41 = vadd.f32 %v4385_v38, %v4384_v7  ;;  %v4381_v42 = vadd.f32 %v4380_v34, %v4379_v20 }
0x3b48   :  { %v4391_v0 = vsel %vm120_vm1, %v4375_v40, 0.0 }
0x3b49   :  { %v4387_v43 = vrot.slane %v4386_v41, 2  ;;  %v4392_v28 = vrot.slane %v4391_v0, 4  ;;  %v4371_v44 = vpop.permute.xlu1 %4370  ;;  %v4382_v37 = vrot.slane %v4381_v42, 1 }
0x3b4a   :  { %v4376_v49 = vmul.f32 %v4371_v44, %v6216_v25 }
0x3b4b   :  { %v4388_v50 = vadd.f32 %v4387_v43, %v4386_v41  ;;  %v4393_v51 = vadd.f32 %v4392_v28, %v4391_v0  ;;  %v4383_v57 = vadd.f32 %v4382_v37, %v4381_v42 }
0x3b4c   :  { %v4398_v9 = vsel %vm120_vm1, %v4376_v49, 0.0 }
0x3b4d   :  { %v4389_v52 = vrot.slane %v4388_v50, 1  ;;  %v4394_v36 = vrot.slane %v4393_v51, 2  ;;  %v4399_v53 = vrot.slane %v4398_v9, 4  ;;  %v4405_v46 = vpack.c.bf16 %v4383_v57, %v4383_v57 }
0x3b4f   :  { %v4390_v55 = vadd.f32 %v4389_v52, %v4388_v50  ;;  %v4395_v56 = vadd.f32 %v4394_v36, %v4393_v51  ;;  %v4400_v14 = vadd.f32 %v4399_v53, %v4398_v9  ;;  %v4473_v3 = vunpack.c.l.b16 %v4405_v46 }
0x3b51   :  { %v4396_v58 = vrot.slane %v4395_v56, 1  ;;  %v4401_v60 = vrot.slane %v4400_v14, 2  ;;  %v4406_v62 = vpack.c.bf16 %v4390_v55, %v4390_v55 }
0x3b53   :  { %v4397_v33 = vadd.f32 %v4396_v58, %v4395_v56  ;;  %v4402_v59 = vadd.f32 %v4401_v60, %v4400_v14  ;;  %v4474_v45 = vunpack.c.l.b16 %v4406_v62 }
0x3b55   :  { %v4407_v22 = vpack.c.bf16 %v4397_v33, %v4397_v33  ;;  %v4403_v25 = vrot.slane %v4402_v59, 1  ;;  %v4477_v12 = vsel %vm567_vm2, %v4474_v45, %v4473_v3 }
0x3b57   :  { %v4404_v1 = vadd.f32 %v4403_v25, %v4402_v59  ;;  %v4475_v61 = vunpack.c.l.b16 %v4407_v22 }
0x3b59   :  { %v4408_v8 = vpack.c.bf16 %v4404_v1, %v4404_v1  ;;  %v4478_v10 = vsel %vm569_vm3, %v4475_v61, %v4477_v12 }
0x3b5b   :  { %v4476_v31 = vunpack.c.l.b16 %v4408_v8 }
0x3b5d   :  { %v4479_v4 = vsel %vm571_vm4, %v4476_v31, %v4478_v10 }
0x3b5e   :  { %v4480_v47 = vpack.c.b16 %v4479_v4, %v4479_v4 }
0x3b60   :  { %5161 = vmatmul.mubr.msk.bf16.vlgmr.msra.gmra.mxu1 %vm120_vm1, %v4480_v47 }
0x3c20   :  { %v4530_v48 = vpop.f32.mrf.mxu1 }
0x3c21   :  { %v4531_v13 = vadd.f32 %v4530_v48, %v6308_v63 }
0x3c22   :  { %v5162_v19 = vpop.f32.mrf.mxu1 }
0x3c23   :  { %5431 = vtanh.f32 %v4531_v13 }
0x3c24   :  { %v4533_v11 = vpop.f32.mrf.mxu1 }
0x3c26   :  { %v5163_v24 = vpop.f32.mrf.mxu1 }
0x3c30   :  { %v5432_v2 = vpop.eup %5431 }
0x3c31   :  { %4538 = vst.msk [vmem:[#allocation11 + $0x14] sm:$0xf] %vm862_vm6, %v5432_v2 }
0x3c32   :  { %5544 = shalt.err (!%p5541_p1)
}
0x3c33   :  { %4550 = dma.vmem_to_hbm [thread:$0]  %s4545_s28, 384, %s6376_s6, [#allocation4], %s5566_s9, %s5566_s9, %s5567_s10  }
0x3c34   :  { %5559 = dma.done.wait [#allocation4], 384  }
0x3c35   :  { %5560 = vsyncadd [#allocation4], 4294966912 }
0x3c36   :  { %4554 = vsyncpa [#allocation3], 1 }
0x3c37   :  { %4555 = vsyncpa [#allocation6], 1 }
0x3c38   :  { %4556 = vsyncpa [#allocation9], 1 }
0x3c39   :  { %4557 = vsyncpa [#allocation4], 1 }

</bundles_post_ra>
